<compile_context>
chip_gen: v5e
topology: v5e:2x2
jax: 0.10.0
libtpu: 0.0.40
codegen_flags: <defaults>
</compile_context>

<pallas_src>
import jax
import jax.numpy as jnp
from jax.experimental import pallas as pl
from jax.experimental.pallas import tpu as pltpu

LANE = 128  # TPU lane width; channel dims are padded to a multiple of this.


def _round_up(x, m):
    return (x + m - 1) // m * m


def _tpu_vmem_capacity_bytes():
    """Physical VMEM per core; conservative 64 MiB (v7x) if unqueryable."""
    try:
        return int(pltpu.get_tpu_info().vmem_capacity_bytes)
    except Exception:
        return 64 * 1024 * 1024


def _is_v5_family():
    try:
        kind = jax.devices()[0].device_kind.lower()
    except Exception:
        return False
    return "v5" in kind


def _divisors_desc(h, cap):
    return [d for d in range(min(h, cap), 0, -1) if h % d == 0]


def _vmem_footprint_bytes(r, wp, w, cin_t, cout_t):
    """Approximate per-step VMEM working set (inputs/outputs double-buffered)."""
    x_blk = (r + 3) * wp * cin_t * 2      # bf16 flattened input band
    w_blk = 9 * cin_t * cout_t * 2        # bf16 weight tile
    o_blk = r * w * cout_t * 2            # bf16 output band
    acc = r * wp * cout_t * 4             # f32 accumulator (single buffer)
    return 2 * (x_blk + w_blk + o_blk) + acc


def _conv3x3_relu_kernel(x_ref, w_ref, b_ref, o_ref, acc_ref):
    """One (batch, row-band, Cout-tile, Cin-tile) grid step.

    x_ref  : (1, 1, (R+3)*W_pad, Cin_t)  bf16  pre-flattened padded row band
    w_ref  : (3, 3, Cin_t, Cout_t)       bf16  weight tile (HWIO)
    b_ref  : (1, Cout_t)                 f32   bias tile
    o_ref  : (1, R, W, Cout_t)           bf16  output row band
    acc_ref: (R*W_pad, Cout_t)           f32   accumulator, resident over Cin
    """
    ci = pl.program_id(3)
    n_ci = pl.num_programs(3)

    r = o_ref.shape[1]
    w_out = o_ref.shape[2]
    cout_t = o_ref.shape[3]
    wp = acc_ref.shape[0] // r

    @pl.when(ci == 0)
    def _init():
        acc_ref[...] = jnp.zeros_like(acc_ref)

    acc = acc_ref[...]
    # 3x3 conv = 9 shifted (R*W_pad, Cin_t) @ (Cin_t, Cout_t) MXU matmuls.
    # The band is already flattened row-major with W_pad % 8 == 0, so every tap
    # is a static row slice of the same ref (kw=1,2 are merely sublane-shifted).
    # Wrap-around rows only pollute output columns >= W, which are discarded.
    for kh in range(3):
        for kw in range(3):
            off = kh * wp + kw
            tap = x_ref[0, 0, off:off + r * wp, :]
            acc = acc + jnp.dot(tap, w_ref[kh, kw],
                                preferred_element_type=jnp.float32)
    acc_ref[...] = acc

    @pl.when(ci == n_ci - 1)
    def _finalize():
        out = jnp.maximum(acc + b_ref[...], 0.0)          # bias + ReLU in f32
        out = out.reshape(r, wp, cout_t)[:, :w_out, :]    # drop padded columns
        o_ref[...] = out.reshape(1, r, w_out, cout_t).astype(o_ref.dtype)


def conv3x3_relu_nhwc(x_nhwc, weight_oihw, bias, *, band_rows=None,
                      cin_tile=None, cout_tile=None, out_dtype=jnp.bfloat16):
    """3x3 conv (padding=1) + ReLU.  NHWC activations, PyTorch OIHW weights.

    x_nhwc      : (N, H, W, Cin)    float32
    weight_oihw : (Cout, Cin, 3, 3) float32 (nn.Conv2d layout)
    bias        : (Cout,)           float32
    returns     : (N, H, W, Cout)   out_dtype (bf16 by default)
    """
    n, h, w, cin = x_nhwc.shape
    cout = weight_oihw.shape[0]
    assert weight_oihw.shape == (cout, cin, 3, 3)

    cin_p = _round_up(cin, LANE)
    cout_p = _round_up(cout, LANE)
    wp = _round_up(w + 2, 8)          # 1-px halo + pad to a sublane multiple

    # ---- generation-aware budgets -----------------------------------------
    vmem_cap = _tpu_vmem_capacity_bytes()
    vmem_limit = min(vmem_cap * 3 // 4, 112 * 1024 * 1024)   # 96 MiB on 128 MiB
    budget = vmem_limit * 4 // 7                             # ~27 MiB on v7x
    band_cap = 128 if vmem_cap >= (96 << 20) else 32
    v5 = _is_v5_family()

    # Contraction-depth tile: 256 fills the 2x256x256 MXU on v6e/v7x; v5e's
    # 4x128x128 MXU gains nothing from 256, so keep it at 128 there.
    if cin_tile is None:
        cin_tile = 256 if (not v5 and cin_p % 256 == 0) else 128
    cin_tile = min(cin_tile, cin_p)
    assert cin_p % cin_tile == 0

    # Band / Cout-tile selection: prefer fat bands and (at small spatial sizes)
    # wide Cout tiles so each input band is DMA'd fewer times, subject to the
    # per-generation VMEM budget.
    band_cands = [band_rows] if band_rows is not None else _divisors_desc(h, band_cap)
    if cout_tile is not None:
        cout_cands = [cout_tile]
    else:
        cout_cands = [c for c in (512, 256, 128) if c <= cout_p and cout_p % c == 0]
        if v5 and h * w > 64 * 64:
            cout_cands = [c for c in cout_cands if c <= 128]
    r, ct = band_cands[-1], cout_cands[-1]
    done = False
    for rr in band_cands:
        for cc in cout_cands:
            if _vmem_footprint_bytes(rr, wp, w, cin_tile, cc) <= budget:
                r, ct = rr, cc
                done = True
                break
        if done:
            break
    cout_tile = ct
    assert h % r == 0 and cout_p % cout_tile == 0
    n_bands = h // r

    # ---- single fused HBM prep pass ----------------------------------------
    # 1-px spatial halo pad (+1 extra bottom slack row for the last tap slice),
    # width padded to W_pad, channels padded to a lane multiple, bf16 cast, and
    # per-band windows of R+3 rows flattened row-major to ((R+3)*W_pad, Cin_p).
    x_p = jnp.pad(x_nhwc.astype(jnp.bfloat16),
                  ((0, 0), (1, 2), (1, wp - w - 1), (0, cin_p - cin)))
    if n_bands == 1:
        x_bands = x_p[:, None]
    else:
        x_bands = jnp.stack(
            [x_p[:, i * r:i * r + r + 3] for i in range(n_bands)], axis=1)
    x_flat = x_bands.reshape(n, n_bands, (r + 3) * wp, cin_p)

    # Weights -> HWIO, channel-padded, bf16 (tiny one-time parameter prep).
    w_hwio = jnp.pad(
        jnp.transpose(weight_oihw, (2, 3, 1, 0)).astype(jnp.bfloat16),
        ((0, 0), (0, 0), (0, cin_p - cin), (0, cout_p - cout)))
    b_pad = jnp.pad(bias.astype(jnp.float32),
                    (0, cout_p - cout)).reshape(1, cout_p)

    grid = (n, n_bands, cout_p // cout_tile, cin_p // cin_tile)
    n_co = cout_p // cout_tile

    out_itemsize = jnp.dtype(out_dtype).itemsize
    flops = 2 * n * h * w * 9 * cin_p * cout_p
    bytes_accessed = (x_flat.size * 2 * n_co                 # band re-read per Cout tile
                      + w_hwio.size * 2 * n * n_bands
                      + b_pad.size * 4
                      + n * h * w * cout_p * out_itemsize)

    out = pl.pallas_call(
        _conv3x3_relu_kernel,
        out_shape=jax.ShapeDtypeStruct((n, h, w, cout_p), out_dtype),
        grid_spec=pltpu.PrefetchScalarGridSpec(
            num_scalar_prefetch=0,
            grid=grid,
            in_specs=[
                # pre-flattened padded row band
                pl.BlockSpec((1, 1, (r + 3) * wp, cin_tile),
                             lambda bn, bh, bco, bci: (bn, bh, 0, bci)),
                # weight tile (full 3x3, tiled over channels)
                pl.BlockSpec((3, 3, cin_tile, cout_tile),
                             lambda bn, bh, bco, bci: (0, 0, bci, bco)),
                # bias tile
                pl.BlockSpec((1, cout_tile),
                             lambda bn, bh, bco, bci: (0, bco)),
            ],
            out_specs=pl.BlockSpec((1, r, w, cout_tile),
                                   lambda bn, bh, bco, bci: (bn, bh, 0, bco)),
            scratch_shapes=[pltpu.VMEM((r * wp, cout_tile), jnp.float32)],
        ),
        compiler_params=pltpu.CompilerParams(
            # batch / row-band / Cout tiles are independent ("parallel" so a
            # 2-TC chip can shard them even at batch 1); Cin is the innermost
            # accumulator-carried reduction axis.
            dimension_semantics=("parallel", "parallel", "parallel",
                                 "arbitrary"),
            vmem_limit_bytes=int(vmem_limit),
        ),
        cost_estimate=pl.CostEstimate(flops=int(flops), transcendentals=0,
                                      bytes_accessed=int(bytes_accessed)),
    )(x_flat, w_hwio, b_pad)

    # TODO(synk): in a fused UNet16 the lane-padded bf16 layout is carried to
    # the next layer; this slice exists only for the single-layer wrapper.
    return out[..., :cout]


def conv3x3_relu_reference(x_nhwc, weight_oihw, bias):
    w_hwio = jnp.transpose(weight_oihw, (2, 3, 1, 0))
    out = jax.lax.conv_general_dilated(
        x_nhwc, w_hwio, window_strides=(1, 1), padding=((1, 1), (1, 1)),
        dimension_numbers=("NHWC", "HWIO", "NHWC"),
        precision=jax.lax.Precision.HIGHEST)
    out = out + bias.reshape(1, 1, 1, -1)
    return jnp.maximum(out, 0.0)


def _check(x, wt, bs, **kw):
    out = jax.block_until_ready(conv3x3_relu_nhwc(x, wt, bs, **kw))
    ref = conv3x3_relu_reference(x, wt, bs)
    assert out.shape == ref.shape, (out.shape, ref.shape)
    # bf16 MXU inputs / bf16 output with f32 accumulation -> loose tolerance.
    err = float(jnp.max(jnp.abs(out.astype(jnp.float32) - ref)))
    assert err < 5e-2, err
    return out


if __name__ == "__main__":
    key = jax.random.PRNGKey(0)

    # ConvRelu(in_=4, out=8) on a batch-2, 16x16 input (NHWC: 2x16x16x4).
    n, cin, cout, h, w = 2, 4, 8, 16, 16
    k1, k2, k3, k4 = jax.random.split(key, 4)
    x = jax.random.normal(k1, (n, h, w, cin), dtype=jnp.float32)
    bound = 1.0 / (cin * 9) ** 0.5
    wt = jax.random.uniform(k2, (cout, cin, 3, 3), jnp.float32, -bound, bound)
    bs = jax.random.uniform(k3, (cout,), jnp.float32, -bound, bound)

    _check(x, wt, bs)                # default tiling (single row band)
    _check(x, wt, bs, band_rows=8)   # multi-band path (banded prep + halos)

    # Deeper-layer style: >128 channels exercises the Cin-reduction grid axis
    # (accumulator init/finalize) and Cout tiling.
    n2, cin2, cout2, h2, w2 = 1, 256, 256, 8, 16
    k5, k6, k7, k8 = jax.random.split(k4, 4)
    x2 = jax.random.normal(k5, (n2, h2, w2, cin2), dtype=jnp.float32)
    bound2 = 1.0 / (cin2 * 9) ** 0.5
    wt2 = jax.random.uniform(k6, (cout2, cin2, 3, 3), jnp.float32,
                             -bound2, bound2)
    bs2 = jax.random.uniform(k7, (cout2,), jnp.float32, -bound2, bound2)
    _check(x2, wt2, bs2, cin_tile=128, cout_tile=128)

    # Odd spatial size (14x14, as in the VGG pyramid at 224 input) — no W%8
    # restriction anymore.
    n3, cin3, cout3, h3, w3 = 1, 8, 16, 14, 14
    k9, k10, k11 = jax.random.split(k8, 3)
    x3 = jax.random.normal(k9, (n3, h3, w3, cin3), dtype=jnp.float32)
    bound3 = 1.0 / (cin3 * 9) ** 0.5
    wt3 = jax.random.uniform(k10, (cout3, cin3, 3, 3), jnp.float32,
                             -bound3, bound3)
    bs3 = jax.random.uniform(k11, (cout3,), jnp.float32, -bound3, bound3)
    _check(x3, wt3, bs3)

    print("KERNEL_OK")
</pallas_src>

<mosaic_0001>
module attributes {stable_mosaic.version = 11 : i64} {
  func.func @_conv3x3_relu_kernel(%arg0: i32, %arg1: i32, %arg2: i32, %arg3: i32, %arg4: memref<1x1x456x128xbf16, #tpu.memory_space<vmem>>, %arg5: memref<3x3x128x128xbf16, #tpu.memory_space<vmem>>, %arg6: memref<1x128xf32, #tpu.memory_space<vmem>>, %arg7: memref<1x16x16x128xbf16, #tpu.memory_space<vmem>>, %arg8: memref<384x128xf32, #tpu.memory_space<vmem>>) attributes {dimension_semantics = [#tpu.dimension_semantics<parallel>, #tpu.dimension_semantics<parallel>, #tpu.dimension_semantics<parallel>, #tpu.dimension_semantics<arbitrary>], iteration_bounds = array<i64: 2, 1, 1, 1>, scalar_prefetch = 0 : i64, scratch_operands = 1 : i64, tpu.core_type = #tpu.core_type<tc>, window_params = [{transform_indices = @transform_0, window_bounds = array<i64: 1, 1, 456, 128>}, {transform_indices = @transform_1, window_bounds = array<i64: 3, 3, 128, 128>}, {transform_indices = @transform_2, window_bounds = array<i64: 1, 128>}, {transform_indices = @transform_3, window_bounds = array<i64: 1, 16, 16, 128>}]} {
    %c0_i32 = arith.constant 0 : i32
    %0 = arith.cmpi eq, %arg3, %c0_i32 : i32
    %1 = arith.extui %0 : i1 to i32
    %c0_i32_0 = arith.constant 0 : i32
    %2 = arith.cmpi ne, %1, %c0_i32_0 : i32
    scf.if %2 {
      %cst_78 = arith.constant 0.000000e+00 : f32
      %62 = vector.broadcast %cst_78 : f32 to vector<384x128xf32>
      %c0_79 = arith.constant 0 : index
      %c0_80 = arith.constant 0 : index
      %63 = vector.load %arg8[%c0_79, %c0_80] : memref<384x128xf32, #tpu.memory_space<vmem>>, vector<384x128xf32>
      tpu.vector_store %arg8[%c0_79, %c0_80], %62 {strides = array<i32>} : memref<384x128xf32, #tpu.memory_space<vmem>>, vector<384x128xf32>,
    } else {
    }
    %c0 = arith.constant 0 : index
    %c0_1 = arith.constant 0 : index
    %3 = vector.load %arg8[%c0, %c0_1] : memref<384x128xf32, #tpu.memory_space<vmem>>, vector<384x128xf32>
    %c0_2 = arith.constant 0 : index
    %c0_3 = arith.constant 0 : index
    %c0_4 = arith.constant 0 : index
    %c0_5 = arith.constant 0 : index
    %4 = vector.load %arg4[%c0_2, %c0_3, %c0_4, %c0_5] : memref<1x1x456x128xbf16, #tpu.memory_space<vmem>>, vector<1x1x384x128xbf16>
    %5 = vector.shape_cast %4 : vector<1x1x384x128xbf16> to vector<384x128xbf16>
    %c0_6 = arith.constant 0 : index
    %c0_7 = arith.constant 0 : index
    %c0_8 = arith.constant 0 : index
    %c0_9 = arith.constant 0 : index
    %6 = vector.load %arg5[%c0_6, %c0_7, %c0_8, %c0_9] : memref<3x3x128x128xbf16, #tpu.memory_space<vmem>>, vector<1x1x128x128xbf16>
    %7 = vector.shape_cast %6 : vector<1x1x128x128xbf16> to vector<128x128xbf16>
    %cst = arith.constant dense<0.000000e+00> : vector<384x128xf32>
    %8 = tpu.matmul %5, %7, %cst {dimension_numbers = #tpu.dot_dimension_numbers<[1], [0], [0], [1], [0, 0, 1, 1], [], []>} : vector<384x128xbf16>, vector<128x128xbf16>, vector<384x128xf32> -> vector<384x128xf32>
    %9 = arith.addf %3, %8 : vector<384x128xf32>
    %c0_10 = arith.constant 0 : index
    %c0_11 = arith.constant 0 : index
    %c1 = arith.constant 1 : index
    %c0_12 = arith.constant 0 : index
    %10 = vector.load %arg4[%c0_10, %c0_11, %c1, %c0_12] : memref<1x1x456x128xbf16, #tpu.memory_space<vmem>>, vector<1x1x384x128xbf16>
    %11 = vector.shape_cast %10 : vector<1x1x384x128xbf16> to vector<384x128xbf16>
    %c0_13 = arith.constant 0 : index
    %c1_14 = arith.constant 1 : index
    %c0_15 = arith.constant 0 : index
    %c0_16 = arith.constant 0 : index
    %12 = vector.load %arg5[%c0_13, %c1_14, %c0_15, %c0_16] : memref<3x3x128x128xbf16, #tpu.memory_space<vmem>>, vector<1x1x128x128xbf16>
    %13 = vector.shape_cast %12 : vector<1x1x128x128xbf16> to vector<128x128xbf16>
    %cst_17 = arith.constant dense<0.000000e+00> : vector<384x128xf32>
    %14 = tpu.matmul %11, %13, %cst_17 {dimension_numbers = #tpu.dot_dimension_numbers<[1], [0], [0], [1], [0, 0, 1, 1], [], []>} : vector<384x128xbf16>, vector<128x128xbf16>, vector<384x128xf32> -> vector<384x128xf32>
    %15 = arith.addf %9, %14 : vector<384x128xf32>
    %c0_18 = arith.constant 0 : index
    %c0_19 = arith.constant 0 : index
    %c2 = arith.constant 2 : index
    %c0_20 = arith.constant 0 : index
    %16 = vector.load %arg4[%c0_18, %c0_19, %c2, %c0_20] : memref<1x1x456x128xbf16, #tpu.memory_space<vmem>>, vector<1x1x384x128xbf16>
    %17 = vector.shape_cast %16 : vector<1x1x384x128xbf16> to vector<384x128xbf16>
    %c0_21 = arith.constant 0 : index
    %c2_22 = arith.constant 2 : index
    %c0_23 = arith.constant 0 : index
    %c0_24 = arith.constant 0 : index
    %18 = vector.load %arg5[%c0_21, %c2_22, %c0_23, %c0_24] : memref<3x3x128x128xbf16, #tpu.memory_space<vmem>>, vector<1x1x128x128xbf16>
    %19 = vector.shape_cast %18 : vector<1x1x128x128xbf16> to vector<128x128xbf16>
    %cst_25 = arith.constant dense<0.000000e+00> : vector<384x128xf32>
    %20 = tpu.matmul %17, %19, %cst_25 {dimension_numbers = #tpu.dot_dimension_numbers<[1], [0], [0], [1], [0, 0, 1, 1], [], []>} : vector<384x128xbf16>, vector<128x128xbf16>, vector<384x128xf32> -> vector<384x128xf32>
    %21 = arith.addf %15, %20 : vector<384x128xf32>
    %c0_26 = arith.constant 0 : index
    %c0_27 = arith.constant 0 : index
    %c24 = arith.constant 24 : index
    %c0_28 = arith.constant 0 : index
    %22 = vector.load %arg4[%c0_26, %c0_27, %c24, %c0_28] : memref<1x1x456x128xbf16, #tpu.memory_space<vmem>>, vector<1x1x384x128xbf16>
    %23 = vector.shape_cast %22 : vector<1x1x384x128xbf16> to vector<384x128xbf16>
    %c1_29 = arith.constant 1 : index
    %c0_30 = arith.constant 0 : index
    %c0_31 = arith.constant 0 : index
    %c0_32 = arith.constant 0 : index
    %24 = vector.load %arg5[%c1_29, %c0_30, %c0_31, %c0_32] : memref<3x3x128x128xbf16, #tpu.memory_space<vmem>>, vector<1x1x128x128xbf16>
    %25 = vector.shape_cast %24 : vector<1x1x128x128xbf16> to vector<128x128xbf16>
    %cst_33 = arith.constant dense<0.000000e+00> : vector<384x128xf32>
    %26 = tpu.matmul %23, %25, %cst_33 {dimension_numbers = #tpu.dot_dimension_numbers<[1], [0], [0], [1], [0, 0, 1, 1], [], []>} : vector<384x128xbf16>, vector<128x128xbf16>, vector<384x128xf32> -> vector<384x128xf32>
    %27 = arith.addf %21, %26 : vector<384x128xf32>
    %c0_34 = arith.constant 0 : index
    %c0_35 = arith.constant 0 : index
    %c25 = arith.constant 25 : index
    %c0_36 = arith.constant 0 : index
    %28 = vector.load %arg4[%c0_34, %c0_35, %c25, %c0_36] : memref<1x1x456x128xbf16, #tpu.memory_space<vmem>>, vector<1x1x384x128xbf16>
    %29 = vector.shape_cast %28 : vector<1x1x384x128xbf16> to vector<384x128xbf16>
    %c1_37 = arith.constant 1 : index
    %c1_38 = arith.constant 1 : index
    %c0_39 = arith.constant 0 : index
    %c0_40 = arith.constant 0 : index
    %30 = vector.load %arg5[%c1_37, %c1_38, %c0_39, %c0_40] : memref<3x3x128x128xbf16, #tpu.memory_space<vmem>>, vector<1x1x128x128xbf16>
    %31 = vector.shape_cast %30 : vector<1x1x128x128xbf16> to vector<128x128xbf16>
    %cst_41 = arith.constant dense<0.000000e+00> : vector<384x128xf32>
    %32 = tpu.matmul %29, %31, %cst_41 {dimension_numbers = #tpu.dot_dimension_numbers<[1], [0], [0], [1], [0, 0, 1, 1], [], []>} : vector<384x128xbf16>, vector<128x128xbf16>, vector<384x128xf32> -> vector<384x128xf32>
    %33 = arith.addf %27, %32 : vector<384x128xf32>
    %c0_42 = arith.constant 0 : index
    %c0_43 = arith.constant 0 : index
    %c26 = arith.constant 26 : index
    %c0_44 = arith.constant 0 : index
    %34 = vector.load %arg4[%c0_42, %c0_43, %c26, %c0_44] : memref<1x1x456x128xbf16, #tpu.memory_space<vmem>>, vector<1x1x384x128xbf16>
    %35 = vector.shape_cast %34 : vector<1x1x384x128xbf16> to vector<384x128xbf16>
    %c1_45 = arith.constant 1 : index
    %c2_46 = arith.constant 2 : index
    %c0_47 = arith.constant 0 : index
    %c0_48 = arith.constant 0 : index
    %36 = vector.load %arg5[%c1_45, %c2_46, %c0_47, %c0_48] : memref<3x3x128x128xbf16, #tpu.memory_space<vmem>>, vector<1x1x128x128xbf16>
    %37 = vector.shape_cast %36 : vector<1x1x128x128xbf16> to vector<128x128xbf16>
    %cst_49 = arith.constant dense<0.000000e+00> : vector<384x128xf32>
    %38 = tpu.matmul %35, %37, %cst_49 {dimension_numbers = #tpu.dot_dimension_numbers<[1], [0], [0], [1], [0, 0, 1, 1], [], []>} : vector<384x128xbf16>, vector<128x128xbf16>, vector<384x128xf32> -> vector<384x128xf32>
    %39 = arith.addf %33, %38 : vector<384x128xf32>
    %c0_50 = arith.constant 0 : index
    %c0_51 = arith.constant 0 : index
    %c48 = arith.constant 48 : index
    %c0_52 = arith.constant 0 : index
    %40 = vector.load %arg4[%c0_50, %c0_51, %c48, %c0_52] : memref<1x1x456x128xbf16, #tpu.memory_space<vmem>>, vector<1x1x384x128xbf16>
    %41 = vector.shape_cast %40 : vector<1x1x384x128xbf16> to vector<384x128xbf16>
    %c2_53 = arith.constant 2 : index
    %c0_54 = arith.constant 0 : index
    %c0_55 = arith.constant 0 : index
    %c0_56 = arith.constant 0 : index
    %42 = vector.load %arg5[%c2_53, %c0_54, %c0_55, %c0_56] : memref<3x3x128x128xbf16, #tpu.memory_space<vmem>>, vector<1x1x128x128xbf16>
    %43 = vector.shape_cast %42 : vector<1x1x128x128xbf16> to vector<128x128xbf16>
    %cst_57 = arith.constant dense<0.000000e+00> : vector<384x128xf32>
    %44 = tpu.matmul %41, %43, %cst_57 {dimension_numbers = #tpu.dot_dimension_numbers<[1], [0], [0], [1], [0, 0, 1, 1], [], []>} : vector<384x128xbf16>, vector<128x128xbf16>, vector<384x128xf32> -> vector<384x128xf32>
    %45 = arith.addf %39, %44 : vector<384x128xf32>
    %c0_58 = arith.constant 0 : index
    %c0_59 = arith.constant 0 : index
    %c49 = arith.constant 49 : index
    %c0_60 = arith.constant 0 : index
    %46 = vector.load %arg4[%c0_58, %c0_59, %c49, %c0_60] : memref<1x1x456x128xbf16, #tpu.memory_space<vmem>>, vector<1x1x384x128xbf16>
    %47 = vector.shape_cast %46 : vector<1x1x384x128xbf16> to vector<384x128xbf16>
    %c2_61 = arith.constant 2 : index
    %c1_62 = arith.constant 1 : index
    %c0_63 = arith.constant 0 : index
    %c0_64 = arith.constant 0 : index
    %48 = vector.load %arg5[%c2_61, %c1_62, %c0_63, %c0_64] : memref<3x3x128x128xbf16, #tpu.memory_space<vmem>>, vector<1x1x128x128xbf16>
    %49 = vector.shape_cast %48 : vector<1x1x128x128xbf16> to vector<128x128xbf16>
    %cst_65 = arith.constant dense<0.000000e+00> : vector<384x128xf32>
    %50 = tpu.matmul %47, %49, %cst_65 {dimension_numbers = #tpu.dot_dimension_numbers<[1], [0], [0], [1], [0, 0, 1, 1], [], []>} : vector<384x128xbf16>, vector<128x128xbf16>, vector<384x128xf32> -> vector<384x128xf32>
    %51 = arith.addf %45, %50 : vector<384x128xf32>
    %c0_66 = arith.constant 0 : index
    %c0_67 = arith.constant 0 : index
    %c50 = arith.constant 50 : index
    %c0_68 = arith.constant 0 : index
    %52 = vector.load %arg4[%c0_66, %c0_67, %c50, %c0_68] : memref<1x1x456x128xbf16, #tpu.memory_space<vmem>>, vector<1x1x384x128xbf16>
    %53 = vector.shape_cast %52 : vector<1x1x384x128xbf16> to vector<384x128xbf16>
    %c2_69 = arith.constant 2 : index
    %c2_70 = arith.constant 2 : index
    %c0_71 = arith.constant 0 : index
    %c0_72 = arith.constant 0 : index
    %54 = vector.load %arg5[%c2_69, %c2_70, %c0_71, %c0_72] : memref<3x3x128x128xbf16, #tpu.memory_space<vmem>>, vector<1x1x128x128xbf16>
    %55 = vector.shape_cast %54 : vector<1x1x128x128xbf16> to vector<128x128xbf16>
    %cst_73 = arith.constant dense<0.000000e+00> : vector<384x128xf32>
    %56 = tpu.matmul %53, %55, %cst_73 {dimension_numbers = #tpu.dot_dimension_numbers<[1], [0], [0], [1], [0, 0, 1, 1], [], []>} : vector<384x128xbf16>, vector<128x128xbf16>, vector<384x128xf32> -> vector<384x128xf32>
    %57 = arith.addf %51, %56 : vector<384x128xf32>
    %c0_74 = arith.constant 0 : index
    %c0_75 = arith.constant 0 : index
    %58 = vector.load %arg8[%c0_74, %c0_75] : memref<384x128xf32, #tpu.memory_space<vmem>>, vector<384x128xf32>
    tpu.vector_store %arg8[%c0_74, %c0_75], %57 {strides = array<i32>} : memref<384x128xf32, #tpu.memory_space<vmem>>, vector<384x128xf32>,
    %c0_i32_76 = arith.constant 0 : i32
    %59 = arith.cmpi eq, %arg3, %c0_i32_76 : i32
    %60 = arith.extui %59 : i1 to i32
    %c0_i32_77 = arith.constant 0 : i32
    %61 = arith.cmpi ne, %60, %c0_i32_77 : i32
    scf.if %61 {
      %c0_78 = arith.constant 0 : index
      %c0_79 = arith.constant 0 : index
      %62 = vector.load %arg6[%c0_78, %c0_79] : memref<1x128xf32, #tpu.memory_space<vmem>>, vector<1x128xf32>
      %63 = vector.broadcast %62 : vector<1x128xf32> to vector<384x128xf32>
      %64 = arith.addf %57, %63 : vector<384x128xf32>
      %cst_80 = arith.constant 0.000000e+00 : f32
      %65 = vector.broadcast %cst_80 : f32 to vector<384x128xf32>
      %66 = arith.maximumf %64, %65 : vector<384x128xf32>
      %67 = vector.shape_cast %66 : vector<384x128xf32> to vector<16x24x128xf32>
      %68 = vector.extract_strided_slice %67 {offsets = [0, 0, 0], sizes = [16, 16, 128], strides = [1, 1, 1]} : vector<16x24x128xf32> to vector<16x16x128xf32>
      %69 = vector.shape_cast %68 : vector<16x16x128xf32> to vector<1x16x16x128xf32>
      %70 = arith.truncf %69 : vector<1x16x16x128xf32> to vector<1x16x16x128xbf16>
      %c0_81 = arith.constant 0 : index
      %c0_82 = arith.constant 0 : index
      %c0_83 = arith.constant 0 : index
      %c0_84 = arith.constant 0 : index
      %71 = vector.load %arg7[%c0_81, %c0_82, %c0_83, %c0_84] : memref<1x16x16x128xbf16, #tpu.memory_space<vmem>>, vector<1x16x16x128xbf16>
      tpu.vector_store %arg7[%c0_81, %c0_82, %c0_83, %c0_84], %70 {strides = array<i32>} : memref<1x16x16x128xbf16, #tpu.memory_space<vmem>>, vector<1x16x16x128xbf16>,
    } else {
    }
    return
  }
  func.func @transform_0(%arg0: i32, %arg1: i32, %arg2: i32, %arg3: i32) -> (i32, i32, i32, i32) {
    %c0_i32 = arith.constant 0 : i32
    %c0_i32_0 = arith.constant 0 : i32
    return %arg0, %arg1, %c0_i32, %arg3 : i32, i32, i32, i32
  }
  func.func @transform_1(%arg0: i32, %arg1: i32, %arg2: i32, %arg3: i32) -> (i32, i32, i32, i32) {
    %c0_i32 = arith.constant 0 : i32
    %c0_i32_0 = arith.constant 0 : i32
    %c0_i32_1 = arith.constant 0 : i32
    return %c0_i32, %c0_i32_0, %arg3, %arg2 : i32, i32, i32, i32
  }
  func.func @transform_2(%arg0: i32, %arg1: i32, %arg2: i32, %arg3: i32) -> (i32, i32) {
    %c0_i32 = arith.constant 0 : i32
    %c0_i32_0 = arith.constant 0 : i32
    return %c0_i32, %arg2 : i32, i32
  }
  func.func @transform_3(%arg0: i32, %arg1: i32, %arg2: i32, %arg3: i32) -> (i32, i32, i32, i32) {
    %c0_i32 = arith.constant 0 : i32
    %c0_i32_0 = arith.constant 0 : i32
    return %arg0, %arg1, %c0_i32, %arg2 : i32, i32, i32, i32
  }
}

</mosaic_0001>

<bundles_post_ra>
// kernel: tpu_custom_call.1
= control target key start
LH: loop header
LB: loop body
LE: loop exit
PB: predicated region body
PF: predicated region fallthrough
CT: control target
= control target key end

     0   :  { %8 = vsyncpa [#allocation4], 0  ;;  %s7141_s0 = inlined_call_operand.hbm [shape: bf16[2,1,456,128], index: 0, kind: input, shape index: {}]   ;;  %s7142_s1 = inlined_call_operand.hbm [shape: bf16[3,3,128,128], index: 1, kind: input, shape index: {}]   ;;  %s7143_s2 = inlined_call_operand.vmem [shape: f32[1,128], index: 2, kind: input, shape index: {}]   ;;  %s7144_s3 = inlined_call_operand.hbm [shape: bf16[2,16,16,128], index: 3, kind: output, shape index: {}]  }
   0x1   :  { %10 = vsyncpa [#allocation4 + $0x1], 0 }
   0x2   :  { %11 = vsyncpa [#allocation7], 0 }
   0x3   :  { %12 = vsyncpa [#allocation5], 0 }
   0x4   :  { %14 = vsyncpa [#allocation5 + $0x1], 0  ;;  %s6354_s12 = smov 0   ;;  %s6356_s13 = smov 0  }
   0x5   :  { %s6358_s14 = smov 0   ;;  %s6360_s15 = smov 0  }
   0x6   :  { %s6362_s16 = smov 0   ;;  %s6364_s17 = smov 0  }
   0x7 LB: > { %s4858_s18 = sadd.s32 4294967295, %s6327_s17   ;;  %s4859_s19 = sadd.s32 4294967294, %s6327_s17   ;;  %s6327_s17 = sphi %s6364_s17, %s20_s17   ;;  %s6323_s16 = sphi %s6362_s16, %s7155_s16   ;;  %s6319_s15 = sphi %s6360_s15, %s7154_s15   ;;  %s6315_s14 = sphi %s6358_s14, %s7153_s14   ;;  %s6311_s13 = sphi %s6356_s13, %s7152_s13   ;;  %s6307_s12 = sphi %s6354_s12, %s7151_s12  }
   0x8   : > { %p70_p0 = scmp.ne.s32.totalorder %s6311_s13, %s6307_s12  ;;  %p6388_p1 = scmp.eq.s32.totalorder %s4858_s18, 0 }
   0x9   : > { %p6392_p2 = scmp.eq.s32.totalorder %s4858_s18, 1  ;;  %p158_p3 = scmp.eq.s32.totalorder %s4859_s19, 1 }
   0xa   : > { %p6398_p4 = por %p6388_p1, %p70_p0  ;;  %p4860_p5 = scmp.ge.s32.totalorder %s6327_s17, 1 }
   0xb   : > { %p6403_p6 = por %p158_p3, %p70_p0  ;;  %p165_p7 = scmp.lt.s32.totalorder %s6327_s17, 3 }
   0xc   : > { %s180_s26 = sshll.u32 %s7142_s1, 4  ;;  %s6329_s28 = smov [#allocation6]   ;;  %s181_s26 = int_to_ptr.hbm [resolvable:$true] %s180_s26 }
   0xd   : > { %p6411_p8 = pnand %p4860_p5, %p165_p7  ;;  %s182_s29 = sshll.u32 %s6329_s28, 4  ;;  %s183_s29 = int_to_ptr.vmem [resolvable:$true] %s182_s29 }
   0xe   : > { %p4863_p11 = scmp.ge.s32.totalorder %s6327_s17, 2  ;;  %s6330_s30 = smov 64  }
   0xf   : > { %p6084_p9 = pneg %p6411_p8  ;;  %s6331_s4 = smov 4  }
  0x10   : > { %s46_s5 = sadd.s32 1, %s6323_s16  ;;  %s57_s6 = sadd.s32 1, %s6315_s14 }
  0x11   : > { %p6085_p10 = pnand %p6084_p9, %p6388_p1  ;;  %p48_p12 = scmp.ge.s32.totalorder %s46_s5, 2 }
  0x12   : > { %p64_p13 = scmp.ne.s32.totalorder %s6315_s14, %s6311_s13  ;;  %p65_p0 = scmp.eq.s32.totalorder %s6327_s17, 0 }
  0x13   : > { %6087 = dma.hbm_to_vmem [thread:$0]  (!%p6085_p10), %s181_s26, 9216, %s183_s29, [#allocation7], %s6330_s30, %s6330_s30, %s6331_s4  }
  0x14   : > { %s7157_s5 = smov (%p48_p12, %s46_s5), 0  ;;  %p66_p3 = por %p65_p0, %p64_p13 }
  0x15   : > { %p6432_p5 = por %p6392_p2, %p64_p13  ;;  %s50_s8 = ssub.s32 %s6323_s16, %s7157_s5 }
  0x16   : > { %p6097_p7 = scmp.lt.s32.totalorder %s6327_s17, 2  ;;  %p55_p9 = scmp.eq.s32.totalorder %s50_s8, 0 }
  0x17   : > { %s202_s9 = sand.u32 1, %s6315_s14   ;;  %s6074_s18 = smul.u32 228, %s6323_s16 }
  0x18   : > { %s6073_s10 = smul.u32 228, %s202_s9  ;;  %p6089_p10 = pnand %p6097_p7, %p66_p3 }
  0x19   : > { %s6441_s11 = scalar_select %p55_p9, %s6315_s14, %s57_s6  }
  0x1a   : > { %s206_s19 = scalar_lea.vmem [#allocation3], %s6073_s10  ;;  %s214_s28 = scalar_lea.hbm %s7141_s0, %s6074_s18 }
  0x1b   : > { %s217_s24 = sshll.u32 %s206_s19, 4  ;;  %s215_s21 = sshll.u32 %s214_s28, 4  ;;  %s218_s24 = int_to_ptr.vmem [resolvable:$true] %s217_s24  ;;  %s216_s21 = int_to_ptr.hbm [resolvable:$true] %s215_s21 }
  0x1c   : > { %s203_s29 = scalar_lea.sflag [#allocation4], %s202_s9  ;;  %229 = sbr.rel (%p6411_p8) target bundleno = 1065 (0x429), region = 32 }
  0x1d   : > { %6091 = dma.hbm_to_vmem [thread:$0]  (!%p6089_p10), %s216_s21, 3648, %s218_s24, %s203_s29, %s6330_s30, %s6330_s30, %s6331_s4  }
  0x1e   : > { %s6453_s6 = sand.u32 (!%p6411_p8), 1, %s6311_s13  }
  0x1f   : > { %s6075_s8 = smul.u32 (!%p6411_p8), 228, %s6453_s6  ;;  %s232_s10 = scalar_lea.sflag (!%p6411_p8), [#allocation4], %s6453_s6 }
  0x21   : > { %s6457_s18 = scalar_lea.vmem [#allocation3], %s6075_s8 }
  0x22   : > { %6294 = dma.done.wait (%p6398_p4), %s232_s10, 3648  }
  0x23   : > { %6296 = vsyncadd (%p6398_p4), %s232_s10, 4294963648 }
  0x24   : > { %6298 = dma.done.wait (%p6388_p1), [#allocation7], 9216  }
  0x25   : > { %6300 = vsyncadd (%p6388_p1), [#allocation7], 4294958080  ;;  %v5756_v0 = vld [vmem:[#allocation6 + $0x38] sm:$0xff]  ;;  %v5755_v1 = vld [vmem:[#allocation6 + $0x30] sm:$0xff]  ;;  %vm994_vm0 = vsmask.f32 7424 }
  0x26   : > { %6049 = vmatpush.bf16.msra.mxu1 %v5756_v0  ;;  %6050 = vmatpush.bf16.msra.mxu2 %v5756_v0  ;;  %v5754_v2 = vld [vmem:[#allocation6 + $0x28] sm:$0xff]  ;;  %v5753_v3 = vld [vmem:[#allocation6 + $0x20] sm:$0xff]  ;;  %v5752_v4 = vld [vmem:[#allocation6 + $0x18] sm:$0xff]  ;;  %vm1461_vm1 = vcmask 1046528   ;;  %s4867_s27 = sshll.u32 %s6453_s6, 7  ;;  %s5938_s19 = sshll.u32 %s6319_s15, 7 }
  0x27   : > { %6051 = vmatpush.bf16.msra.mxu3 %v5756_v0  ;;  %628 = vmatpush.bf16.msra.mxu0 %v5756_v0  ;;  %v5751_v5 = vld [vmem:[#allocation6 + $0x10] sm:$0xff]  ;;  %v5750_v6 = vld [vmem:[#allocation6 + $0x8] sm:$0xff]  ;;  %v5749_v7 = vld [vmem:[#allocation6] sm:$0xff]  ;;  %s6929_s30 = scalar_lea.vmem [#allocation8], %s4867_s27  ;;  %s4733_s26 = scalar_lea.hbm %s7144_s3, %s5938_s19 }
  0x28   : > { %v5795_v8 = vld [vmem:[#allocation6 + $0xb8] sm:$0xff]  ;;  %v5731_v10 = vld [vmem:[%s6457_s18 + $0x30] sm:$0xff]  ;;  %v5792_v24 = vld [vmem:[#allocation6 + $0xa0] sm:$0xff]  ;;  %s4734_s28 = sshll.u32 %s6929_s30, 4  ;;  %s4736_s21 = sshll.u32 %s4733_s26, 4  ;;  %s4735_s28 = int_to_ptr.vmem [resolvable:$true] %s4734_s28  ;;  %s4737_s21 = int_to_ptr.hbm [resolvable:$true] %s4736_s21 }
  0x29   : > { %v5827_v9 = vld [vmem:[#allocation6 + $0xf8] sm:$0xff]  ;;  %v5743_v12 = vld [vmem:[%s6457_s18 + $0x90] sm:$0xff]  ;;  %v5824_v25 = vld [vmem:[#allocation6 + $0xe0] sm:$0xff]  ;;  %s4718_s15 = scalar_lea.sflag [#allocation5], %s6453_s6  ;;  %s6255_s29 = sshra.s32 %s4737_s21, 4  ;;  %s6256_s29 = int_to_ptr.hbm [resolvable:$true] %s6255_s29 }
  0x2a   : > { %6052 = vmatpush.bf16.msra.mxu1 %v5755_v1  ;;  %6053 = vmatpush.bf16.msra.mxu2 %v5755_v1  ;;  %v5737_v11 = vld [vmem:[%s6457_s18 + $0x60] sm:$0xff]  ;;  %v5794_v16 = vld [vmem:[#allocation6 + $0xb0] sm:$0xff]  ;;  %v5793_v20 = vld [vmem:[#allocation6 + $0xa8] sm:$0xff]  ;;  %s6257_s8 = scalar_lea.hbm %s6256_s29, 128  ;;  %s6261_s20 = scalar_lea.hbm %s7144_s3, 256 }
  0x2b   : > { %6054 = vmatpush.bf16.msra.mxu3 %v5755_v1  ;;  %629 = vmatpush.bf16.msra.mxu0 %v5755_v1  ;;  %v5725_v13 = vld [vmem:[%s6457_s18] sm:$0xff]  ;;  %v5826_v17 = vld [vmem:[#allocation6 + $0xf0] sm:$0xff]  ;;  %v5825_v21 = vld [vmem:[#allocation6 + $0xe8] sm:$0xff]  ;;  %p6258_p1 = scmp.ne.s32.totalorder %s6256_s29, %s6257_s8  ;;  %p6262_p8 = scmp.lt.s32.totalorder %s6256_s29, %s7144_s3 }
  0x2c   : > { %v5787_v14 = vld [vmem:[#allocation6 + $0x78] sm:$0xff]  ;;  %v5786_v18 = vld [vmem:[#allocation6 + $0x70] sm:$0xff]  ;;  %v5785_v22 = vld [vmem:[#allocation6 + $0x68] sm:$0xff]  ;;  %p6263_p12 = scmp.lt.s32.totalorder %s6261_s20, %s6257_s8 }
  0x2d   : > { %v5858_v15 = vld [vmem:[#allocation6 + $0x138] sm:$0xff]  ;;  %v5857_v19 = vld [vmem:[#allocation6 + $0x130] sm:$0xff]  ;;  %v5856_v23 = vld [vmem:[#allocation6 + $0x128] sm:$0xff]  ;;  %p6259_p2 = pnand %p6258_p1, %p6432_p5 }
  0x2e   : > { %6055 = vmatpush.bf16.msra.mxu1 %v5754_v2  ;;  %6056 = vmatpush.bf16.msra.mxu2 %v5754_v2  ;;  %v5784_v26 = vld [vmem:[#allocation6 + $0x60] sm:$0xff]  ;;  %v5732_v28 = vld [vmem:[%s6457_s18 + $0x38] sm:$0xff]  ;;  %v5739_v39 = vld [vmem:[%s6457_s18 + $0x70] sm:$0xff]  ;;  %p6264_p13 = por %p6263_p12, %p6262_p8 }
  0x2f   : > { %6057 = vmatpush.bf16.msra.mxu3 %v5754_v2  ;;  %630 = vmatpush.bf16.msra.mxu0 %v5754_v2  ;;  %v5855_v27 = vld [vmem:[#allocation6 + $0x120] sm:$0xff]  ;;  %v5744_v30 = vld [vmem:[%s6457_s18 + $0x98] sm:$0xff]  ;;  %v5727_v41 = vld [vmem:[%s6457_s18 + $0x10] sm:$0xff]  ;;  %p6260_p4 = pneg %p6259_p2 }
  0x30   : > { %v5738_v29 = vld [vmem:[%s6457_s18 + $0x68] sm:$0xff]  ;;  %v5791_v32 = vld [vmem:[#allocation6 + $0x98] sm:$0xff]  ;;  %v5790_v36 = vld [vmem:[#allocation6 + $0x90] sm:$0xff] }
  0x31   : > { %v5726_v31 = vld [vmem:[%s6457_s18 + $0x8] sm:$0xff]  ;;  %v5823_v33 = vld [vmem:[#allocation6 + $0xd8] sm:$0xff]  ;;  %v5822_v37 = vld [vmem:[#allocation6 + $0xd0] sm:$0xff]  ;;  %p6265_p0 = pnand %p6264_p13, %p6260_p4 }
  0x32   : > { %6058 = vmatpush.bf16.msra.mxu1 %v5753_v3  ;;  %6059 = vmatpush.bf16.msra.mxu2 %v5753_v3  ;;  %v5783_v34 = vld [vmem:[#allocation6 + $0x58] sm:$0xff]  ;;  %v5782_v42 = vld [vmem:[#allocation6 + $0x50] sm:$0xff]  ;;  %v5789_v44 = vld [vmem:[#allocation6 + $0x88] sm:$0xff] }
  0x33   : > { %6060 = vmatpush.bf16.msra.mxu3 %v5753_v3  ;;  %631 = vmatpush.bf16.msra.mxu0 %v5753_v3  ;;  %v5854_v35 = vld [vmem:[#allocation6 + $0x118] sm:$0xff]  ;;  %v5853_v43 = vld [vmem:[#allocation6 + $0x110] sm:$0xff]  ;;  %v5821_v45 = vld [vmem:[#allocation6 + $0xc8] sm:$0xff] }
  0x34   : > { %v5733_v38 = vld [vmem:[%s6457_s18 + $0x40] sm:$0xff]  ;;  %v5781_v46 = vld [vmem:[#allocation6 + $0x48] sm:$0xff]  ;;  %v5740_v48 = vld [vmem:[%s6457_s18 + $0x78] sm:$0xff] }
  0x35   : > { %v5745_v40 = vld [vmem:[%s6457_s18 + $0xa0] sm:$0xff]  ;;  %v5734_v47 = vld [vmem:[%s6457_s18 + $0x48] sm:$0xff]  ;;  %v5728_v50 = vld [vmem:[%s6457_s18 + $0x18] sm:$0xff] }
  0x36   : > { %6061 = vmatpush.bf16.msra.mxu1 %v5752_v4  ;;  %6062 = vmatpush.bf16.msra.mxu2 %v5752_v4  ;;  %v5746_v49 = vld [vmem:[%s6457_s18 + $0xa8] sm:$0xff]  ;;  %v5735_v56 = vld [vmem:[%s6457_s18 + $0x50] sm:$0xff]  ;;  %v5741_v57 = vld [vmem:[%s6457_s18 + $0x80] sm:$0xff] }
  0x37   : > { %6063 = vmatpush.bf16.msra.mxu3 %v5752_v4  ;;  %632 = vmatpush.bf16.msra.mxu0 %v5752_v4  ;;  %v5852_v51 = vld [vmem:[#allocation6 + $0x108] sm:$0xff]  ;;  %v5788_v52 = vld [vmem:[#allocation6 + $0x80] sm:$0xff]  ;;  %v5898_v60 = vld [vmem:[#allocation6 + $0x1b8] sm:$0xff] }
  0x38   : > { %v5820_v53 = vld [vmem:[#allocation6 + $0xc0] sm:$0xff]  ;;  %v5747_v58 = vld [vmem:[%s6457_s18 + $0xb0] sm:$0xff]  ;;  %v5929_v61 = vld [vmem:[#allocation6 + $0x1f8] sm:$0xff] }
  0x39   : > { %v5780_v54 = vld [vmem:[#allocation6 + $0x40] sm:$0xff]  ;;  %v5866_v62 = vld [vmem:[#allocation6 + $0x178] sm:$0xff]  ;;  %v6489_v1 = vld [vmem:[%s6457_s18 + $0xc] sm:$0xf0] }
  0x3a   : > { %6064 = vmatpush.bf16.msra.mxu1 %v5751_v5  ;;  %6065 = vmatpush.bf16.msra.mxu2 %v5751_v5  ;;  %v5851_v55 = vld [vmem:[#allocation6 + $0x100] sm:$0xff]  ;;  %v5937_v63 = vld [vmem:[#allocation6 + $0x238] sm:$0xff] }
  0x3b   : > { %6066 = vmatpush.bf16.msra.mxu3 %v5751_v5  ;;  %633 = vmatpush.bf16.msra.mxu0 %v5751_v5  ;;  %v5729_v59 = vld [vmem:[%s6457_s18 + $0x20] sm:$0xff]  ;;  %v2194_v0 = vld [vmem:[%s6457_s18 + $0xc] sm:$0xff]   ;;  %v5736_v2 = vld [vmem:[%s6457_s18 + $0x58] sm:$0xff] }
  0x3c   : > { %v5742_v3 = vld [vmem:[%s6457_s18 + $0x88] sm:$0xff]  ;;  %v5748_v4 = vld [vmem:[%s6457_s18 + $0xb8] sm:$0xff] }
  0x3d   : > { %v5730_v5 = vld [vmem:[%s6457_s18 + $0x28] sm:$0xff] }
  0x3e   : > { %6067 = vmatpush.bf16.msra.mxu1 %v5750_v6  ;;  %6068 = vmatpush.bf16.msra.mxu2 %v5750_v6 }
  0x3f   : > { %6069 = vmatpush.bf16.msra.mxu3 %v5750_v6  ;;  %634 = vmatpush.bf16.msra.mxu0 %v5750_v6  ;;  %v5940_v6 = vld [vmem:[%s6457_s18] sm:$0xff]  }
  0x42   : > { %6070 = vmatpush.bf16.msra.mxu1 %v5749_v7  ;;  %6071 = vmatpush.bf16.msra.mxu2 %v5749_v7 }
  0x43   : > { %6072 = vmatpush.bf16.msra.mxu3 %v5749_v7  ;;  %635 = vmatpush.bf16.msra.mxu0 %v5749_v7  ;;  %v5757_v7 = vld [vmem:[%s6457_s18 + $0x8] sm:$0xff] }
  0x45   : > { %666 = vmatmul.bf16.vlgmr.msra.gmra.mxu1 %v5731_v10  ;;  %696 = vmatmul.bf16.vlgmr.msra.gmra.mxu2 %v5737_v11  ;;  %v6028_v10 = vld [vmem:[%s6457_s18] sm:$0xe]  ;;  %v5828_v11 = vld [vmem:[%s6457_s18 + $0x14] sm:$0xff] }
  0x46   : > { %1583 = vmatpush.bf16.msrb.mxu2 %v5795_v8  ;;  %726 = vmatmul.bf16.vlgmr.msra.gmra.mxu3 %v5743_v12  ;;  %v998_v8 = vshll.u32 %v5940_v6, 16  ;;  %v2386_v12 = vshll.u32 %v2194_v0, 16 }
  0x47   : > { %2017 = vmatpush.bf16.msrb.mxu3 %v5827_v9  ;;  %636 = vmatmul.bf16.vlgmr.msra.gmra.mxu0 %v5725_v13  ;;  %v6027_v9 = vld [vmem:[%s6457_s18] sm:$0xf0]  ;;  %v996_v13 = vshrl.u32 %v5940_v6, 16 }
  0x48   : > { %1263 = vmatpush.bf16.msrb.mxu1 %v5787_v14  ;;  %2651 = vmatpush.bf16.msrb.mxu0 %v5858_v15  ;;  %v1000_v14 = vrot.slane %v998_v8, 1  ;;  %v1003_v15 = vshll.u32 %v5757_v7, 16 }
  0x4a   : > { %1584 = vmatpush.bf16.msrb.mxu2 %v5794_v16  ;;  %v6029_v16 = vor.u32 %v6028_v10, %v6027_v9 }
  0x4b   : > { %2018 = vmatpush.bf16.msrb.mxu3 %v5826_v17  ;;  %v2384_v17 = vshrl.u32 %v2194_v0, 16 }
  0x4c   : > { %1264 = vmatpush.bf16.msrb.mxu1 %v5786_v18  ;;  %2652 = vmatpush.bf16.msrb.mxu0 %v5857_v19  ;;  %v2388_v18 = vrot.slane %v2386_v12, 1  ;;  %v2391_v19 = vshll.u32 %v5828_v11, 16 }
  0x4e   : > { %1585 = vmatpush.bf16.msrb.mxu2 %v5793_v20  ;;  %v1001_v20 = vor.u32 %v1000_v14, %v996_v13 }
  0x4f   : > { %2019 = vmatpush.bf16.msrb.mxu3 %v5825_v21  ;;  %v1005_v21 = vrot.slane %v1003_v15, 1 }
  0x50   : > { %1265 = vmatpush.bf16.msrb.mxu1 %v5785_v22  ;;  %2653 = vmatpush.bf16.msrb.mxu0 %v5856_v23  ;;  %v1462_v22 = vrot.slane %v6029_v16, 1  ;;  %v1463_v23 = vrot.slane %v5757_v7, 1 }
  0x52   : > { %1586 = vmatpush.bf16.msrb.mxu2 %v5792_v24  ;;  %v2389_v24 = vor.u32 %v2388_v18, %v2384_v17 }
  0x53   : > { %2020 = vmatpush.bf16.msrb.mxu3 %v5824_v25  ;;  %v2393_v25 = vrot.slane %v2391_v19, 1 }
  0x54   : > { %1266 = vmatpush.bf16.msrb.mxu1 %v5784_v26  ;;  %2654 = vmatpush.bf16.msrb.mxu0 %v5855_v27  ;;  %v1006_v26 = vsel %vm994_vm0, %v1001_v20, %v1005_v21  ;;  %v1464_v27 = vsel %vm1461_vm1, %v1462_v22, %v1463_v23 }
  0x55   : > { %671 = vmatmul.bf16.gmra.mxu1 %v5732_v28  ;;  %701 = vmatmul.bf16.gmra.mxu2 %v5738_v29  ;;  %v5796_v28 = vld [vmem:[%s6457_s18 + $0xc] sm:$0xff]  ;;  %v2394_v29 = vsel %vm994_vm0, %v2389_v24, %v2393_v25 }
  0x56   : > { %731 = vmatmul.bf16.gmra.mxu3 %v5744_v30  ;;  %1587 = vmatpush.bf16.msrb.mxu2 %v5791_v32  ;;  %v5758_v30 = vld [vmem:[%s6457_s18 + $0x10] sm:$0xff]  ;;  %v1007_v32 = vshrl.u32 %v5757_v7, 16 }
  0x57   : > { %641 = vmatmul.bf16.gmra.mxu0 %v5726_v31  ;;  %2021 = vmatpush.bf16.msrb.mxu3 %v5823_v33  ;;  %v5829_v31 = vld [vmem:[%s6457_s18 + $0x1c] sm:$0xff]  ;;  %v1011_v33 = vshll.u32 %v5758_v30, 16 }
  0x58   : > { %1267 = vmatpush.bf16.msrb.mxu1 %v5783_v34  ;;  %2655 = vmatpush.bf16.msrb.mxu0 %v5854_v35  ;;  %v2395_v34 = vshrl.u32 %v5828_v11, 16  ;;  %v2399_v35 = vshll.u32 %v5829_v31, 16 }
  0x5a   : > { %1588 = vmatpush.bf16.msrb.mxu2 %v5790_v36  ;;  %v1009_v36 = vor.u32 %v1007_v32, %v1005_v21 }
  0x5b   : > { %2022 = vmatpush.bf16.msrb.mxu3 %v5822_v37  ;;  %v1013_v37 = vrot.slane %v1011_v33, 1 }
  0x5c   : > { %1268 = vmatpush.bf16.msrb.mxu1 %v5782_v42  ;;  %2656 = vmatpush.bf16.msrb.mxu0 %v5853_v43  ;;  %v5797_v43 = vld [vmem:[%s6457_s18 + $0x14] sm:$0xff] }
  0x5e   : > { %1589 = vmatpush.bf16.msrb.mxu2 %v5789_v44 }
  0x5f   : > { %2023 = vmatpush.bf16.msrb.mxu3 %v5821_v45  ;;  %v5759_v45 = vld [vmem:[%s6457_s18 + $0x18] sm:$0xff] }
  0x60   : > { %1269 = vmatpush.bf16.msrb.mxu1 %v5781_v46  ;;  %2657 = vmatpush.bf16.msrb.mxu0 %v5852_v51  ;;  %v5897_v46 = vld [vmem:[#allocation6 + $0x1b0] sm:$0xff]  ;;  %v1019_v51 = vshll.u32 %v5759_v45, 16  ;;  %v1023_v8 = vshrl.u32 %v5759_v45, 16 }
  0x62   : > { %1590 = vmatpush.bf16.msrb.mxu2 %v5788_v52  ;;  %v2403_v52 = vshrl.u32 %v5829_v31, 16 }
  0x63   : > { %2024 = vmatpush.bf16.msrb.mxu3 %v5820_v53 }
  0x64   : > { %1270 = vmatpush.bf16.msrb.mxu1 %v5780_v54  ;;  %2658 = vmatpush.bf16.msrb.mxu0 %v5851_v55  ;;  %v5936_v54 = vld [vmem:[#allocation6 + $0x230] sm:$0xff] }
  0x65   : > { %676 = vmatmul.bf16.gmra.mxu1 %v5733_v38  ;;  %706 = vmatmul.bf16.gmra.mxu2 %v5739_v39  ;;  %v1465_v38 = vrot.slane %v5758_v30, 1  ;;  %v2397_v39 = vor.u32 %v2395_v34, %v2393_v25 }
  0x66   : > { %736 = vmatmul.bf16.gmra.mxu3 %v5745_v40  ;;  %3404 = vmatpush.bf16.msra.mxu2 %v5898_v60  ;;  %v2401_v40 = vrot.slane %v2399_v35, 1 }
  0x67   : > { %646 = vmatmul.bf16.gmra.mxu0 %v5727_v41  ;;  %4038 = vmatpush.bf16.msra.mxu3 %v5929_v61  ;;  %v1014_v41 = vsel %vm994_vm0, %v1009_v36, %v1013_v37  ;;  %v1466_v42 = vsel %vm1461_vm1, %v1463_v23, %v1465_v38  ;;  %v5799_v23 = vld [vmem:[%s6457_s18 + $0x24] sm:$0xff] }
  0x68   : > { %2970 = vmatpush.bf16.msra.mxu1 %v5866_v62  ;;  %4357 = vmatpush.bf16.msra.mxu0 %v5937_v63  ;;  %v2402_v44 = vsel %vm994_vm0, %v2397_v39, %v2401_v40  ;;  %v5798_v63 = vld [vmem:[%s6457_s18 + $0x1c] sm:$0xff] }
  0x6a   : > { %3405 = vmatpush.bf16.msra.mxu2 %v5897_v46  ;;  %v5800_v46 = vld [vmem:[%s6457_s18 + $0x2c] sm:$0xff] }
  0x6c   : > { %4358 = vmatpush.bf16.msra.mxu0 %v5936_v54 }
  0x75   : > { %681 = vmatmul.bf16.gmra.mxu1 %v5734_v47  ;;  %711 = vmatmul.bf16.gmra.mxu2 %v5740_v48  ;;  %v5928_v47 = vld [vmem:[#allocation6 + $0x1f0] sm:$0xff]  ;;  %v5830_v48 = vld [vmem:[%s6457_s18 + $0x24] sm:$0xff] }
  0x76   : > { %741 = vmatmul.bf16.gmra.mxu3 %v5746_v49  ;;  %v5865_v49 = vld [vmem:[#allocation6 + $0x170] sm:$0xff]  ;;  %v2407_v53 = vshll.u32 %v5830_v48, 16  ;;  %v2411_v11 = vshrl.u32 %v5830_v48, 16 }
  0x77   : > { %651 = vmatmul.bf16.gmra.mxu0 %v5728_v50  ;;  %4039 = vmatpush.bf16.msra.mxu3 %v5928_v47  ;;  %v1015_v50 = vshrl.u32 %v5758_v30, 16 }
  0x78   : > { %2971 = vmatpush.bf16.msra.mxu1 %v5865_v49  ;;  %v5762_v49 = vld [vmem:[%s6457_s18 + $0x30] sm:$0xff] }
  0x79   : > { %v1017_v55 = vor.u32 %v1015_v50, %v1013_v37  ;;  %v5896_v50 = vld [vmem:[#allocation6 + $0x1a8] sm:$0xff] }
  0x7a   : > { %3406 = vmatpush.bf16.msra.mxu2 %v5896_v50  ;;  %v5764_v50 = vld [vmem:[%s6457_s18 + $0x40] sm:$0xff] }
  0x85   : > { %686 = vmatmul.bf16.gmra.mxu1 %v5735_v56  ;;  %716 = vmatmul.bf16.gmra.mxu2 %v5741_v57  ;;  %v1021_v56 = vrot.slane %v1019_v51, 1  ;;  %v1467_v57 = vrot.slane %v5759_v45, 1  ;;  %v5927_v51 = vld [vmem:[#allocation6 + $0x1e8] sm:$0xff] }
  0x86   : > { %746 = vmatmul.bf16.gmra.mxu3 %v5747_v58  ;;  %v2405_v58 = vor.u32 %v2403_v52, %v2401_v40  ;;  %v5833_v52 = vld [vmem:[%s6457_s18 + $0x3c] sm:$0xff] }
  0x87   : > { %656 = vmatmul.bf16.gmra.mxu0 %v5729_v59  ;;  %v2409_v59 = vrot.slane %v2407_v53, 1  ;;  %v1022_v61 = vsel %vm994_vm0, %v1017_v55, %v1021_v56  ;;  %v1468_v62 = vsel %vm1461_vm1, %v1465_v38, %v1467_v57  ;;  %v1025_v13 = vor.u32 %v1023_v8, %v1021_v56  ;;  %4040 = vmatpush.bf16.msra.mxu3 %v5927_v51  ;;  %v5864_v55 = vld [vmem:[#allocation6 + $0x168] sm:$0xff] }
  0x88   : > { %2972 = vmatpush.bf16.msra.mxu1 %v5864_v55  ;;  %v5835_v51 = vld [vmem:[%s6457_s18 + $0x4c] sm:$0xff] }
  0x89   : > { %v2413_v16 = vor.u32 %v2411_v11, %v2409_v59 }
  0x95   : > { %691 = vmatmul.bf16.gmra.mxu1 %v5736_v2  ;;  %721 = vmatmul.bf16.gmra.mxu2 %v5742_v3  ;;  %v2410_v2 = vsel %vm994_vm0, %v2405_v58, %v2409_v59  ;;  %v5760_v3 = vld [vmem:[%s6457_s18 + $0x20] sm:$0xff]  ;;  %v1043_v58 = vshll.u32 %v5762_v49, 16 }
  0x96   : > { %751 = vmatmul.bf16.gmra.mxu3 %v5748_v4  ;;  %v5831_v4 = vld [vmem:[%s6457_s18 + $0x2c] sm:$0xff]  ;;  %v1027_v9 = vshll.u32 %v5760_v3, 16  ;;  %v1469_v15 = vrot.slane %v5760_v3, 1  ;;  %v1031_v31 = vshrl.u32 %v5760_v3, 16 }
  0x97   : > { %661 = vmatmul.bf16.gmra.mxu0 %v5730_v5  ;;  %v2415_v12 = vshll.u32 %v5831_v4, 16  ;;  %v2419_v34 = vshrl.u32 %v5831_v4, 16  ;;  %v1045_v3 = vrot.slane %v1043_v58, 1  ;;  %v1473_v4 = vrot.slane %v5762_v49, 1 }
  0x98   : > { %v1029_v14 = vrot.slane %v1027_v9, 1  ;;  %v1470_v22 = vsel %vm1461_vm1, %v1467_v57, %v1469_v15  ;;  %v1059_v58 = vshll.u32 %v5764_v50, 16 }
  0x99   : > { %v2417_v17 = vrot.slane %v2415_v12, 1 }
  0x9a   : > { %v1030_v21 = vsel %vm994_vm0, %v1025_v13, %v1029_v14  ;;  %v1033_v36 = vor.u32 %v1031_v31, %v1029_v14 }
  0x9b   : > { %v2418_v25 = vsel %vm994_vm0, %v2413_v16, %v2417_v17  ;;  %v2421_v39 = vor.u32 %v2419_v34, %v2417_v17  ;;  %v5801_v16 = vld [vmem:[%s6457_s18 + $0x34] sm:$0xff] }
  0xa5   : > { %1271 = vmatmul.bf16.vlgmr.msrb.gmra.mxu1 %v1006_v26  ;;  %1591 = vmatmul.bf16.vlgmr.msrb.gmra.mxu2 %v1464_v27  ;;  %v5761_v26 = vld [vmem:[%s6457_s18 + $0x28] sm:$0xff]  ;;  %v5832_v27 = vld [vmem:[%s6457_s18 + $0x34] sm:$0xff] }
  0xa6   : > { %2025 = vmatmul.bf16.vlgmr.msrb.gmra.mxu3 %v5796_v28  ;;  %v1035_v32 = vshll.u32 %v5761_v26, 16  ;;  %v2423_v35 = vshll.u32 %v5832_v27, 16  ;;  %v1471_v38 = vrot.slane %v5761_v26, 1  ;;  %v1039_v57 = vshrl.u32 %v5761_v26, 16 }
  0xa7   : > { %2659 = vmatmul.bf16.vlgmr.msrb.gmra.mxu0 %v2394_v29  ;;  %v1047_v26 = vshrl.u32 %v5762_v49, 16 }
  0xa8   : > { %v1037_v37 = vrot.slane %v1035_v32, 1  ;;  %v2425_v40 = vrot.slane %v2423_v35, 1  ;;  %v1472_v45 = vsel %vm1461_vm1, %v1469_v15, %v1471_v38  ;;  %v1474_v15 = vsel %vm1461_vm1, %v1471_v38, %v1473_v4 }
  0xa9   : > { %v1049_v32 = vor.u32 %v1047_v26, %v1045_v3  ;;  %v5895_v26 = vld [vmem:[#allocation6 + $0x1a0] sm:$0xff] }
  0xaa   : > { %v2426_v48 = vsel %vm994_vm0, %v2421_v39, %v2425_v40  ;;  %3407 = vmatpush.bf16.msra.mxu2 %v5895_v26 }
  0xb5   : > { %1276 = vmatmul.bf16.gmra.mxu1 %v1014_v41  ;;  %1596 = vmatmul.bf16.gmra.mxu2 %v1466_v42 }
  0xb6   : > { %2030 = vmatmul.bf16.gmra.mxu3 %v5797_v43 }
  0xb7   : > { %2664 = vmatmul.bf16.gmra.mxu0 %v2402_v44  ;;  %v1038_v44 = vsel %vm994_vm0, %v1033_v36, %v1037_v37 }
  0xc2   : > { %v6512_v60 = vpop.f32.mrf.mxu1 }
  0xc4   : > { %v6517_v0 = vpop.f32.mrf.mxu0 }
  0xc5   : > { %1281 = vmatmul.bf16.gmra.mxu1 %v1022_v61  ;;  %1601 = vmatmul.bf16.gmra.mxu2 %v1468_v62  ;;  %v2427_v61 = vshrl.u32 %v5832_v27, 16  ;;  %v2431_v62 = vshll.u32 %v5833_v52, 16 }
  0xc6   : > { %2035 = vmatmul.bf16.gmra.mxu3 %v5798_v63  ;;  %v5935_v63 = vld [vmem:[#allocation6 + $0x228] sm:$0xff] }
  0xc7   : > { %2669 = vmatmul.bf16.gmra.mxu0 %v2410_v2  ;;  %v1041_v2 = vor.u32 %v1039_v57, %v1037_v37  ;;  %v2429_v8 = vor.u32 %v2427_v61, %v2425_v40  ;;  %v2433_v9 = vrot.slane %v2431_v62, 1  ;;  %v2447_v62 = vshll.u32 %v5835_v51, 16 }
  0xc8   : > { %v6522_v5 = vpop.f32.mrf.mxu2  ;;  %4359 = vmatpush.bf16.msra.mxu0 %v5935_v63 }
  0xc9   : > { %v6524_v6 = vpop.f32.mrf.mxu3  ;;  %v1046_v14 = vsel %vm994_vm0, %v1041_v2, %v1045_v3  ;;  %v1061_v2 = vrot.slane %v1059_v58, 1  ;;  %v1477_v3 = vrot.slane %v5764_v50, 1 }
  0xca   : > { %v6526_v7 = vpop.f32.mrf.mxu1 }
  0xcc   : > { %v6528_v10 = vpop.f32.mrf.mxu0 }
  0xd0   : > { %v6530_v18 = vpop.f32.mrf.mxu2 }
  0xd1   : > { %v6532_v19 = vpop.f32.mrf.mxu3 }
  0xd2   : > { %v672_v20 = vpop.f32.mrf.mxu1 }
  0xd3   : > { %v2434_v20 = vsel %vm994_vm0, %v2429_v8, %v2433_v9  ;;  %v2449_v8 = vrot.slane %v2447_v62, 1 }
  0xd4   : > { %v642_v24 = vpop.f32.mrf.mxu0 }
  0xd5   : > { %1286 = vmatmul.bf16.gmra.mxu1 %v1030_v21  ;;  %1606 = vmatmul.bf16.gmra.mxu2 %v1470_v22  ;;  %v5763_v21 = vld [vmem:[%s6457_s18 + $0x38] sm:$0xff]  ;;  %v5834_v22 = vld [vmem:[%s6457_s18 + $0x44] sm:$0xff] }
  0xd6   : > { %2040 = vmatmul.bf16.gmra.mxu3 %v5799_v23  ;;  %v1051_v27 = vshll.u32 %v5763_v21, 16  ;;  %v2439_v31 = vshll.u32 %v5834_v22, 16  ;;  %v1475_v35 = vrot.slane %v5763_v21, 1  ;;  %v1055_v57 = vshrl.u32 %v5763_v21, 16 }
  0xd7   : > { %2674 = vmatmul.bf16.gmra.mxu0 %v2418_v25  ;;  %v2443_v61 = vshrl.u32 %v5834_v22, 16  ;;  %v5765_v22 = vld [vmem:[%s6457_s18 + $0x48] sm:$0xff] }
  0xd8   : > { %v702_v28 = vpop.f32.mrf.mxu2  ;;  %v1053_v34 = vrot.slane %v1051_v27, 1  ;;  %v2441_v37 = vrot.slane %v2439_v31, 1  ;;  %v5926_v27 = vld [vmem:[#allocation6 + $0x1e0] sm:$0xff] }
  0xd9   : > { %v732_v29 = vpop.f32.mrf.mxu3  ;;  %4041 = vmatpush.bf16.msra.mxu3 %v5926_v27 }
  0xda   : > { %v6540_v30 = vpop.f32.mrf.mxu1  ;;  %v2435_v29 = vshrl.u32 %v5833_v52, 16  ;;  %v1057_v63 = vor.u32 %v1055_v57, %v1053_v34 }
  0xdc   : > { %v6542_v33 = vpop.f32.mrf.mxu0  ;;  %v2437_v36 = vor.u32 %v2435_v29, %v2433_v9  ;;  %v5836_v29 = vld [vmem:[%s6457_s18 + $0x54] sm:$0xff] }
  0xde   : > { %v2442_v49 = vsel %vm994_vm0, %v2437_v36, %v2441_v37  ;;  %v1063_v36 = vshrl.u32 %v5764_v50, 16 }
  0xe0   : > { %v6544_v41 = vpop.f32.mrf.mxu2 }
  0xe1   : > { %v6546_v42 = vpop.f32.mrf.mxu3 }
  0xe2   : > { %v6548_v43 = vpop.f32.mrf.mxu1 }
  0xe4   : > { %v6553_v47 = vpop.f32.mrf.mxu0 }
  0xe5   : > { %1291 = vmatmul.bf16.gmra.mxu1 %v1038_v44  ;;  %1611 = vmatmul.bf16.gmra.mxu2 %v1472_v45  ;;  %v1054_v44 = vsel %vm994_vm0, %v1049_v32, %v1053_v34  ;;  %v1476_v45 = vsel %vm1461_vm1, %v1473_v4, %v1475_v35  ;;  %v2445_v4 = vor.u32 %v2443_v61, %v2441_v37  ;;  %v5863_v34 = vld [vmem:[#allocation6 + $0x160] sm:$0xff]  ;;  %v1067_v37 = vshll.u32 %v5765_v22, 16 }
  0xe6   : > { %2045 = vmatmul.bf16.gmra.mxu3 %v5800_v46  ;;  %v5802_v46 = vld [vmem:[%s6457_s18 + $0x3c] sm:$0xff]  ;;  %2973 = vmatpush.bf16.msra.mxu1 %v5863_v34  ;;  %v1071_v34 = vshrl.u32 %v5765_v22, 16 }
  0xe7   : > { %2679 = vmatmul.bf16.gmra.mxu0 %v2426_v48  ;;  %v2450_v21 = vsel %vm994_vm0, %v2445_v4, %v2449_v8  ;;  %v5804_v4 = vld [vmem:[%s6457_s18 + $0x4c] sm:$0xff] }
  0xe8   : > { %v6558_v53 = vpop.f32.mrf.mxu2 }
  0xe9   : > { %v6560_v54 = vpop.f32.mrf.mxu3 }
  0xea   : > { %v679_v56 = vpop.f32.mrf.mxu1 }
  0xec   : > { %v649_v59 = vpop.f32.mrf.mxu0 }
  0xf0   : > { %v709_v11 = vpop.f32.mrf.mxu2 }
  0xf1   : > { %v739_v12 = vpop.f32.mrf.mxu3 }
  0xf2   : > { %v6562_v13 = vpop.f32.mrf.mxu1 }
  0xf4   : > { %v6567_v17 = vpop.f32.mrf.mxu0 }
  0xf5   : > { %1296 = vmatmul.bf16.gmra.mxu1 %v1046_v14  ;;  %1616 = vmatmul.bf16.gmra.mxu2 %v1474_v15  ;;  %v1062_v14 = vsel %vm994_vm0, %v1057_v63, %v1061_v2  ;;  %v1478_v15 = vsel %vm1461_vm1, %v1475_v35, %v1477_v3 }
  0xf6   : > { %2050 = vmatmul.bf16.gmra.mxu3 %v5801_v16  ;;  %v5803_v16 = vld [vmem:[%s6457_s18 + $0x44] sm:$0xff] }
  0xf7   : > { %2684 = vmatmul.bf16.gmra.mxu0 %v2434_v20 }
  0xf8   : > { %v6572_v23 = vpop.f32.mrf.mxu2 }
  0xf9   : > { %v6574_v24 = vpop.f32.mrf.mxu3 }
  0xfa   : > { %v6576_v25 = vpop.f32.mrf.mxu1 }
  0xfc   : > { %v6578_v28 = vpop.f32.mrf.mxu0 }
 0x100   : > { %v6580_v38 = vpop.f32.mrf.mxu2 }
 0x101   : > { %v6582_v39 = vpop.f32.mrf.mxu3 }
 0x102   : > { %v687_v40 = vpop.f32.mrf.mxu1 }
 0x104   : > { %v657_v48 = vpop.f32.mrf.mxu0 }
 0x105   : > { %1301 = vmatmul.bf16.gmra.mxu1 %v1054_v44  ;;  %1621 = vmatmul.bf16.gmra.mxu2 %v1476_v45  ;;  %v2451_v44 = vshrl.u32 %v5835_v51, 16  ;;  %v2455_v45 = vshll.u32 %v5836_v29, 16  ;;  %v1065_v48 = vor.u32 %v1063_v36, %v1061_v2  ;;  %v5766_v2 = vld [vmem:[%s6457_s18 + $0x50] sm:$0xff] }
 0x106   : > { %2055 = vmatmul.bf16.gmra.mxu3 %v5802_v46  ;;  %v5934_v46 = vld [vmem:[#allocation6 + $0x220] sm:$0xff] }
 0x107   : > { %2689 = vmatmul.bf16.gmra.mxu0 %v2442_v49  ;;  %v1069_v49 = vrot.slane %v1067_v37, 1  ;;  %v2457_v57 = vrot.slane %v2455_v45, 1  ;;  %v2459_v37 = vshrl.u32 %v5836_v29, 16 }
 0x108   : > { %v717_v52 = vpop.f32.mrf.mxu2  ;;  %4360 = vmatpush.bf16.msra.mxu0 %v5934_v46 }
 0x109   : > { %v747_v55 = vpop.f32.mrf.mxu3  ;;  %v1479_v52 = vrot.slane %v5765_v22, 1  ;;  %v1070_v50 = vsel %vm994_vm0, %v1065_v48, %v1069_v49  ;;  %v1073_v45 = vor.u32 %v1071_v34, %v1069_v49  ;;  %v1481_v48 = vrot.slane %v5766_v2, 1 }
 0x10a   : > { %v6590_v56 = vpop.f32.mrf.mxu1  ;;  %v2453_v55 = vor.u32 %v2451_v44, %v2449_v8 }
 0x10b   : > { %v1480_v63 = vsel %vm1461_vm1, %v1477_v3, %v1479_v52  ;;  %v1482_v29 = vsel %vm1461_vm1, %v1479_v52, %v1481_v48 }
 0x10c   : > { %v6592_v59 = vpop.f32.mrf.mxu0 }
 0x110   : > { %v6594_v9 = vpop.f32.mrf.mxu2 }
 0x111   : > { %v6596_v11 = vpop.f32.mrf.mxu3 }
 0x112   : > { %v6598_v12 = vpop.f32.mrf.mxu1 }
 0x114   : > { %v6603_v20 = vpop.f32.mrf.mxu0 }
 0x115   : > { %1306 = vmatmul.bf16.gmra.mxu1 %v1062_v14  ;;  %1626 = vmatmul.bf16.gmra.mxu2 %v1478_v15  ;;  %v2458_v14 = vsel %vm994_vm0, %v2453_v55, %v2457_v57  ;;  %v5837_v15 = vld [vmem:[%s6457_s18 + $0x5c] sm:$0xff] }
 0x116   : > { %2060 = vmatmul.bf16.gmra.mxu3 %v5803_v16 }
 0x117   : > { %2694 = vmatmul.bf16.gmra.mxu0 %v2450_v21 }
 0x118   : > { %v6608_v31 = vpop.f32.mrf.mxu2 }
 0x119   : > { %v6610_v32 = vpop.f32.mrf.mxu3 }
 0x11a   : > { %v694_v35 = vpop.f32.mrf.mxu1 }
 0x11b   : > { %v1075_v35 = vshll.u32 %v5766_v2, 16 }
 0x11c   : > { %v664_v40 = vpop.f32.mrf.mxu0 }
 0x11d   : > { %v2463_v40 = vshll.u32 %v5837_v15, 16  ;;  %v1077_v46 = vrot.slane %v1075_v35, 1  ;;  %v2467_v35 = vshrl.u32 %v5837_v15, 16  ;;  %v5806_v15 = vld [vmem:[%s6457_s18 + $0x5c] sm:$0xff] }
 0x120   : > { %v724_v58 = vpop.f32.mrf.mxu2 }
 0x121   : > { %v754_v61 = vpop.f32.mrf.mxu3  ;;  %v2465_v58 = vrot.slane %v2463_v40, 1 }
 0x122   : > { %v1272_v62 = vpop.f32.mrf.mxu1 }
 0x123   : > { %v1392_v8 = vadd.f32 %v1272_v62, %v6517_v0  ;;  %v2461_v0 = vor.u32 %v2459_v37, %v2457_v57  ;;  %v6629_v57 = vld [vmem:[%s6457_s18 + $0x58] sm:$0xff] }
 0x124   : > { %v2660_v51 = vpop.f32.mrf.mxu0  ;;  %v1083_v52 = vshll.u32 %v6629_v57, 16 }
 0x125   : > { %1311 = vmatmul.bf16.gmra.mxu1 %v1070_v50  ;;  %1631 = vmatmul.bf16.gmra.mxu2 %v1480_v63  ;;  %v1078_v63 = vsel %vm994_vm0, %v1073_v45, %v1077_v46  ;;  %v2466_v49 = vsel %vm994_vm0, %v2461_v0, %v2465_v58 }
 0x126   : > { %2065 = vmatmul.bf16.gmra.mxu3 %v5804_v4  ;;  %v5805_v4 = vld [vmem:[%s6457_s18 + $0x54] sm:$0xff]  ;;  %v1085_v40 = vrot.slane %v1083_v52, 1 }
 0x127   : > { %2699 = vmatmul.bf16.gmra.mxu0 %v2458_v14 }
 0x128   : > { %v1592_v16 = vpop.f32.mrf.mxu2 }
 0x129   : > { %v1712_v21 = vadd.f32 %v1592_v16, %v1392_v8  ;;  %v2026_v26 = vpop.f32.mrf.mxu3  ;;  %v5838_v8 = vld [vmem:[%s6457_s18 + $0x64] sm:$0xff] }
 0x12a   : > { %v1274_v27 = vpop.f32.mrf.mxu1 }
 0x12b   : > { %v2146_v36 = vadd.f32 %v2026_v26, %v1712_v21  ;;  %v1393_v55 = vadd.f32 %v1274_v27, %v6528_v10  ;;  %v1079_v27 = vshrl.u32 %v5766_v2, 16 }
 0x12c   : > { %v2662_v3 = vpop.f32.mrf.mxu0 }
 0x12d   : > { %v6619_v44 = vadd.f32 %v2660_v51, %v2146_v36  ;;  %v2471_v36 = vshll.u32 %v5838_v8, 16  ;;  %v1081_v37 = vor.u32 %v1079_v27, %v1077_v46  ;;  %v5862_v27 = vld [vmem:[#allocation6 + $0x158] sm:$0xff] }
 0x12e   : > { %2974 = vmatpush.bf16.msra.mxu1 %v5862_v27 }
 0x12f   : > { %v2473_v0 = vrot.slane %v2471_v36, 1  ;;  %v1086_v2 = vsel %vm994_vm0, %v1081_v37, %v1085_v40 }
 0x130   : > { %v1594_v61 = vpop.f32.mrf.mxu2 }
 0x131   : > { %v1713_v62 = vadd.f32 %v1594_v61, %v1393_v55  ;;  %v2028_v22 = vpop.f32.mrf.mxu3  ;;  %v2469_v55 = vor.u32 %v2467_v35, %v2465_v58  ;;  %v6642_v58 = vld [vmem:[%s6457_s18 + $0x60] sm:$0xff]  ;;  %v1087_v35 = vshrl.u32 %v6629_v57, 16 }
 0x132   : > { %v1277_v50 = vpop.f32.mrf.mxu1 }
 0x133   : > { %v2147_v51 = vadd.f32 %v2028_v22, %v1713_v62 }
 0x134   : > { %v2665_v14 = vpop.f32.mrf.mxu0 }
 0x135   : > { %1316 = vmatmul.bf16.gmra.mxu1 %v1078_v63  ;;  %1636 = vmatmul.bf16.gmra.mxu2 %v1482_v29  ;;  %v6626_v10 = vadd.f32 %v2662_v3, %v2147_v51  ;;  %v1483_v3 = vrot.slane %v6629_v57, 1  ;;  %v5894_v51 = vld [vmem:[#allocation6 + $0x198] sm:$0xff] }
 0x136   : > { %2070 = vmatmul.bf16.gmra.mxu3 %v5805_v4  ;;  %v2474_v4 = vsel %vm994_vm0, %v2469_v55, %v2473_v0  ;;  %v5925_v14 = vld [vmem:[#allocation6 + $0x1d8] sm:$0xff]  ;;  %3408 = vmatpush.bf16.msra.mxu2 %v5894_v51 }
 0x137   : > { %2704 = vmatmul.bf16.gmra.mxu0 %v2466_v49  ;;  %v1484_v63 = vsel %vm1461_vm1, %v1481_v48, %v1483_v3  ;;  %4042 = vmatpush.bf16.msra.mxu3 %v5925_v14  ;;  %v5807_v51 = vld [vmem:[%s6457_s18 + $0x64] sm:$0xff] }
 0x138   : > { %v1597_v16 = vpop.f32.mrf.mxu2 }
 0x139   : > { %v2031_v21 = vpop.f32.mrf.mxu3  ;;  %v5839_v16 = vld [vmem:[%s6457_s18 + $0x6c] sm:$0xff] }
 0x13a   : > { %v1279_v26 = vpop.f32.mrf.mxu1  ;;  %v2479_v55 = vshll.u32 %v5839_v16, 16 }
 0x13b   : > { %v1395_v45 = vadd.f32 %v1279_v26, %v6542_v33 }
 0x13c   : > { %v2667_v34 = vpop.f32.mrf.mxu0  ;;  %v2481_v57 = vrot.slane %v2479_v55, 1 }
 0x140   : > { %v1599_v61 = vpop.f32.mrf.mxu2 }
 0x141   : > { %v1715_v62 = vadd.f32 %v1599_v61, %v1395_v45  ;;  %v2033_v22 = vpop.f32.mrf.mxu3  ;;  %v2475_v45 = vshrl.u32 %v5838_v8, 16  ;;  %v5933_v61 = vld [vmem:[#allocation6 + $0x218] sm:$0xff] }
 0x142   : > { %v1282_v50 = vpop.f32.mrf.mxu1  ;;  %4361 = vmatpush.bf16.msra.mxu0 %v5933_v61 }
 0x143   : > { %v2149_v29 = vadd.f32 %v2033_v22, %v1715_v62  ;;  %v1396_v49 = vadd.f32 %v1282_v50, %v6553_v47  ;;  %v1089_v62 = vor.u32 %v1087_v35, %v1085_v40  ;;  %v1485_v50 = vrot.slane %v6642_v58, 1  ;;  %v5769_v40 = vld [vmem:[%s6457_s18 + $0x68] sm:$0xff] }
 0x144   : > { %v2670_v46 = vpop.f32.mrf.mxu0  ;;  %v1099_v35 = vshll.u32 %v5769_v40, 16 }
 0x145   : > { %1321 = vmatmul.bf16.gmra.mxu1 %v1086_v2  ;;  %1641 = vmatmul.bf16.gmra.mxu2 %v1484_v63  ;;  %v6639_v33 = vadd.f32 %v2667_v34, %v2149_v29  ;;  %v1091_v34 = vshll.u32 %v6642_v58, 16  ;;  %v2477_v2 = vor.u32 %v2475_v45, %v2473_v0 }
 0x146   : > { %2075 = vmatmul.bf16.gmra.mxu3 %v5806_v15  ;;  %v1101_v61 = vrot.slane %v1099_v35, 1 }
 0x147   : > { %2709 = vmatmul.bf16.gmra.mxu0 %v2474_v4  ;;  %v1093_v22 = vrot.slane %v1091_v34, 1  ;;  %v1486_v4 = vsel %vm1461_vm1, %v1483_v3, %v1485_v50 }
 0x148   : > { %v1602_v21 = vpop.f32.mrf.mxu2 }
 0x149   : > { %v1716_v48 = vadd.f32 %v1602_v21, %v1396_v49  ;;  %v2036_v26 = vpop.f32.mrf.mxu3  ;;  %v1094_v8 = vsel %vm994_vm0, %v1089_v62, %v1093_v22  ;;  %v5840_v49 = vld [vmem:[%s6457_s18 + $0x74] sm:$0xff]  ;;  %v1487_v62 = vrot.slane %v5769_v40, 1 }
 0x14a   : > { %v1284_v52 = vpop.f32.mrf.mxu1  ;;  %v2491_v35 = vshrl.u32 %v5840_v49, 16 }
 0x14b   : > { %v2150_v36 = vadd.f32 %v2036_v26, %v1716_v48  ;;  %v1095_v52 = vshrl.u32 %v6642_v58, 16 }
 0x14c   : > { %v2672_v37 = vpop.f32.mrf.mxu0 }
 0x14d   : > { %v6648_v47 = vadd.f32 %v2670_v46, %v2150_v36  ;;  %v2482_v46 = vsel %vm994_vm0, %v2477_v2, %v2481_v57  ;;  %v2483_v36 = vshrl.u32 %v5839_v16, 16  ;;  %v2487_v37 = vshll.u32 %v5840_v49, 16  ;;  %v5809_v49 = vld [vmem:[%s6457_s18 + $0x74] sm:$0xff] }
 0x14e   : > { %v1097_v55 = vor.u32 %v1095_v52, %v1093_v22  ;;  %v1488_v16 = vsel %vm1461_vm1, %v1485_v50, %v1487_v62 }
 0x14f   : > { %v2485_v2 = vor.u32 %v2483_v36, %v2481_v57  ;;  %v6669_v57 = vld [vmem:[%s6457_s18 + $0x70] sm:$0xff] }
 0x150   : > { %v1604_v63 = vpop.f32.mrf.mxu2  ;;  %v1107_v50 = vshll.u32 %v6669_v57, 16 }
 0x151   : > { %v2038_v15 = vpop.f32.mrf.mxu3  ;;  %v2489_v63 = vrot.slane %v2487_v37, 1 }
 0x152   : > { %v1287_v29 = vpop.f32.mrf.mxu1  ;;  %v1109_v37 = vrot.slane %v1107_v50, 1 }
 0x153   : > { %v1398_v0 = vadd.f32 %v1287_v29, %v6567_v17  ;;  %v2490_v22 = vsel %vm994_vm0, %v2485_v2, %v2489_v63 }
 0x154   : > { %v2675_v14 = vpop.f32.mrf.mxu0 }
 0x155   : > { %1326 = vmatmul.bf16.gmra.mxu1 %v1094_v8  ;;  %1646 = vmatmul.bf16.gmra.mxu2 %v1486_v4  ;;  %v1102_v4 = vsel %vm994_vm0, %v1097_v55, %v1101_v61 }
 0x156   : > { %2080 = vmatmul.bf16.gmra.mxu3 %v5807_v51  ;;  %v5808_v51 = vld [vmem:[%s6457_s18 + $0x6c] sm:$0xff] }
 0x157   : > { %2714 = vmatmul.bf16.gmra.mxu0 %v2482_v46 }
 0x158   : > { %v1607_v21 = vpop.f32.mrf.mxu2 }
 0x159   : > { %v1718_v48 = vadd.f32 %v1607_v21, %v1398_v0  ;;  %v2041_v26 = vpop.f32.mrf.mxu3  ;;  %v5841_v0 = vld [vmem:[%s6457_s18 + $0x7c] sm:$0xff] }
 0x15a   : > { %v1289_v27 = vpop.f32.mrf.mxu1 }
 0x15b   : > { %v2152_v3 = vadd.f32 %v2041_v26, %v1718_v48  ;;  %v1399_v17 = vadd.f32 %v1289_v27, %v6578_v28  ;;  %v1103_v27 = vshrl.u32 %v5769_v40, 16 }
 0x15c   : > { %v2677_v34 = vpop.f32.mrf.mxu0 }
 0x15d   : > { %v6659_v45 = vadd.f32 %v2675_v14, %v2152_v3  ;;  %v2495_v3 = vshll.u32 %v5841_v0, 16  ;;  %v1105_v36 = vor.u32 %v1103_v27, %v1101_v61  ;;  %v5861_v27 = vld [vmem:[#allocation6 + $0x150] sm:$0xff] }
 0x15e   : > { %2975 = vmatpush.bf16.msra.mxu1 %v5861_v27 }
 0x15f   : > { %v2497_v2 = vrot.slane %v2495_v3, 1  ;;  %v1110_v40 = vsel %vm994_vm0, %v1105_v36, %v1109_v37 }
 0x160   : > { %v1609_v15 = vpop.f32.mrf.mxu2 }
 0x161   : > { %v1719_v29 = vadd.f32 %v1609_v15, %v1399_v17  ;;  %v2043_v58 = vpop.f32.mrf.mxu3  ;;  %v2493_v17 = vor.u32 %v2491_v35, %v2489_v63  ;;  %v6682_v63 = vld [vmem:[%s6457_s18 + $0x78] sm:$0xff]  ;;  %v1111_v35 = vshrl.u32 %v6669_v57, 16 }
 0x162   : > { %v1292_v8 = vpop.f32.mrf.mxu1 }
 0x163   : > { %v2153_v14 = vadd.f32 %v2043_v58, %v1719_v29 }
 0x164   : > { %v2680_v46 = vpop.f32.mrf.mxu0 }
 0x165   : > { %1331 = vmatmul.bf16.gmra.mxu1 %v1102_v4  ;;  %1651 = vmatmul.bf16.gmra.mxu2 %v1488_v16  ;;  %v6666_v28 = vadd.f32 %v2677_v34, %v2153_v14  ;;  %v1489_v34 = vrot.slane %v6669_v57, 1  ;;  %v5893_v14 = vld [vmem:[#allocation6 + $0x190] sm:$0xff] }
 0x166   : > { %2085 = vmatmul.bf16.gmra.mxu3 %v5808_v51  ;;  %v2498_v51 = vsel %vm994_vm0, %v2493_v17, %v2497_v2  ;;  %v5924_v46 = vld [vmem:[#allocation6 + $0x1d0] sm:$0xff]  ;;  %3409 = vmatpush.bf16.msra.mxu2 %v5893_v14 }
 0x167   : > { %2719 = vmatmul.bf16.gmra.mxu0 %v2490_v22  ;;  %v1490_v4 = vsel %vm1461_vm1, %v1487_v62, %v1489_v34  ;;  %4043 = vmatpush.bf16.msra.mxu3 %v5924_v46  ;;  %v5810_v14 = vld [vmem:[%s6457_s18 + $0x7c] sm:$0xff] }
 0x168   : > { %v1612_v21 = vpop.f32.mrf.mxu2 }
 0x169   : > { %v2046_v48 = vpop.f32.mrf.mxu3  ;;  %v5842_v21 = vld [vmem:[%s6457_s18 + $0x84] sm:$0xff] }
 0x16a   : > { %v1294_v26 = vpop.f32.mrf.mxu1  ;;  %v2503_v17 = vshll.u32 %v5842_v21, 16 }
 0x16b   : > { %v1401_v55 = vadd.f32 %v1294_v26, %v6592_v59 }
 0x16c   : > { %v2682_v52 = vpop.f32.mrf.mxu0  ;;  %v2505_v57 = vrot.slane %v2503_v17, 1 }
 0x170   : > { %v1614_v15 = vpop.f32.mrf.mxu2 }
 0x171   : > { %v1721_v29 = vadd.f32 %v1614_v15, %v1401_v55  ;;  %v2048_v58 = vpop.f32.mrf.mxu3  ;;  %v2499_v55 = vshrl.u32 %v5841_v0, 16  ;;  %v5932_v15 = vld [vmem:[#allocation6 + $0x210] sm:$0xff] }
 0x172   : > { %v1297_v8 = vpop.f32.mrf.mxu1  ;;  %4362 = vmatpush.bf16.msra.mxu0 %v5932_v15 }
 0x173   : > { %v2155_v16 = vadd.f32 %v2048_v58, %v1721_v29  ;;  %v1402_v22 = vadd.f32 %v1297_v8, %v6603_v20  ;;  %v1113_v29 = vor.u32 %v1111_v35, %v1109_v37  ;;  %v1491_v8 = vrot.slane %v6682_v63, 1  ;;  %v5772_v37 = vld [vmem:[%s6457_s18 + $0x80] sm:$0xff] }
 0x174   : > { %v2685_v61 = vpop.f32.mrf.mxu0  ;;  %v1123_v35 = vshll.u32 %v5772_v37, 16 }
 0x175   : > { %1336 = vmatmul.bf16.gmra.mxu1 %v1110_v40  ;;  %1656 = vmatmul.bf16.gmra.mxu2 %v1490_v4  ;;  %v6679_v59 = vadd.f32 %v2682_v52, %v2155_v16  ;;  %v1115_v52 = vshll.u32 %v6682_v63, 16  ;;  %v2501_v40 = vor.u32 %v2499_v55, %v2497_v2 }
 0x176   : > { %2090 = vmatmul.bf16.gmra.mxu3 %v5809_v49  ;;  %v1125_v15 = vrot.slane %v1123_v35, 1 }
 0x177   : > { %2724 = vmatmul.bf16.gmra.mxu0 %v2498_v51  ;;  %v1117_v58 = vrot.slane %v1115_v52, 1  ;;  %v1492_v51 = vsel %vm1461_vm1, %v1489_v34, %v1491_v8 }
 0x178   : > { %v1617_v48 = vpop.f32.mrf.mxu2 }
 0x179   : > { %v1722_v62 = vadd.f32 %v1617_v48, %v1402_v22  ;;  %v2051_v26 = vpop.f32.mrf.mxu3  ;;  %v1118_v0 = vsel %vm994_vm0, %v1113_v29, %v1117_v58  ;;  %v5843_v22 = vld [vmem:[%s6457_s18 + $0x8c] sm:$0xff]  ;;  %v1493_v29 = vrot.slane %v5772_v37, 1 }
 0x17a   : > { %v1299_v50 = vpop.f32.mrf.mxu1  ;;  %v2515_v35 = vshrl.u32 %v5843_v22, 16 }
 0x17b   : > { %v2156_v3 = vadd.f32 %v2051_v26, %v1722_v62  ;;  %v1119_v50 = vshrl.u32 %v6682_v63, 16 }
 0x17c   : > { %v2687_v36 = vpop.f32.mrf.mxu0 }
 0x17d   : > { %v6688_v20 = vadd.f32 %v2685_v61, %v2156_v3  ;;  %v2506_v61 = vsel %vm994_vm0, %v2501_v40, %v2505_v57  ;;  %v2507_v3 = vshrl.u32 %v5842_v21, 16  ;;  %v2511_v36 = vshll.u32 %v5843_v22, 16  ;;  %v5812_v22 = vld [vmem:[%s6457_s18 + $0x8c] sm:$0xff] }
 0x17e   : > { %v1121_v17 = vor.u32 %v1119_v50, %v1117_v58  ;;  %v1494_v21 = vsel %vm1461_vm1, %v1491_v8, %v1493_v29 }
 0x17f   : > { %v2509_v40 = vor.u32 %v2507_v3, %v2505_v57  ;;  %v6709_v57 = vld [vmem:[%s6457_s18 + $0x88] sm:$0xff] }
 0x180   : > { %v1619_v4 = vpop.f32.mrf.mxu2  ;;  %v1131_v8 = vshll.u32 %v6709_v57, 16 }
 0x181   : > { %v2053_v49 = vpop.f32.mrf.mxu3  ;;  %v2513_v4 = vrot.slane %v2511_v36, 1 }
 0x182   : > { %v1302_v16 = vpop.f32.mrf.mxu1  ;;  %v1133_v36 = vrot.slane %v1131_v8, 1 }
 0x183   : > { %v1404_v2 = vadd.f32 %v1302_v16, %v6512_v60  ;;  %v2514_v58 = vsel %vm994_vm0, %v2509_v40, %v2513_v4 }
 0x184   : > { %v2690_v46 = vpop.f32.mrf.mxu0 }
 0x185   : > { %1341 = vmatmul.bf16.gmra.mxu1 %v1118_v0  ;;  %1661 = vmatmul.bf16.gmra.mxu2 %v1492_v51  ;;  %v1126_v51 = vsel %vm994_vm0, %v1121_v17, %v1125_v15 }
 0x186   : > { %2095 = vmatmul.bf16.gmra.mxu3 %v5810_v14  ;;  %v5811_v14 = vld [vmem:[%s6457_s18 + $0x84] sm:$0xff] }
 0x187   : > { %2729 = vmatmul.bf16.gmra.mxu0 %v2506_v61 }
 0x188   : > { %v1622_v48 = vpop.f32.mrf.mxu2 }
 0x189   : > { %v1724_v62 = vadd.f32 %v1622_v48, %v1404_v2  ;;  %v2056_v26 = vpop.f32.mrf.mxu3  ;;  %v5844_v2 = vld [vmem:[%s6457_s18 + $0x94] sm:$0xff] }
 0x18a   : > { %v1304_v27 = vpop.f32.mrf.mxu1 }
 0x18b   : > { %v2158_v34 = vadd.f32 %v2056_v26, %v1724_v62  ;;  %v1405_v60 = vadd.f32 %v1304_v27, %v6526_v7  ;;  %v1127_v27 = vshrl.u32 %v5772_v37, 16 }
 0x18c   : > { %v2692_v52 = vpop.f32.mrf.mxu0 }
 0x18d   : > { %v6699_v55 = vadd.f32 %v2690_v46, %v2158_v34  ;;  %v2519_v34 = vshll.u32 %v5844_v2, 16  ;;  %v1129_v3 = vor.u32 %v1127_v27, %v1125_v15  ;;  %v5860_v27 = vld [vmem:[#allocation6 + $0x148] sm:$0xff] }
 0x18e   : > { %2976 = vmatpush.bf16.msra.mxu1 %v5860_v27 }
 0x18f   : > { %v2521_v40 = vrot.slane %v2519_v34, 1  ;;  %v1134_v37 = vsel %vm994_vm0, %v1129_v3, %v1133_v36 }
 0x190   : > { %v1624_v49 = vpop.f32.mrf.mxu2 }
 0x191   : > { %v1725_v16 = vadd.f32 %v1624_v49, %v1405_v60  ;;  %v2058_v63 = vpop.f32.mrf.mxu3  ;;  %v2517_v60 = vor.u32 %v2515_v35, %v2513_v4  ;;  %v6722_v4 = vld [vmem:[%s6457_s18 + $0x90] sm:$0xff]  ;;  %v1135_v35 = vshrl.u32 %v6709_v57, 16 }
 0x192   : > { %v1307_v0 = vpop.f32.mrf.mxu1 }
 0x193   : > { %v2159_v46 = vadd.f32 %v2058_v63, %v1725_v16 }
 0x194   : > { %v2695_v61 = vpop.f32.mrf.mxu0 }
 0x195   : > { %1346 = vmatmul.bf16.gmra.mxu1 %v1126_v51  ;;  %1666 = vmatmul.bf16.gmra.mxu2 %v1494_v21  ;;  %v6706_v7 = vadd.f32 %v2692_v52, %v2159_v46  ;;  %v1495_v52 = vrot.slane %v6709_v57, 1  ;;  %v5892_v46 = vld [vmem:[#allocation6 + $0x188] sm:$0xff] }
 0x196   : > { %2100 = vmatmul.bf16.gmra.mxu3 %v5811_v14  ;;  %v2522_v14 = vsel %vm994_vm0, %v2517_v60, %v2521_v40  ;;  %v5923_v61 = vld [vmem:[#allocation6 + $0x1c8] sm:$0xff]  ;;  %3410 = vmatpush.bf16.msra.mxu2 %v5892_v46 }
 0x197   : > { %2734 = vmatmul.bf16.gmra.mxu0 %v2514_v58  ;;  %v1496_v51 = vsel %vm1461_vm1, %v1493_v29, %v1495_v52  ;;  %4044 = vmatpush.bf16.msra.mxu3 %v5923_v61  ;;  %v5813_v46 = vld [vmem:[%s6457_s18 + $0x94] sm:$0xff] }
 0x198   : > { %v1627_v48 = vpop.f32.mrf.mxu2 }
 0x199   : > { %v2061_v62 = vpop.f32.mrf.mxu3  ;;  %v5845_v48 = vld [vmem:[%s6457_s18 + $0x9c] sm:$0xff] }
 0x19a   : > { %v1309_v26 = vpop.f32.mrf.mxu1  ;;  %v2527_v60 = vshll.u32 %v5845_v48, 16 }
 0x19b   : > { %v1407_v17 = vadd.f32 %v1309_v26, %v6540_v30 }
 0x19c   : > { %v2697_v50 = vpop.f32.mrf.mxu0  ;;  %v2529_v57 = vrot.slane %v2527_v60, 1 }
 0x1a0   : > { %v1629_v49 = vpop.f32.mrf.mxu2 }
 0x1a1   : > { %v1727_v16 = vadd.f32 %v1629_v49, %v1407_v17  ;;  %v2063_v63 = vpop.f32.mrf.mxu3  ;;  %v2523_v17 = vshrl.u32 %v5844_v2, 16  ;;  %v5931_v49 = vld [vmem:[#allocation6 + $0x208] sm:$0xff] }
 0x1a2   : > { %v1312_v0 = vpop.f32.mrf.mxu1  ;;  %4363 = vmatpush.bf16.msra.mxu0 %v5931_v49 }
 0x1a3   : > { %v2161_v21 = vadd.f32 %v2063_v63, %v1727_v16  ;;  %v1408_v58 = vadd.f32 %v1312_v0, %v6548_v43  ;;  %v1137_v16 = vor.u32 %v1135_v35, %v1133_v36  ;;  %v1497_v0 = vrot.slane %v6722_v4, 1  ;;  %v5775_v36 = vld [vmem:[%s6457_s18 + $0x98] sm:$0xff] }
 0x1a4   : > { %v2700_v15 = vpop.f32.mrf.mxu0  ;;  %v1147_v35 = vshll.u32 %v5775_v36, 16 }
 0x1a5   : > { %1351 = vmatmul.bf16.gmra.mxu1 %v1134_v37  ;;  %1671 = vmatmul.bf16.gmra.mxu2 %v1496_v51  ;;  %v6719_v30 = vadd.f32 %v2697_v50, %v2161_v21  ;;  %v1139_v50 = vshll.u32 %v6722_v4, 16  ;;  %v2525_v37 = vor.u32 %v2523_v17, %v2521_v40 }
 0x1a6   : > { %2105 = vmatmul.bf16.gmra.mxu3 %v5812_v22  ;;  %v1149_v49 = vrot.slane %v1147_v35, 1 }
 0x1a7   : > { %2739 = vmatmul.bf16.gmra.mxu0 %v2522_v14  ;;  %v1141_v63 = vrot.slane %v1139_v50, 1  ;;  %v1498_v14 = vsel %vm1461_vm1, %v1495_v52, %v1497_v0 }
 0x1a8   : > { %v1632_v62 = vpop.f32.mrf.mxu2 }
 0x1a9   : > { %v1728_v29 = vadd.f32 %v1632_v62, %v1408_v58  ;;  %v2066_v26 = vpop.f32.mrf.mxu3  ;;  %v1142_v2 = vsel %vm994_vm0, %v1137_v16, %v1141_v63  ;;  %v5846_v58 = vld [vmem:[%s6457_s18 + $0xa4] sm:$0xff]  ;;  %v1499_v16 = vrot.slane %v5775_v36, 1 }
 0x1aa   : > { %v1314_v8 = vpop.f32.mrf.mxu1  ;;  %v2539_v35 = vshrl.u32 %v5846_v58, 16 }
 0x1ab   : > { %v2162_v34 = vadd.f32 %v2066_v26, %v1728_v29  ;;  %v1143_v8 = vshrl.u32 %v6722_v4, 16 }
 0x1ac   : > { %v2702_v3 = vpop.f32.mrf.mxu0 }
 0x1ad   : > { %v6728_v43 = vadd.f32 %v2700_v15, %v2162_v34  ;;  %v2530_v15 = vsel %vm994_vm0, %v2525_v37, %v2529_v57  ;;  %v2531_v34 = vshrl.u32 %v5845_v48, 16  ;;  %v2535_v3 = vshll.u32 %v5846_v58, 16  ;;  %v5815_v58 = vld [vmem:[%s6457_s18 + $0xa4] sm:$0xff] }
 0x1ae   : > { %v1145_v60 = vor.u32 %v1143_v8, %v1141_v63  ;;  %v1500_v48 = vsel %vm1461_vm1, %v1497_v0, %v1499_v16 }
 0x1af   : > { %v2533_v37 = vor.u32 %v2531_v34, %v2529_v57  ;;  %v6749_v57 = vld [vmem:[%s6457_s18 + $0xa0] sm:$0xff] }
 0x1b0   : > { %v1634_v51 = vpop.f32.mrf.mxu2  ;;  %v1155_v0 = vshll.u32 %v6749_v57, 16 }
 0x1b1   : > { %v2068_v22 = vpop.f32.mrf.mxu3  ;;  %v2537_v51 = vrot.slane %v2535_v3, 1 }
 0x1b2   : > { %v1317_v21 = vpop.f32.mrf.mxu1  ;;  %v1157_v3 = vrot.slane %v1155_v0, 1 }
 0x1b3   : > { %v1410_v40 = vadd.f32 %v1317_v21, %v6562_v13  ;;  %v2538_v63 = vsel %vm994_vm0, %v2533_v37, %v2537_v51 }
 0x1b4   : > { %v2705_v61 = vpop.f32.mrf.mxu0 }
 0x1b5   : > { %1356 = vmatmul.bf16.gmra.mxu1 %v1142_v2  ;;  %1676 = vmatmul.bf16.gmra.mxu2 %v1498_v14  ;;  %v1150_v14 = vsel %vm994_vm0, %v1145_v60, %v1149_v49 }
 0x1b6   : > { %2110 = vmatmul.bf16.gmra.mxu3 %v5813_v46  ;;  %v5814_v46 = vld [vmem:[%s6457_s18 + $0x9c] sm:$0xff] }
 0x1b7   : > { %2744 = vmatmul.bf16.gmra.mxu0 %v2530_v15 }
 0x1b8   : > { %v1637_v62 = vpop.f32.mrf.mxu2 }
 0x1b9   : > { %v1730_v29 = vadd.f32 %v1637_v62, %v1410_v40  ;;  %v2071_v26 = vpop.f32.mrf.mxu3  ;;  %v5847_v40 = vld [vmem:[%s6457_s18 + $0xac] sm:$0xff] }
 0x1ba   : > { %v1319_v27 = vpop.f32.mrf.mxu1 }
 0x1bb   : > { %v2164_v52 = vadd.f32 %v2071_v26, %v1730_v29  ;;  %v1411_v13 = vadd.f32 %v1319_v27, %v6576_v25  ;;  %v1151_v27 = vshrl.u32 %v5775_v36, 16 }
 0x1bc   : > { %v2707_v50 = vpop.f32.mrf.mxu0 }
 0x1bd   : > { %v6739_v17 = vadd.f32 %v2705_v61, %v2164_v52  ;;  %v2543_v52 = vshll.u32 %v5847_v40, 16  ;;  %v1153_v34 = vor.u32 %v1151_v27, %v1149_v49  ;;  %v5859_v27 = vld [vmem:[#allocation6 + $0x140] sm:$0xff] }
 0x1be   : > { %2977 = vmatpush.bf16.msra.mxu1 %v5859_v27 }
 0x1bf   : > { %v2545_v37 = vrot.slane %v2543_v52, 1  ;;  %v1158_v36 = vsel %vm994_vm0, %v1153_v34, %v1157_v3 }
 0x1c0   : > { %v1639_v22 = vpop.f32.mrf.mxu2 }
 0x1c1   : > { %v1731_v21 = vadd.f32 %v1639_v22, %v1411_v13  ;;  %v2073_v4 = vpop.f32.mrf.mxu3  ;;  %v2541_v13 = vor.u32 %v2539_v35, %v2537_v51  ;;  %v6762_v51 = vld [vmem:[%s6457_s18 + $0xa8] sm:$0xff]  ;;  %v1159_v35 = vshrl.u32 %v6749_v57, 16 }
 0x1c2   : > { %v1322_v2 = vpop.f32.mrf.mxu1 }
 0x1c3   : > { %v2165_v61 = vadd.f32 %v2073_v4, %v1731_v21 }
 0x1c4   : > { %v2710_v15 = vpop.f32.mrf.mxu0 }
 0x1c5   : > { %1361 = vmatmul.bf16.gmra.mxu1 %v1150_v14  ;;  %1681 = vmatmul.bf16.gmra.mxu2 %v1500_v48  ;;  %v6746_v25 = vadd.f32 %v2707_v50, %v2165_v61  ;;  %v1501_v50 = vrot.slane %v6749_v57, 1  ;;  %v5891_v61 = vld [vmem:[#allocation6 + $0x180] sm:$0xff] }
 0x1c6   : > { %2115 = vmatmul.bf16.gmra.mxu3 %v5814_v46  ;;  %v2546_v46 = vsel %vm994_vm0, %v2541_v13, %v2545_v37  ;;  %v5922_v15 = vld [vmem:[#allocation6 + $0x1c0] sm:$0xff]  ;;  %3411 = vmatpush.bf16.msra.mxu2 %v5891_v61 }
 0x1c7   : > { %2749 = vmatmul.bf16.gmra.mxu0 %v2538_v63  ;;  %v1502_v14 = vsel %vm1461_vm1, %v1499_v16, %v1501_v50  ;;  %4045 = vmatpush.bf16.msra.mxu3 %v5922_v15  ;;  %v5816_v61 = vld [vmem:[%s6457_s18 + $0xac] sm:$0xff] }
 0x1c8   : > { %v1642_v62 = vpop.f32.mrf.mxu2 }
 0x1c9   : > { %v2076_v29 = vpop.f32.mrf.mxu3  ;;  %v5848_v62 = vld [vmem:[%s6457_s18 + $0xb4] sm:$0xff] }
 0x1ca   : > { %v1324_v26 = vpop.f32.mrf.mxu1  ;;  %v2551_v13 = vshll.u32 %v5848_v62, 16 }
 0x1cb   : > { %v1413_v60 = vadd.f32 %v1324_v26, %v6590_v56 }
 0x1cc   : > { %v2712_v8 = vpop.f32.mrf.mxu0  ;;  %v2553_v57 = vrot.slane %v2551_v13, 1 }
 0x1d0   : > { %v1644_v22 = vpop.f32.mrf.mxu2 }
 0x1d1   : > { %v1733_v21 = vadd.f32 %v1644_v22, %v1413_v60  ;;  %v2078_v4 = vpop.f32.mrf.mxu3  ;;  %v2547_v60 = vshrl.u32 %v5847_v40, 16  ;;  %v5930_v22 = vld [vmem:[#allocation6 + $0x200] sm:$0xff] }
 0x1d2   : > { %v1327_v2 = vpop.f32.mrf.mxu1  ;;  %4364 = vmatpush.bf16.msra.mxu0 %v5930_v22 }
 0x1d3   : > { %v2167_v48 = vadd.f32 %v2078_v4, %v1733_v21  ;;  %v1414_v63 = vadd.f32 %v1327_v2, %v6598_v12  ;;  %v1161_v21 = vor.u32 %v1159_v35, %v1157_v3  ;;  %v1503_v2 = vrot.slane %v6762_v51, 1  ;;  %v5778_v3 = vld [vmem:[%s6457_s18 + $0xb0] sm:$0xff] }
 0x1d4   : > { %v2715_v49 = vpop.f32.mrf.mxu0  ;;  %v1171_v35 = vshll.u32 %v5778_v3, 16 }
 0x1d5   : > { %1366 = vmatmul.bf16.gmra.mxu1 %v1158_v36  ;;  %1686 = vmatmul.bf16.gmra.mxu2 %v1502_v14  ;;  %v6759_v56 = vadd.f32 %v2712_v8, %v2167_v48  ;;  %v1163_v8 = vshll.u32 %v6762_v51, 16  ;;  %v2549_v36 = vor.u32 %v2547_v60, %v2545_v37 }
 0x1d6   : > { %2120 = vmatmul.bf16.gmra.mxu3 %v5815_v58  ;;  %v1173_v22 = vrot.slane %v1171_v35, 1 }
 0x1d7   : > { %2754 = vmatmul.bf16.gmra.mxu0 %v2546_v46  ;;  %v1165_v4 = vrot.slane %v1163_v8, 1  ;;  %v1504_v46 = vsel %vm1461_vm1, %v1501_v50, %v1503_v2 }
 0x1d8   : > { %v1647_v29 = vpop.f32.mrf.mxu2 }
 0x1d9   : > { %v1734_v16 = vadd.f32 %v1647_v29, %v1414_v63  ;;  %v2081_v26 = vpop.f32.mrf.mxu3  ;;  %v1166_v40 = vsel %vm994_vm0, %v1161_v21, %v1165_v4  ;;  %v5849_v63 = vld [vmem:[%s6457_s18 + $0xbc] sm:$0xff]  ;;  %v1505_v21 = vrot.slane %v5778_v3, 1 }
 0x1da   : > { %v1329_v0 = vpop.f32.mrf.mxu1  ;;  %v2563_v35 = vshrl.u32 %v5849_v63, 16 }
 0x1db   : > { %v2168_v52 = vadd.f32 %v2081_v26, %v1734_v16  ;;  %v1167_v0 = vshrl.u32 %v6762_v51, 16 }
 0x1dc   : > { %v2717_v34 = vpop.f32.mrf.mxu0 }
 0x1dd   : > { %v6768_v12 = vadd.f32 %v2715_v49, %v2168_v52  ;;  %v2554_v49 = vsel %vm994_vm0, %v2549_v36, %v2553_v57  ;;  %v2555_v52 = vshrl.u32 %v5848_v62, 16  ;;  %v2559_v34 = vshll.u32 %v5849_v63, 16  ;;  %v5818_v63 = vld [vmem:[%s6457_s18 + $0xbc] sm:$0xff] }
 0x1de   : > { %v1169_v13 = vor.u32 %v1167_v0, %v1165_v4  ;;  %v1506_v62 = vsel %vm1461_vm1, %v1503_v2, %v1505_v21 }
 0x1df   : > { %v2557_v36 = vor.u32 %v2555_v52, %v2553_v57  ;;  %v5779_v57 = vld [vmem:[%s6457_s18 + $0xb8] sm:$0xff] }
 0x1e0   : > { %v1649_v14 = vpop.f32.mrf.mxu2  ;;  %v1179_v2 = vshll.u32 %v5779_v57, 16 }
 0x1e1   : > { %v2083_v58 = vpop.f32.mrf.mxu3  ;;  %v2561_v14 = vrot.slane %v2559_v34, 1 }
 0x1e2   : > { %v1332_v48 = vpop.f32.mrf.mxu1  ;;  %v1181_v34 = vrot.slane %v1179_v2, 1 }
 0x1e3   : > { %v1416_v37 = vadd.f32 %v1332_v48, %v6522_v5  ;;  %v2562_v4 = vsel %vm994_vm0, %v2557_v36, %v2561_v14 }
 0x1e4   : > { %v2720_v15 = vpop.f32.mrf.mxu0 }
 0x1e5   : > { %1371 = vmatmul.bf16.gmra.mxu1 %v1166_v40  ;;  %1691 = vmatmul.bf16.gmra.mxu2 %v1504_v46  ;;  %v1174_v46 = vsel %vm994_vm0, %v1169_v13, %v1173_v22  ;;  %v1507_v13 = vrot.slane %v5779_v57, 1 }
 0x1e6   : > { %2125 = vmatmul.bf16.gmra.mxu3 %v5816_v61  ;;  %v5817_v61 = vld [vmem:[%s6457_s18 + $0xb4] sm:$0xff] }
 0x1e7   : > { %2759 = vmatmul.bf16.gmra.mxu0 %v2554_v49 }
 0x1e8   : > { %v1652_v29 = vpop.f32.mrf.mxu2 }
 0x1e9   : > { %v1736_v16 = vadd.f32 %v1652_v29, %v1416_v37  ;;  %v2086_v26 = vpop.f32.mrf.mxu3  ;;  %v5850_v37 = vld [vmem:[%s6457_s18 + $0xc4] sm:$0xff] }
 0x1ea   : > { %v1334_v27 = vpop.f32.mrf.mxu1 }
 0x1eb   : > { %v2170_v50 = vadd.f32 %v2086_v26, %v1736_v16  ;;  %v1417_v5 = vadd.f32 %v1334_v27, %v6530_v18  ;;  %v1175_v27 = vshrl.u32 %v5778_v3, 16 }
 0x1ec   : > { %v2722_v8 = vpop.f32.mrf.mxu0 }
 0x1ed   : > { %v6779_v60 = vadd.f32 %v2720_v15, %v2170_v50  ;;  %v2567_v50 = vshll.u32 %v5850_v37, 16  ;;  %v1177_v52 = vor.u32 %v1175_v27, %v1173_v22 }
 0x1ef   : > { %v2569_v36 = vrot.slane %v2567_v50, 1  ;;  %v1182_v3 = vsel %vm994_vm0, %v1177_v52, %v1181_v34  ;;  %v1183_v50 = vshrl.u32 %v5779_v57, 16 }
 0x1f0   : > { %v1654_v58 = vpop.f32.mrf.mxu2 }
 0x1f1   : > { %v1737_v48 = vadd.f32 %v1654_v58, %v1417_v5  ;;  %v2088_v51 = vpop.f32.mrf.mxu3  ;;  %v2565_v5 = vor.u32 %v2563_v35, %v2561_v14  ;;  %v853_v58 = vld [vmem:[%s6457_s18 + $0xc0] sm:$0x1] }
 0x1f2   : > { %v1337_v40 = vpop.f32.mrf.mxu1 }
 0x1f3   : > { %v2171_v15 = vadd.f32 %v2088_v51, %v1737_v48  ;;  %v2242_v51 = vld [vmem:[%s6457_s18 + $0xcc] sm:$0x1] }
 0x1f4   : > { %v2725_v49 = vpop.f32.mrf.mxu0 }
 0x1f5   : > { %1376 = vmatmul.bf16.gmra.mxu1 %v1174_v46  ;;  %1696 = vmatmul.bf16.gmra.mxu2 %v1506_v62  ;;  %v6786_v18 = vadd.f32 %v2722_v8, %v2171_v15  ;;  %v968_v15 = vunpack.c.l.b16 %v853_v58  ;;  %v2571_v58 = vshrl.u32 %v5850_v37, 16 }
 0x1f6   : > { %2130 = vmatmul.bf16.gmra.mxu3 %v5817_v61  ;;  %v1508_v61 = vsel %vm1461_vm1, %v1505_v21, %v1507_v13 }
 0x1f7   : > { %2764 = vmatmul.bf16.gmra.mxu0 %v2562_v4  ;;  %v2570_v4 = vsel %vm994_vm0, %v2565_v5, %v2569_v36  ;;  %v993_v14 = vpack.c.b16 %v968_v15, %v968_v15  ;;  %v5819_v15 = vld [vmem:[%s6457_s18 + $0xc4] sm:$0xff] }
 0x1f8   : > { %v1657_v29 = vpop.f32.mrf.mxu2 }
 0x1f9   : > { %v2091_v16 = vpop.f32.mrf.mxu3  ;;  %v2357_v29 = vunpack.c.l.b16 %v2242_v51  ;;  %v1187_v52 = vshll.u32 %v993_v14, 16  ;;  %v1185_v51 = vor.u32 %v1183_v50, %v1181_v34  ;;  %v6030_v34 = vld [vmem:[%s6457_s18 + $0x18] sm:$0xff]  }
 0x1fa   : > { %v1339_v26 = vpop.f32.mrf.mxu1 }
 0x1fb   : > { %v1419_v8 = vadd.f32 %v1339_v26, %v6544_v41  ;;  %v6800_v26 = vpack.c.b16 %v2357_v29, %v2357_v29 }
 0x1fc   : > { %v2727_v0 = vpop.f32.mrf.mxu0 }
 0x200   : > { %v1659_v48 = vpop.f32.mrf.mxu2 }
 0x201   : > { %v1739_v40 = vadd.f32 %v1659_v48, %v1419_v8  ;;  %v2093_v46 = vpop.f32.mrf.mxu3 }
 0x202   : > { %v1342_v62 = vpop.f32.mrf.mxu1 }
 0x203   : > { %v2173_v49 = vadd.f32 %v2093_v46, %v1739_v40  ;;  %v1420_v16 = vadd.f32 %v1342_v62, %v6558_v53  ;;  %v1189_v53 = vrot.slane %v1187_v52, 1  ;;  %v1509_v40 = vrot.slane %v993_v14, 1  ;;  %v5899_v14 = vld [vmem:[%s6457_s18 + $0x20] sm:$0xff] }
 0x204   : > { %v2730_v22 = vpop.f32.mrf.mxu0  ;;  %v2573_v46 = vor.u32 %v2571_v58, %v2569_v36  ;;  %v3773_v36 = vshll.u32 %v6030_v34, 16  ;;  %v3771_v52 = vshrl.u32 %v6030_v34, 16 }
 0x205   : > { %1381 = vmatmul.bf16.gmra.mxu1 %v1182_v3  ;;  %1701 = vmatmul.bf16.gmra.mxu2 %v1508_v61  ;;  %v6797_v41 = vadd.f32 %v2727_v0, %v2173_v49  ;;  %v2575_v0 = vshll.u32 %v6800_v26, 16  ;;  %v1510_v37 = vsel %vm1461_vm1, %v1507_v13, %v1509_v40  ;;  %v6154_v40 = vld [vmem:[%s6457_s18 + $0x14] sm:$0xff] }
 0x206   : > { %2135 = vmatmul.bf16.gmra.mxu3 %v5818_v63  ;;  %v1190_v63 = vsel %vm994_vm0, %v1185_v51, %v1189_v53 }
 0x207   : > { %2769 = vmatmul.bf16.gmra.mxu0 %v2570_v4  ;;  %v2577_v62 = vrot.slane %v2575_v0, 1  ;;  %v6179_v4 = vld [vmem:[%s6457_s18 + $0xc] sm:$0xe]  ;;  %v3778_v0 = vshll.u32 %v5899_v14, 16 }
 0x208   : > { %v1662_v27 = vpop.f32.mrf.mxu2  ;;  %v6180_v50 = vor.u32 %v6179_v4, %v6489_v1 }
 0x209   : > { %v1740_v21 = vadd.f32 %v1662_v27, %v1420_v16  ;;  %v2096_v2 = vpop.f32.mrf.mxu3  ;;  %v6031_v27 = vld [vmem:[%s6457_s18 + $0x18] sm:$0xf0] }
 0x20a   : > { %v1344_v35 = vpop.f32.mrf.mxu1 }
 0x20b   : > { %v2174_v8 = vadd.f32 %v2096_v2, %v1740_v21  ;;  %v6032_v21 = vld [vmem:[%s6457_s18 + $0x18] sm:$0xe] }
 0x20c   : > { %v2732_v5 = vpop.f32.mrf.mxu0  ;;  %v6033_v51 = vor.u32 %v6032_v21, %v6031_v27  ;;  %v5900_v27 = vld [vmem:[%s6457_s18 + $0x28] sm:$0xff] }
 0x20d   : > { %v6803_v48 = vadd.f32 %v2730_v22, %v2174_v8  ;;  %v2578_v22 = vsel %vm994_vm0, %v2573_v46, %v2577_v62  ;;  %v3775_v8 = vrot.slane %v3773_v36, 1  ;;  %v2850_v46 = vrot.slane %v6154_v40, 1 }
 0x20e   : > { %v4239_v40 = vrot.slane %v5900_v27, 1 }
 0x20f   : > { %v3776_v62 = vor.u32 %v3775_v8, %v3771_v52  ;;  %v3786_v52 = vshll.u32 %v5900_v27, 16  ;;  %v6155_v8 = vld [vmem:[%s6457_s18 + $0x1c] sm:$0xff] }
 0x210   : > { %v1664_v3 = vpop.f32.mrf.mxu2 }
 0x211   : > { %v2098_v61 = vpop.f32.mrf.mxu3 }
 0x212   : > { %v1347_v57 = vpop.f32.mrf.mxu1  ;;  %v3780_v61 = vrot.slane %v3778_v0, 1 }
 0x213   : > { %v1422_v29 = vadd.f32 %v1347_v57, %v6572_v23  ;;  %v2849_v23 = vrot.slane %v6180_v50, 1  ;;  %v4236_v57 = vrot.slane %v6033_v51, 1  ;;  %v3782_v50 = vshrl.u32 %v5899_v14, 16 }
 0x214   : > { %v2735_v49 = vpop.f32.mrf.mxu0 }
 0x215   : > { %1386 = vmatmul.bf16.gmra.mxu1 %v1190_v63  ;;  %1706 = vmatmul.bf16.gmra.mxu2 %v1510_v37  ;;  %v4237_v63 = vrot.slane %v5899_v14, 1  ;;  %v2851_v34 = vsel %vm1461_vm1, %v2849_v23, %v2850_v46  ;;  %v3784_v51 = vor.u32 %v3782_v50, %v3780_v61  ;;  %v3788_v23 = vrot.slane %v3786_v52, 1  ;;  %v6156_v50 = vld [vmem:[%s6457_s18 + $0x24] sm:$0xff] }
 0x216   : > { %2140 = vmatmul.bf16.gmra.mxu3 %v5819_v15  ;;  %v2854_v52 = vrot.slane %v6156_v50, 1 }
 0x217   : > { %2774 = vmatmul.bf16.gmra.mxu0 %v2578_v22  ;;  %v5867_v22 = vld [vmem:[%s6457_s18 + $0x18] sm:$0xff]  ;;  %v3789_v14 = vsel %vm994_vm0, %v3784_v51, %v3788_v23 }
 0x218   : > { %v1667_v16 = vpop.f32.mrf.mxu2 }
 0x219   : > { %v1742_v2 = vadd.f32 %v1667_v16, %v1422_v29  ;;  %v2101_v13 = vpop.f32.mrf.mxu3  ;;  %v3781_v29 = vsel %vm994_vm0, %v3776_v62, %v3780_v61  ;;  %v4238_v16 = vsel %vm1461_vm1, %v4236_v57, %v4237_v63  ;;  %v5868_v57 = vld [vmem:[%s6457_s18 + $0x20] sm:$0xff] }
 0x21a   : > { %v1349_v35 = vpop.f32.mrf.mxu1 }
 0x21b   : > { %v2176_v5 = vadd.f32 %v2101_v13, %v1742_v2  ;;  %v1423_v3 = vadd.f32 %v1349_v35, %v6580_v38 }
 0x21c   : > { %v2737_v58 = vpop.f32.mrf.mxu0 }
 0x21d   : > { %v6816_v53 = vadd.f32 %v2735_v49, %v2176_v5  ;;  %v2852_v5 = vrot.slane %v6155_v8, 1 }
 0x220   : > { %v1669_v1 = vpop.f32.mrf.mxu2 }
 0x221   : > { %v1743_v37 = vadd.f32 %v1669_v1, %v1423_v3  ;;  %v2103_v15 = vpop.f32.mrf.mxu3 }
 0x222   : > { %v1352_v4 = vpop.f32.mrf.mxu1 }
 0x223   : > { %v2177_v36 = vadd.f32 %v2103_v15, %v1743_v37  ;;  %v2853_v37 = vsel %vm1461_vm1, %v2850_v46, %v2852_v5  ;;  %v4240_v4 = vsel %vm1461_vm1, %v4237_v63, %v4239_v40 }
 0x224   : > { %v2740_v49 = vpop.f32.mrf.mxu0 }
 0x225   : > { %2978 = vmatmul.bf16.vlgmr.msra.gmra.mxu1 %v2851_v34  ;;  %3412 = vmatmul.bf16.vlgmr.msra.gmra.mxu2 %v5867_v22  ;;  %v6824_v38 = vadd.f32 %v2737_v58, %v2177_v36  ;;  %v5901_v34 = vld [vmem:[%s6457_s18 + $0x30] sm:$0xff] }
 0x226   : > { %4046 = vmatmul.bf16.vlgmr.msra.gmra.mxu3 %v3781_v29 }
 0x227   : > { %4365 = vmatmul.bf16.vlgmr.msra.gmra.mxu0 %v4238_v16 }
 0x228   : > { %v1672_v21 = vpop.f32.mrf.mxu2 }
 0x229   : > { %v2106_v2 = vpop.f32.mrf.mxu3 }
 0x22a   : > { %v1354_v13 = vpop.f32.mrf.mxu1  ;;  %v3790_v2 = vshrl.u32 %v5900_v27, 16 }
 0x22b   : > { %v1425_v0 = vadd.f32 %v1354_v13, %v6594_v9  ;;  %v3794_v13 = vshll.u32 %v5901_v34, 16 }
 0x22c   : > { %v2742_v35 = vpop.f32.mrf.mxu0 }
 0x22d   : > { %v3796_v8 = vrot.slane %v3794_v13, 1 }
 0x230   : > { %v1674_v62 = vpop.f32.mrf.mxu2 }
 0x231   : > { %v1745_v58 = vadd.f32 %v1674_v62, %v1425_v0  ;;  %v2108_v3 = vpop.f32.mrf.mxu3  ;;  %v4241_v0 = vrot.slane %v5901_v34, 1  ;;  %v5869_v62 = vld [vmem:[%s6457_s18 + $0x28] sm:$0xff] }
 0x232   : > { %v1357_v1 = vpop.f32.mrf.mxu1 }
 0x233   : > { %v2179_v15 = vadd.f32 %v2108_v3, %v1745_v58  ;;  %v1426_v61 = vadd.f32 %v1357_v1, %v6608_v31  ;;  %v2855_v3 = vsel %vm1461_vm1, %v2852_v5, %v2854_v52  ;;  %v4242_v27 = vsel %vm1461_vm1, %v4239_v40, %v4241_v0  ;;  %v6157_v40 = vld [vmem:[%s6457_s18 + $0x2c] sm:$0xff] }
 0x234   : > { %v2745_v22 = vpop.f32.mrf.mxu0 }
 0x235   : > { %2983 = vmatmul.bf16.gmra.mxu1 %v2853_v37  ;;  %3417 = vmatmul.bf16.gmra.mxu2 %v5868_v57  ;;  %v6833_v9 = vadd.f32 %v2742_v35, %v2179_v15  ;;  %v3792_v35 = vor.u32 %v3790_v2, %v3788_v23  ;;  %v5902_v37 = vld [vmem:[%s6457_s18 + $0x38] sm:$0xff] }
 0x236   : > { %4051 = vmatmul.bf16.gmra.mxu3 %v3789_v14  ;;  %v4243_v13 = vrot.slane %v5902_v37, 1 }
 0x237   : > { %4370 = vmatmul.bf16.gmra.mxu0 %v4240_v4  ;;  %v3797_v1 = vsel %vm994_vm0, %v3792_v35, %v3796_v8 }
 0x238   : > { %v1677_v36 = vpop.f32.mrf.mxu2 }
 0x239   : > { %v1746_v49 = vadd.f32 %v1677_v36, %v1426_v61  ;;  %v2111_v46 = vpop.f32.mrf.mxu3  ;;  %v3798_v36 = vshrl.u32 %v5901_v34, 16 }
 0x23a   : > { %v1359_v29 = vpop.f32.mrf.mxu1 }
 0x23b   : > { %v2180_v16 = vadd.f32 %v2111_v46, %v1746_v49  ;;  %v3802_v49 = vshll.u32 %v5902_v37, 16  ;;  %v2856_v29 = vrot.slane %v6157_v40, 1 }
 0x23c   : > { %v2747_v21 = vpop.f32.mrf.mxu0 }
 0x23d   : > { %v6837_v63 = vadd.f32 %v2745_v22, %v2180_v16  ;;  %v3800_v21 = vor.u32 %v3798_v36, %v3796_v8  ;;  %v3804_v2 = vrot.slane %v3802_v49, 1  ;;  %v5903_v8 = vld [vmem:[%s6457_s18 + $0x40] sm:$0xff] }
 0x23e   : > { %v4245_v49 = vrot.slane %v5903_v8, 1 }
 0x240   : > { %v1679_v51 = vpop.f32.mrf.mxu2 }
 0x241   : > { %v2113_v31 = vpop.f32.mrf.mxu3  ;;  %v5870_v51 = vld [vmem:[%s6457_s18 + $0x30] sm:$0xff] }
 0x242   : > { %v1362_v58 = vpop.f32.mrf.mxu1 }
 0x243   : > { %v1428_v23 = vadd.f32 %v1362_v58, %v6524_v6 }
 0x244   : > { %v2750_v57 = vpop.f32.mrf.mxu0 }
 0x245   : > { %2988 = vmatmul.bf16.gmra.mxu1 %v2855_v3  ;;  %3422 = vmatmul.bf16.gmra.mxu2 %v5869_v62  ;;  %v2857_v62 = vsel %vm1461_vm1, %v2854_v52, %v2856_v29  ;;  %v3805_v3 = vsel %vm994_vm0, %v3800_v21, %v3804_v2  ;;  %v3806_v52 = vshrl.u32 %v5902_v37, 16  ;;  %v5871_v21 = vld [vmem:[%s6457_s18 + $0x38] sm:$0xff] }
 0x246   : > { %4056 = vmatmul.bf16.gmra.mxu3 %v3797_v1 }
 0x247   : > { %4375 = vmatmul.bf16.gmra.mxu0 %v4242_v27  ;;  %v3808_v36 = vor.u32 %v3806_v52, %v3804_v2  ;;  %v6159_v52 = vld [vmem:[%s6457_s18 + $0x3c] sm:$0xff] }
 0x248   : > { %v1682_v15 = vpop.f32.mrf.mxu2 }
 0x249   : > { %v1748_v22 = vadd.f32 %v1682_v15, %v1428_v23  ;;  %v2116_v14 = vpop.f32.mrf.mxu3 }
 0x24a   : > { %v1364_v4 = vpop.f32.mrf.mxu1 }
 0x24b   : > { %v2182_v61 = vadd.f32 %v2116_v14, %v1748_v22  ;;  %v1429_v16 = vadd.f32 %v1364_v4, %v6532_v19  ;;  %v3810_v22 = vshll.u32 %v5903_v8, 16  ;;  %v6158_v14 = vld [vmem:[%s6457_s18 + $0x34] sm:$0xff] }
 0x24c   : > { %v2752_v5 = vpop.f32.mrf.mxu0  ;;  %v2858_v4 = vrot.slane %v6158_v14, 1 }
 0x24d   : > { %v6846_v46 = vadd.f32 %v2750_v57, %v2182_v61  ;;  %v4244_v57 = vsel %vm1461_vm1, %v4241_v0, %v4243_v13  ;;  %v3812_v0 = vrot.slane %v3810_v22, 1  ;;  %v2860_v22 = vrot.slane %v6159_v52, 1 }
 0x24f   : > { %v3813_v37 = vsel %vm994_vm0, %v3808_v36, %v3812_v0 }
 0x250   : > { %v1684_v6 = vpop.f32.mrf.mxu2 }
 0x251   : > { %v1749_v50 = vadd.f32 %v1684_v6, %v1429_v16  ;;  %v2118_v35 = vpop.f32.mrf.mxu3 }
 0x252   : > { %v1367_v31 = vpop.f32.mrf.mxu1 }
 0x253   : > { %v2183_v58 = vadd.f32 %v2118_v35, %v1749_v50  ;;  %v2859_v50 = vsel %vm1461_vm1, %v2856_v29, %v2858_v4  ;;  %v4246_v31 = vsel %vm1461_vm1, %v4243_v13, %v4245_v49 }
 0x254   : > { %v2755_v34 = vpop.f32.mrf.mxu0 }
 0x255   : > { %2993 = vmatmul.bf16.gmra.mxu1 %v2857_v62  ;;  %3427 = vmatmul.bf16.gmra.mxu2 %v5870_v51  ;;  %v6854_v19 = vadd.f32 %v2752_v5, %v2183_v58  ;;  %v5904_v62 = vld [vmem:[%s6457_s18 + $0x48] sm:$0xff] }
 0x256   : > { %4061 = vmatmul.bf16.gmra.mxu3 %v3805_v3 }
 0x257   : > { %4380 = vmatmul.bf16.gmra.mxu0 %v4244_v57 }
 0x258   : > { %v1687_v1 = vpop.f32.mrf.mxu2 }
 0x259   : > { %v2121_v27 = vpop.f32.mrf.mxu3 }
 0x25a   : > { %v1369_v23 = vpop.f32.mrf.mxu1  ;;  %v3814_v27 = vshrl.u32 %v5903_v8, 16 }
 0x25b   : > { %v1431_v61 = vadd.f32 %v1369_v23, %v6546_v42  ;;  %v3818_v23 = vshll.u32 %v5904_v62, 16 }
 0x25c   : > { %v2757_v15 = vpop.f32.mrf.mxu0 }
 0x25d   : > { %v3820_v14 = vrot.slane %v3818_v23, 1 }
 0x260   : > { %v1689_v40 = vpop.f32.mrf.mxu2 }
 0x261   : > { %v1751_v5 = vadd.f32 %v1689_v40, %v1431_v61  ;;  %v2123_v16 = vpop.f32.mrf.mxu3  ;;  %v4247_v61 = vrot.slane %v5904_v62, 1  ;;  %v5872_v40 = vld [vmem:[%s6457_s18 + $0x40] sm:$0xff] }
 0x262   : > { %v1372_v6 = vpop.f32.mrf.mxu1 }
 0x263   : > { %v2185_v35 = vadd.f32 %v2123_v16, %v1751_v5  ;;  %v1432_v2 = vadd.f32 %v1372_v6, %v6560_v54  ;;  %v2861_v16 = vsel %vm1461_vm1, %v2858_v4, %v2860_v22  ;;  %v4248_v8 = vsel %vm1461_vm1, %v4245_v49, %v4247_v61  ;;  %v6160_v49 = vld [vmem:[%s6457_s18 + $0x44] sm:$0xff] }
 0x264   : > { %v2760_v51 = vpop.f32.mrf.mxu0 }
 0x265   : > { %2998 = vmatmul.bf16.gmra.mxu1 %v2859_v50  ;;  %3432 = vmatmul.bf16.gmra.mxu2 %v5871_v21  ;;  %v6863_v42 = vadd.f32 %v2757_v15, %v2185_v35  ;;  %v3816_v15 = vor.u32 %v3814_v27, %v3812_v0  ;;  %v5905_v50 = vld [vmem:[%s6457_s18 + $0x50] sm:$0xff] }
 0x266   : > { %4066 = vmatmul.bf16.gmra.mxu3 %v3813_v37  ;;  %v4249_v23 = vrot.slane %v5905_v50, 1 }
 0x267   : > { %4385 = vmatmul.bf16.gmra.mxu0 %v4246_v31  ;;  %v3821_v6 = vsel %vm994_vm0, %v3816_v15, %v3820_v14 }
 0x268   : > { %v1692_v58 = vpop.f32.mrf.mxu2 }
 0x269   : > { %v1752_v34 = vadd.f32 %v1692_v58, %v1432_v2  ;;  %v2126_v29 = vpop.f32.mrf.mxu3  ;;  %v3822_v58 = vshrl.u32 %v5904_v62, 16 }
 0x26a   : > { %v1374_v3 = vpop.f32.mrf.mxu1 }
 0x26b   : > { %v2186_v57 = vadd.f32 %v2126_v29, %v1752_v34  ;;  %v3826_v34 = vshll.u32 %v5905_v50, 16  ;;  %v2862_v3 = vrot.slane %v6160_v49, 1 }
 0x26c   : > { %v2762_v1 = vpop.f32.mrf.mxu0 }
 0x26d   : > { %v6867_v13 = vadd.f32 %v2760_v51, %v2186_v57  ;;  %v3824_v1 = vor.u32 %v3822_v58, %v3820_v14  ;;  %v3828_v27 = vrot.slane %v3826_v34, 1  ;;  %v5906_v14 = vld [vmem:[%s6457_s18 + $0x58] sm:$0xff] }
 0x26e   : > { %v4251_v34 = vrot.slane %v5906_v14, 1 }
 0x270   : > { %v1694_v36 = vpop.f32.mrf.mxu2 }
 0x271   : > { %v2128_v54 = vpop.f32.mrf.mxu3  ;;  %v5873_v36 = vld [vmem:[%s6457_s18 + $0x48] sm:$0xff] }
 0x272   : > { %v1377_v5 = vpop.f32.mrf.mxu1 }
 0x273   : > { %v1434_v0 = vadd.f32 %v1377_v5, %v6574_v24 }
 0x274   : > { %v2765_v21 = vpop.f32.mrf.mxu0 }
 0x275   : > { %3003 = vmatmul.bf16.gmra.mxu1 %v2861_v16  ;;  %3437 = vmatmul.bf16.gmra.mxu2 %v5872_v40  ;;  %v2863_v40 = vsel %vm1461_vm1, %v2860_v22, %v2862_v3  ;;  %v3829_v16 = vsel %vm994_vm0, %v3824_v1, %v3828_v27  ;;  %v3830_v22 = vshrl.u32 %v5905_v50, 16  ;;  %v5874_v1 = vld [vmem:[%s6457_s18 + $0x50] sm:$0xff] }
 0x276   : > { %4071 = vmatmul.bf16.gmra.mxu3 %v3821_v6 }
 0x277   : > { %4390 = vmatmul.bf16.gmra.mxu0 %v4248_v8  ;;  %v3832_v58 = vor.u32 %v3830_v22, %v3828_v27  ;;  %v6162_v22 = vld [vmem:[%s6457_s18 + $0x54] sm:$0xff] }
 0x278   : > { %v1697_v35 = vpop.f32.mrf.mxu2 }
 0x279   : > { %v1754_v51 = vadd.f32 %v1697_v35, %v1434_v0  ;;  %v2131_v37 = vpop.f32.mrf.mxu3 }
 0x27a   : > { %v1379_v31 = vpop.f32.mrf.mxu1 }
 0x27b   : > { %v2188_v2 = vadd.f32 %v2131_v37, %v1754_v51  ;;  %v1435_v57 = vadd.f32 %v1379_v31, %v6582_v39  ;;  %v3834_v51 = vshll.u32 %v5906_v14, 16  ;;  %v6161_v37 = vld [vmem:[%s6457_s18 + $0x4c] sm:$0xff] }
 0x27c   : > { %v2767_v4 = vpop.f32.mrf.mxu0  ;;  %v2864_v31 = vrot.slane %v6161_v37, 1 }
 0x27d   : > { %v6876_v29 = vadd.f32 %v2765_v21, %v2188_v2  ;;  %v4250_v21 = vsel %vm1461_vm1, %v4247_v61, %v4249_v23  ;;  %v3836_v61 = vrot.slane %v3834_v51, 1  ;;  %v2866_v51 = vrot.slane %v6162_v22, 1  ;;  %v6915_v22 = vld [vmem:[%s7143_s2] ss:$0 sm:$0xff] }
 0x27f   : > { %v3837_v50 = vsel %vm994_vm0, %v3832_v58, %v3836_v61 }
 0x280   : > { %v1699_v24 = vpop.f32.mrf.mxu2 }
 0x281   : > { %v1755_v52 = vadd.f32 %v1699_v24, %v1435_v57  ;;  %v2133_v15 = vpop.f32.mrf.mxu3 }
 0x282   : > { %v1382_v54 = vpop.f32.mrf.mxu1 }
 0x283   : > { %v2189_v5 = vadd.f32 %v2133_v15, %v1755_v52  ;;  %v2865_v52 = vsel %vm1461_vm1, %v2862_v3, %v2864_v31  ;;  %v4252_v54 = vsel %vm1461_vm1, %v4249_v23, %v4251_v34 }
 0x284   : > { %v2770_v62 = vpop.f32.mrf.mxu0 }
 0x285   : > { %3008 = vmatmul.bf16.gmra.mxu1 %v2863_v40  ;;  %3442 = vmatmul.bf16.gmra.mxu2 %v5873_v36  ;;  %v6884_v39 = vadd.f32 %v2767_v4, %v2189_v5  ;;  %v5907_v40 = vld [vmem:[%s6457_s18 + $0x60] sm:$0xff] }
 0x286   : > { %4076 = vmatmul.bf16.gmra.mxu3 %v3829_v16 }
 0x287   : > { %4395 = vmatmul.bf16.gmra.mxu0 %v4250_v21 }
 0x288   : > { %v1702_v6 = vpop.f32.mrf.mxu2 }
 0x289   : > { %v2136_v8 = vpop.f32.mrf.mxu3 }
 0x28a   : > { %v1384_v0 = vpop.f32.mrf.mxu1  ;;  %v3838_v8 = vshrl.u32 %v5906_v14, 16 }
 0x28b   : > { %v1437_v2 = vadd.f32 %v1384_v0, %v6596_v11  ;;  %v3842_v0 = vshll.u32 %v5907_v40, 16 }
 0x28c   : > { %v2772_v35 = vpop.f32.mrf.mxu0 }
 0x28d   : > { %v3844_v37 = vrot.slane %v3842_v0, 1 }
 0x290   : > { %v1704_v49 = vpop.f32.mrf.mxu2 }
 0x291   : > { %v1757_v4 = vadd.f32 %v1704_v49, %v1437_v2  ;;  %v2138_v57 = vpop.f32.mrf.mxu3  ;;  %v4253_v2 = vrot.slane %v5907_v40, 1  ;;  %v5875_v49 = vld [vmem:[%s6457_s18 + $0x58] sm:$0xff] }
 0x292   : > { %v1387_v24 = vpop.f32.mrf.mxu1 }
 0x293   : > { %v2191_v15 = vadd.f32 %v2138_v57, %v1757_v4  ;;  %v1438_v27 = vadd.f32 %v1387_v24, %v6610_v32  ;;  %v2867_v57 = vsel %vm1461_vm1, %v2864_v31, %v2866_v51  ;;  %v4254_v14 = vsel %vm1461_vm1, %v4251_v34, %v4253_v2 }
 0x294   : > { %v2775_v36 = vpop.f32.mrf.mxu0 }
 0x295   : > { %3013 = vmatmul.bf16.gmra.mxu1 %v2865_v52  ;;  %3447 = vmatmul.bf16.gmra.mxu2 %v5874_v1  ;;  %v6893_v11 = vadd.f32 %v2772_v35, %v2191_v15  ;;  %v3840_v35 = vor.u32 %v3838_v8, %v3836_v61  ;;  %v6906_v52 = vld [vmem:[%s6457_s18 + $0x68] sm:$0xff] }
 0x296   : > { %4081 = vmatmul.bf16.gmra.mxu3 %v3837_v50 }
 0x297   : > { %4400 = vmatmul.bf16.gmra.mxu0 %v4252_v54  ;;  %v3845_v24 = vsel %vm994_vm0, %v3840_v35, %v3844_v37 }
 0x298   : > { %v1707_v5 = vpop.f32.mrf.mxu2 }
 0x299   : > { %v1758_v62 = vadd.f32 %v1707_v5, %v1438_v27  ;;  %v2141_v3 = vpop.f32.mrf.mxu3  ;;  %v3846_v27 = vshrl.u32 %v5907_v40, 16  ;;  %v3850_v5 = vshll.u32 %v6906_v52, 16 }
 0x29a   : > { %v1389_v16 = vpop.f32.mrf.mxu1 }
 0x29b   : > { %v2192_v21 = vadd.f32 %v2141_v3, %v1758_v62  ;;  %v6163_v3 = vld [vmem:[%s6457_s18 + $0x5c] sm:$0xff] }
 0x29c   : > { %v2777_v6 = vpop.f32.mrf.mxu0  ;;  %v2868_v34 = vrot.slane %v6163_v3, 1 }
 0x29d   : > { %v6897_v23 = vadd.f32 %v2775_v36, %v2192_v21  ;;  %v3848_v21 = vor.u32 %v3846_v27, %v3844_v37  ;;  %v3852_v6 = vrot.slane %v3850_v5, 1 }
 0x2a0   : > { %v1709_v58 = vpop.f32.mrf.mxu2 }
 0x2a1   : > { %v2143_v32 = vpop.f32.mrf.mxu3  ;;  %v5876_v58 = vld [vmem:[%s6457_s18 + $0x60] sm:$0xff] }
 0x2a2   : > { %v2979_v4 = vpop.f32.mrf.mxu1 }
 0x2a3   : > { %v3099_v61 = vadd.f32 %v2979_v4, %v6619_v44  ;;  %v4255_v44 = vrot.slane %v6906_v52, 1  ;;  %v3853_v4 = vsel %vm994_vm0, %v3848_v21, %v3852_v6 }
 0x2a4   : > { %v4366_v1 = vpop.f32.mrf.mxu0 }
 0x2a5   : > { %3018 = vmatmul.bf16.gmra.mxu1 %v2867_v57  ;;  %3452 = vmatmul.bf16.gmra.mxu2 %v5875_v49  ;;  %v2869_v49 = vsel %vm1461_vm1, %v2866_v51, %v2868_v34  ;;  %v4256_v57 = vsel %vm1461_vm1, %v4253_v2, %v4255_v44 }
 0x2a6   : > { %4086 = vmatmul.bf16.gmra.mxu3 %v3845_v24 }
 0x2a7   : > { %4405 = vmatmul.bf16.gmra.mxu0 %v4254_v14 }
 0x2a8   : > { %v3413_v15 = vpop.f32.mrf.mxu2 }
 0x2a9   : > { %v3533_v36 = vadd.f32 %v3413_v15, %v3099_v61  ;;  %v4047_v50 = vpop.f32.mrf.mxu3  ;;  %v6925_v61 = vld [vmem:[%s6457_s18 + $0x70] sm:$0xff] }
 0x2aa   : > { %v2981_v54 = vpop.f32.mrf.mxu1  ;;  %v3858_v5 = vshll.u32 %v6925_v61, 16 }
 0x2ab   : > { %v4167_v62 = vadd.f32 %v4047_v50, %v3533_v36  ;;  %v3100_v16 = vadd.f32 %v2981_v54, %v6626_v10 }
 0x2ac   : > { %v4368_v31 = vpop.f32.mrf.mxu0 }
 0x2ad   : > { %v4486_v0 = vadd.f32 %v4366_v1, %v4167_v62  ;;  %v6164_v62 = vld [vmem:[%s6457_s18 + $0x64] sm:$0xff] }
 0x2ae   : > { %v2870_v3 = vrot.slane %v6164_v62, 1 }
 0x2af   : > { %v4589_v1 = vadd.f32 %v6915_v22, %v4486_v0  ;;  %v4257_v0 = vrot.slane %v6925_v61, 1 }
 0x2b0   : > { %v3415_v8 = vpop.f32.mrf.mxu2 }
 0x2b1   : > { %v3534_v40 = vadd.f32 %v3415_v8, %v3100_v16  ;;  %v4049_v35 = vpop.f32.mrf.mxu3  ;;  %v4621_v15 = vmax.f32 %v4589_v1, 0.0  ;;  %v3860_v8 = vrot.slane %v3858_v5, 1 }
 0x2b2   : > { %v2984_v32 = vpop.f32.mrf.mxu1 }
 0x2b3   : > { %v4168_v10 = vadd.f32 %v4049_v35, %v3534_v40  ;;  %v5877_v32 = vld [vmem:[%s6457_s18 + $0x68] sm:$0xff] }
 0x2b4   : > { %v4371_v37 = vpop.f32.mrf.mxu0 }
 0x2b5   : > { %v4487_v24 = vadd.f32 %v4368_v31, %v4168_v10  ;;  %3023 = vmatmul.bf16.gmra.mxu1 %v2869_v49  ;;  %3457 = vmatmul.bf16.gmra.mxu2 %v5876_v58  ;;  %v3854_v31 = vshrl.u32 %v6906_v52, 16  ;;  %v2871_v49 = vsel %vm1461_vm1, %v2868_v34, %v2870_v3 }
 0x2b6   : > { %4091 = vmatmul.bf16.gmra.mxu3 %v3853_v4  ;;  %v4258_v4 = vsel %vm1461_vm1, %v4255_v44, %v4257_v0 }
 0x2b7   : > { %4410 = vmatmul.bf16.gmra.mxu0 %v4256_v57  ;;  %v4590_v14 = vadd.f32 %v6915_v22, %v4487_v24  ;;  %v3856_v21 = vor.u32 %v3854_v31, %v3852_v6  ;;  %v5910_v6 = vld [vmem:[%s6457_s18 + $0x78] sm:$0xff]  ;;  %v6165_v31 = vld [vmem:[%s6457_s18 + $0x6c] sm:$0xff] }
 0x2b8   : > { %v3418_v51 = vpop.f32.mrf.mxu2  ;;  %v3866_v44 = vshll.u32 %v5910_v6, 16  ;;  %v2872_v5 = vrot.slane %v6165_v31, 1 }
 0x2b9   : > { %v4622_v36 = vmax.f32 %v4590_v14, 0.0  ;;  %v4052_v50 = vpop.f32.mrf.mxu3  ;;  %v3861_v37 = vsel %vm994_vm0, %v3856_v21, %v3860_v8 }
 0x2ba   : > { %v2986_v54 = vpop.f32.mrf.mxu1  ;;  %v3862_v50 = vshrl.u32 %v6925_v61, 16  ;;  %v2873_v61 = vsel %vm1461_vm1, %v2870_v3, %v2872_v5 }
 0x2bb   : > { %v5950_v2 = vpack.c.bf16 %v4622_v36, %v4621_v15  ;;  %v3102_v16 = vadd.f32 %v2986_v54, %v6639_v33 }
 0x2bc   : > { %v4373_v27 = vpop.f32.mrf.mxu0  ;;  %v3864_v62 = vor.u32 %v3862_v50, %v3860_v8 }
 0x2bd   : > { %5951 = vst [vmem:[%s6929_s30] sm:$0xff] %v5950_v2  }
 0x2c0   : > { %v3420_v40 = vpop.f32.mrf.mxu2 }
 0x2c1   : > { %v3536_v35 = vadd.f32 %v3420_v40, %v3102_v16  ;;  %v4054_v58 = vpop.f32.mrf.mxu3  ;;  %v3868_v16 = vrot.slane %v3866_v44, 1 }
 0x2c2   : > { %v2989_v52 = vpop.f32.mrf.mxu1 }
 0x2c3   : > { %v4170_v57 = vadd.f32 %v4054_v58, %v3536_v35  ;;  %v3103_v33 = vadd.f32 %v2989_v52, %v6648_v47 }
 0x2c4   : > { %v4376_v10 = vpop.f32.mrf.mxu0 }
 0x2c5   : > { %3028 = vmatmul.bf16.gmra.mxu1 %v2871_v49  ;;  %3462 = vmatmul.bf16.gmra.mxu2 %v5877_v32  ;;  %v4489_v24 = vadd.f32 %v4373_v27, %v4170_v57  ;;  %v4259_v27 = vrot.slane %v5910_v6, 1  ;;  %v5878_v32 = vld [vmem:[%s6457_s18 + $0x70] sm:$0xff]  ;;  %v5911_v57 = vld [vmem:[%s6457_s18 + $0x80] sm:$0xff] }
 0x2c6   : > { %4096 = vmatmul.bf16.gmra.mxu3 %v3861_v37 }
 0x2c7   : > { %4415 = vmatmul.bf16.gmra.mxu0 %v4258_v4  ;;  %v4591_v54 = vadd.f32 %v6915_v22, %v4489_v24  ;;  %v4260_v4 = vsel %vm1461_vm1, %v4257_v0, %v4259_v27 }
 0x2c8   : > { %v3423_v1 = vpop.f32.mrf.mxu2 }
 0x2c9   : > { %v3537_v14 = vadd.f32 %v3423_v1, %v3103_v33  ;;  %v4057_v51 = vpop.f32.mrf.mxu3  ;;  %v4623_v40 = vmax.f32 %v4591_v54, 0.0 }
 0x2ca   : > { %v2991_v15 = vpop.f32.mrf.mxu1 }
 0x2cb   : > { %v4171_v34 = vadd.f32 %v4057_v51, %v3537_v14  ;;  %v3870_v51 = vshrl.u32 %v5910_v6, 16  ;;  %v3874_v15 = vshll.u32 %v5911_v57, 16 }
 0x2cc   : > { %v4378_v36 = vpop.f32.mrf.mxu0 }
 0x2cd   : > { %v4490_v2 = vadd.f32 %v4376_v10, %v4171_v34  ;;  %v3869_v10 = vsel %vm994_vm0, %v3864_v62, %v3868_v16  ;;  %v6166_v36 = vld [vmem:[%s6457_s18 + $0x74] sm:$0xff]  ;;  %v3872_v44 = vor.u32 %v3870_v51, %v3868_v16  ;;  %v3876_v54 = vrot.slane %v3874_v15, 1 }
 0x2ce   : > { %v2874_v0 = vrot.slane %v6166_v36, 1 }
 0x2cf   : > { %v4592_v47 = vadd.f32 %v6915_v22, %v4490_v2  ;;  %v4261_v2 = vrot.slane %v5911_v57, 1 }
 0x2d0   : > { %v3425_v21 = vpop.f32.mrf.mxu2 }
 0x2d1   : > { %v4624_v35 = vmax.f32 %v4592_v47, 0.0  ;;  %v4059_v58 = vpop.f32.mrf.mxu3  ;;  %v5879_v21 = vld [vmem:[%s6457_s18 + $0x78] sm:$0xff] }
 0x2d2   : > { %v2994_v52 = vpop.f32.mrf.mxu1 }
 0x2d3   : > { %v5955_v49 = vpack.c.bf16 %v4624_v35, %v4623_v40  ;;  %v3105_v8 = vadd.f32 %v2994_v52, %v6659_v45  ;;  %v2875_v35 = vsel %vm1461_vm1, %v2872_v5, %v2874_v0  ;;  %v4262_v52 = vsel %vm1461_vm1, %v4259_v27, %v4261_v2 }
 0x2d4   : > { %v4381_v37 = vpop.f32.mrf.mxu0 }
 0x2d5   : > { %6034 = vst [vmem:[%s6929_s30 + $0x8] sm:$0xff] %v5955_v49   ;;  %3033 = vmatmul.bf16.gmra.mxu1 %v2873_v61  ;;  %3467 = vmatmul.bf16.gmra.mxu2 %v5878_v32  ;;  %v3877_v32 = vsel %vm994_vm0, %v3872_v44, %v3876_v54  ;;  %v5912_v49 = vld [vmem:[%s6457_s18 + $0x88] sm:$0xff] }
 0x2d6   : > { %4101 = vmatmul.bf16.gmra.mxu3 %v3869_v10  ;;  %v4263_v36 = vrot.slane %v5912_v49, 1 }
 0x2d7   : > { %4420 = vmatmul.bf16.gmra.mxu0 %v4260_v4 }
 0x2d8   : > { %v3428_v33 = vpop.f32.mrf.mxu2 }
 0x2d9   : > { %v3539_v1 = vadd.f32 %v3428_v33, %v3105_v8  ;;  %v4062_v24 = vpop.f32.mrf.mxu3 }
 0x2da   : > { %v2996_v3 = vpop.f32.mrf.mxu1 }
 0x2db   : > { %v4173_v34 = vadd.f32 %v4062_v24, %v3539_v1  ;;  %v3106_v50 = vadd.f32 %v2996_v3, %v6666_v28  ;;  %v3878_v1 = vshrl.u32 %v5911_v57, 16  ;;  %v3882_v24 = vshll.u32 %v5912_v49, 16  ;;  %v6167_v3 = vld [vmem:[%s6457_s18 + $0x7c] sm:$0xff] }
 0x2dc   : > { %v4383_v14 = vpop.f32.mrf.mxu0 }
 0x2dd   : > { %v4492_v47 = vadd.f32 %v4381_v37, %v4173_v34  ;;  %v3880_v15 = vor.u32 %v3878_v1, %v3876_v54  ;;  %v3884_v34 = vrot.slane %v3882_v24, 1  ;;  %v5913_v54 = vld [vmem:[%s6457_s18 + $0x90] sm:$0xff] }
 0x2de   : > { %v4265_v1 = vrot.slane %v5913_v54, 1 }
 0x2df   : > { %v4593_v28 = vadd.f32 %v6915_v22, %v4492_v47  ;;  %v5880_v47 = vld [vmem:[%s6457_s18 + $0x80] sm:$0xff]  ;;  %v3885_v57 = vsel %vm994_vm0, %v3880_v15, %v3884_v34  ;;  %v5881_v15 = vld [vmem:[%s6457_s18 + $0x88] sm:$0xff] }
 0x2e0   : > { %v3430_v31 = vpop.f32.mrf.mxu2 }
 0x2e1   : > { %v3540_v45 = vadd.f32 %v3430_v31, %v3106_v50  ;;  %v4064_v62 = vpop.f32.mrf.mxu3  ;;  %v4625_v5 = vmax.f32 %v4593_v28, 0.0 }
 0x2e2   : > { %v2999_v40 = vpop.f32.mrf.mxu1 }
 0x2e3   : > { %v4174_v58 = vadd.f32 %v4064_v62, %v3540_v45  ;;  %v4264_v40 = vsel %vm1461_vm1, %v4261_v2, %v4263_v36 }
 0x2e4   : > { %v4386_v6 = vpop.f32.mrf.mxu0 }
 0x2e5   : > { %v4493_v16 = vadd.f32 %v4383_v14, %v4174_v58  ;;  %3038 = vmatmul.bf16.gmra.mxu1 %v2875_v35  ;;  %3472 = vmatmul.bf16.gmra.mxu2 %v5879_v21  ;;  %v2876_v14 = vrot.slane %v6167_v3, 1 }
 0x2e6   : > { %4106 = vmatmul.bf16.gmra.mxu3 %v3877_v32 }
 0x2e7   : > { %4425 = vmatmul.bf16.gmra.mxu0 %v4262_v52  ;;  %v4594_v61 = vadd.f32 %v6915_v22, %v4493_v16  ;;  %v2877_v62 = vsel %vm1461_vm1, %v2874_v0, %v2876_v14 }
 0x2e8   : > { %v3433_v37 = vpop.f32.mrf.mxu2 }
 0x2e9   : > { %v4626_v10 = vmax.f32 %v4594_v61, 0.0  ;;  %v4067_v4 = vpop.f32.mrf.mxu3  ;;  %v3886_v61 = vshrl.u32 %v5912_v49, 16  ;;  %v3890_v37 = vshll.u32 %v5913_v54, 16 }
 0x2ea   : > { %v3001_v8 = vpop.f32.mrf.mxu1 }
 0x2eb   : > { %v5960_v33 = vpack.c.bf16 %v4626_v10, %v4625_v5  ;;  %v3108_v51 = vadd.f32 %v3001_v8, %v6679_v59  ;;  %v6168_v10 = vld [vmem:[%s6457_s18 + $0x84] sm:$0xff] }
 0x2ec   : > { %v4388_v27 = vpop.f32.mrf.mxu0  ;;  %v2878_v4 = vrot.slane %v6168_v10, 1 }
 0x2ed   : > { %6035 = vst [vmem:[%s6929_s30 + $0x10] sm:$0xff] %v5960_v33   ;;  %v3892_v33 = vrot.slane %v3890_v37, 1 }
 0x2ee   : > { %v2879_v49 = vsel %vm1461_vm1, %v2876_v14, %v2878_v4 }
 0x2f0   : > { %v3435_v50 = vpop.f32.mrf.mxu2 }
 0x2f1   : > { %v3542_v44 = vadd.f32 %v3435_v50, %v3108_v51  ;;  %v4069_v31 = vpop.f32.mrf.mxu3 }
 0x2f2   : > { %v3004_v45 = vpop.f32.mrf.mxu1 }
 0x2f3   : > { %v4176_v35 = vadd.f32 %v4069_v31, %v3542_v44  ;;  %v3109_v59 = vadd.f32 %v3004_v45, %v6688_v20  ;;  %v3888_v20 = vor.u32 %v3886_v61, %v3884_v34  ;;  %v4266_v45 = vsel %vm1461_vm1, %v4263_v36, %v4265_v1 }
 0x2f4   : > { %v4391_v21 = vpop.f32.mrf.mxu0 }
 0x2f5   : > { %3043 = vmatmul.bf16.gmra.mxu1 %v2877_v62  ;;  %3477 = vmatmul.bf16.gmra.mxu2 %v5880_v47  ;;  %v4495_v6 = vadd.f32 %v4388_v27, %v4176_v35  ;;  %v3893_v47 = vsel %vm994_vm0, %v3888_v20, %v3892_v33  ;;  %v5914_v62 = vld [vmem:[%s6457_s18 + $0x98] sm:$0xff] }
 0x2f6   : > { %4111 = vmatmul.bf16.gmra.mxu3 %v3885_v57 }
 0x2f7   : > { %4430 = vmatmul.bf16.gmra.mxu0 %v4264_v40  ;;  %v4595_v2 = vadd.f32 %v6915_v22, %v4495_v6 }
 0x2f8   : > { %v3438_v58 = vpop.f32.mrf.mxu2 }
 0x2f9   : > { %v3543_v32 = vadd.f32 %v3438_v58, %v3109_v59  ;;  %v4072_v52 = vpop.f32.mrf.mxu3  ;;  %v4627_v24 = vmax.f32 %v4595_v2, 0.0  ;;  %v3894_v59 = vshrl.u32 %v5913_v54, 16  ;;  %v3898_v58 = vshll.u32 %v5914_v62, 16 }
 0x2fa   : > { %v3006_v28 = vpop.f32.mrf.mxu1 }
 0x2fb   : > { %v4177_v0 = vadd.f32 %v4072_v52, %v3543_v32  ;;  %v6169_v32 = vld [vmem:[%s6457_s18 + $0x8c] sm:$0xff]  ;;  %v3896_v28 = vor.u32 %v3894_v59, %v3892_v33 }
 0x2fc   : > { %v4393_v16 = vpop.f32.mrf.mxu0  ;;  %v2880_v36 = vrot.slane %v6169_v32, 1  ;;  %v5883_v32 = vld [vmem:[%s6457_s18 + $0x98] sm:$0xff] }
 0x2fd   : > { %v4496_v5 = vadd.f32 %v4391_v21, %v4177_v0  ;;  %v3900_v0 = vrot.slane %v3898_v58, 1  ;;  %v4267_v16 = vrot.slane %v5914_v62, 1 }
 0x2ff   : > { %v4596_v8 = vadd.f32 %v6915_v22, %v4496_v5  ;;  %v5882_v5 = vld [vmem:[%s6457_s18 + $0x90] sm:$0xff] }
 0x300   : > { %v3440_v27 = vpop.f32.mrf.mxu2 }
 0x301   : > { %v4628_v3 = vmax.f32 %v4596_v8, 0.0  ;;  %v4074_v51 = vpop.f32.mrf.mxu3  ;;  %v2881_v8 = vsel %vm1461_vm1, %v2878_v4, %v2880_v36  ;;  %v3901_v27 = vsel %vm994_vm0, %v3896_v28, %v3900_v0 }
 0x302   : > { %v3009_v50 = vpop.f32.mrf.mxu1  ;;  %v5915_v51 = vld [vmem:[%s6457_s18 + $0xa0] sm:$0xff] }
 0x303   : > { %v5965_v44 = vpack.c.bf16 %v4628_v3, %v4627_v24  ;;  %v3111_v34 = vadd.f32 %v3009_v50, %v6699_v55  ;;  %v4268_v24 = vsel %vm1461_vm1, %v4265_v1, %v4267_v16 }
 0x304   : > { %v4396_v31 = vpop.f32.mrf.mxu0 }
 0x305   : > { %6036 = vst [vmem:[%s6929_s30 + $0x18] sm:$0xff] %v5965_v44   ;;  %3048 = vmatmul.bf16.gmra.mxu1 %v2879_v49  ;;  %3482 = vmatmul.bf16.gmra.mxu2 %v5881_v15 }
 0x306   : > { %4116 = vmatmul.bf16.gmra.mxu3 %v3893_v47  ;;  %v3902_v47 = vshrl.u32 %v5914_v62, 16 }
 0x307   : > { %4435 = vmatmul.bf16.gmra.mxu0 %v4266_v45  ;;  %v3906_v45 = vshll.u32 %v5915_v51, 16 }
 0x308   : > { %v3443_v21 = vpop.f32.mrf.mxu2 }
 0x309   : > { %v3545_v57 = vadd.f32 %v3443_v21, %v3111_v34  ;;  %v4077_v40 = vpop.f32.mrf.mxu3  ;;  %v6170_v34 = vld [vmem:[%s6457_s18 + $0x94] sm:$0xff] }
 0x30a   : > { %v3011_v14 = vpop.f32.mrf.mxu1  ;;  %v2882_v21 = vrot.slane %v6170_v34, 1 }
 0x30b   : > { %v4179_v6 = vadd.f32 %v4077_v40, %v3545_v57  ;;  %v3112_v52 = vadd.f32 %v3011_v14, %v6706_v7  ;;  %v3904_v40 = vor.u32 %v3902_v47, %v3900_v0  ;;  %v3908_v14 = vrot.slane %v3906_v45, 1  ;;  %v5916_v0 = vld [vmem:[%s6457_s18 + $0xa8] sm:$0xff]  ;;  %v5884_v47 = vld [vmem:[%s6457_s18 + $0xa0] sm:$0xff] }
 0x30c   : > { %v4398_v35 = vpop.f32.mrf.mxu0  ;;  %v2883_v28 = vsel %vm1461_vm1, %v2880_v36, %v2882_v21 }
 0x30d   : > { %v4498_v37 = vadd.f32 %v4396_v31, %v4179_v6  ;;  %v3909_v62 = vsel %vm994_vm0, %v3904_v40, %v3908_v14 }
 0x30f   : > { %v4597_v7 = vadd.f32 %v6915_v22, %v4498_v37 }
 0x310   : > { %v3445_v61 = vpop.f32.mrf.mxu2 }
 0x311   : > { %v3546_v55 = vadd.f32 %v3445_v61, %v3112_v52  ;;  %v4079_v2 = vpop.f32.mrf.mxu3  ;;  %v4629_v4 = vmax.f32 %v4597_v7, 0.0 }
 0x312   : > { %v3014_v10 = vpop.f32.mrf.mxu1 }
 0x313   : > { %v4180_v20 = vadd.f32 %v4079_v2, %v3546_v55 }
 0x314   : > { %v4401_v54 = vpop.f32.mrf.mxu0 }
 0x315   : > { %v4499_v33 = vadd.f32 %v4398_v35, %v4180_v20  ;;  %3053 = vmatmul.bf16.gmra.mxu1 %v2881_v8  ;;  %3487 = vmatmul.bf16.gmra.mxu2 %v5882_v5  ;;  %v4269_v35 = vrot.slane %v5915_v51, 1 }
 0x316   : > { %4121 = vmatmul.bf16.gmra.mxu3 %v3901_v27  ;;  %v3910_v27 = vshrl.u32 %v5915_v51, 16 }
 0x317   : > { %4440 = vmatmul.bf16.gmra.mxu0 %v4268_v24  ;;  %v4598_v3 = vadd.f32 %v6915_v22, %v4499_v33  ;;  %v4270_v37 = vsel %vm1461_vm1, %v4267_v16, %v4269_v35  ;;  %v3914_v24 = vshll.u32 %v5916_v0, 16  ;;  %v6171_v33 = vld [vmem:[%s6457_s18 + $0x9c] sm:$0xff] }
 0x318   : > { %v3448_v15 = vpop.f32.mrf.mxu2 }
 0x319   : > { %v4630_v50 = vmax.f32 %v4598_v3, 0.0  ;;  %v4082_v49 = vpop.f32.mrf.mxu3  ;;  %v2884_v3 = vrot.slane %v6171_v33, 1 }
 0x31a   : > { %v3016_v44 = vpop.f32.mrf.mxu1 }
 0x31b   : > { %v5970_v31 = vpack.c.bf16 %v4630_v50, %v4629_v4  ;;  %v3114_v57 = vadd.f32 %v3016_v44, %v6719_v30  ;;  %v3916_v4 = vrot.slane %v3914_v24, 1  ;;  %v4271_v50 = vrot.slane %v5916_v0, 1 }
 0x31c   : > { %v4403_v1 = vpop.f32.mrf.mxu0  ;;  %v2885_v51 = vsel %vm1461_vm1, %v2882_v21, %v2884_v3 }
 0x31d   : > { %6037 = vst [vmem:[%s6929_s30 + $0x20] sm:$0xff] %v5970_v31  }
 0x320   : > { %v3450_v59 = vpop.f32.mrf.mxu2 }
 0x321   : > { %v3548_v58 = vadd.f32 %v3450_v59, %v3114_v57  ;;  %v4084_v6 = vpop.f32.mrf.mxu3  ;;  %v4272_v59 = vsel %vm1461_vm1, %v4269_v35, %v4271_v50 }
 0x322   : > { %v3019_v52 = vpop.f32.mrf.mxu1 }
 0x323   : > { %v4182_v55 = vadd.f32 %v4084_v6, %v3548_v58  ;;  %v3115_v30 = vadd.f32 %v3019_v52, %v6728_v43  ;;  %v3912_v43 = vor.u32 %v3910_v27, %v3908_v14  ;;  %v5917_v58 = vld [vmem:[%s6457_s18 + $0xb0] sm:$0xff] }
 0x324   : > { %v4406_v61 = vpop.f32.mrf.mxu0 }
 0x325   : > { %3058 = vmatmul.bf16.gmra.mxu1 %v2883_v28  ;;  %3492 = vmatmul.bf16.gmra.mxu2 %v5883_v32  ;;  %v4501_v5 = vadd.f32 %v4403_v1, %v4182_v55  ;;  %v3917_v40 = vsel %vm994_vm0, %v3912_v43, %v3916_v4  ;;  %v6172_v55 = vld [vmem:[%s6457_s18 + $0xa4] sm:$0xff] }
 0x326   : > { %4126 = vmatmul.bf16.gmra.mxu3 %v3909_v62  ;;  %v3922_v62 = vshll.u32 %v5917_v58, 16  ;;  %v2886_v35 = vrot.slane %v6172_v55, 1 }
 0x327   : > { %4445 = vmatmul.bf16.gmra.mxu0 %v4270_v37  ;;  %v4599_v16 = vadd.f32 %v6915_v22, %v4501_v5 }
 0x328   : > { %v3453_v2 = vpop.f32.mrf.mxu2  ;;  %v3924_v5 = vrot.slane %v3922_v62, 1  ;;  %v2887_v24 = vsel %vm1461_vm1, %v2884_v3, %v2886_v35 }
 0x329   : > { %v3549_v10 = vadd.f32 %v3453_v2, %v3115_v30  ;;  %v4087_v8 = vpop.f32.mrf.mxu3  ;;  %v4631_v44 = vmax.f32 %v4599_v16, 0.0 }
 0x32a   : > { %v3021_v20 = vpop.f32.mrf.mxu1 }
 0x32b   : > { %v4183_v36 = vadd.f32 %v4087_v8, %v3549_v10  ;;  %v4273_v10 = vrot.slane %v5917_v58, 1 }
 0x32c   : > { %v4408_v54 = vpop.f32.mrf.mxu0 }
 0x32d   : > { %v4502_v7 = vadd.f32 %v4406_v61, %v4183_v36  ;;  %v3918_v61 = vshrl.u32 %v5916_v0, 16  ;;  %v5885_v54 = vld [vmem:[%s6457_s18 + $0xa8] sm:$0xff]  ;;  %v4274_v33 = vsel %vm1461_vm1, %v4271_v50, %v4273_v10 }
 0x32f   : > { %v4600_v15 = vadd.f32 %v6915_v22, %v4502_v7  ;;  %v3920_v2 = vor.u32 %v3918_v61, %v3916_v4  ;;  %v5918_v4 = vld [vmem:[%s6457_s18 + $0xb8] sm:$0xff] }
 0x330   : > { %v3455_v49 = vpop.f32.mrf.mxu2 }
 0x331   : > { %v4632_v31 = vmax.f32 %v4600_v15, 0.0  ;;  %v4089_v1 = vpop.f32.mrf.mxu3  ;;  %v3925_v7 = vsel %vm994_vm0, %v3920_v2, %v3924_v5  ;;  %v5919_v2 = vld [vmem:[%s6457_s18 + $0xc0] sm:$0xff] }
 0x332   : > { %v3024_v45 = vpop.f32.mrf.mxu1 }
 0x333   : > { %v5975_v34 = vpack.c.bf16 %v4632_v31, %v4631_v44  ;;  %v3117_v14 = vadd.f32 %v3024_v45, %v6739_v17  ;;  %v3926_v45 = vshrl.u32 %v5917_v58, 16 }
 0x334   : > { %v4411_v57 = vpop.f32.mrf.mxu0 }
 0x335   : > { %6038 = vst [vmem:[%s6929_s30 + $0x28] sm:$0xff] %v5975_v34   ;;  %3063 = vmatmul.bf16.gmra.mxu1 %v2885_v51  ;;  %3497 = vmatmul.bf16.gmra.mxu2 %v5884_v47  ;;  %v3930_v51 = vshll.u32 %v5918_v4, 16  ;;  %v6173_v34 = vld [vmem:[%s6457_s18 + $0xac] sm:$0xff] }
 0x336   : > { %4131 = vmatmul.bf16.gmra.mxu3 %v3917_v40 }
 0x337   : > { %4450 = vmatmul.bf16.gmra.mxu0 %v4272_v59  ;;  %v3928_v59 = vor.u32 %v3926_v45, %v3924_v5 }
 0x338   : > { %v3458_v6 = vpop.f32.mrf.mxu2 }
 0x339   : > { %v3551_v32 = vadd.f32 %v3458_v6, %v3117_v14  ;;  %v4092_v52 = vpop.f32.mrf.mxu3  ;;  %v3932_v14 = vrot.slane %v3930_v51, 1  ;;  %v4275_v6 = vrot.slane %v5918_v4, 1 }
 0x33a   : > { %v3026_v21 = vpop.f32.mrf.mxu1 }
 0x33b   : > { %v4185_v37 = vadd.f32 %v4092_v52, %v3551_v32  ;;  %v3118_v30 = vadd.f32 %v3026_v21, %v6746_v25  ;;  %v3933_v58 = vsel %vm994_vm0, %v3928_v59, %v3932_v14  ;;  %v4276_v55 = vsel %vm1461_vm1, %v4273_v10, %v4275_v6 }
 0x33c   : > { %v4413_v28 = vpop.f32.mrf.mxu0 }
 0x33d   : > { %v4504_v20 = vadd.f32 %v4411_v57, %v4185_v37  ;;  %v2888_v57 = vrot.slane %v6173_v34, 1 }
 0x33f   : > { %v4601_v25 = vadd.f32 %v6915_v22, %v4504_v20  ;;  %v2889_v62 = vsel %vm1461_vm1, %v2886_v35, %v2888_v57 }
 0x340   : > { %v3460_v8 = vpop.f32.mrf.mxu2 }
 0x341   : > { %v3552_v17 = vadd.f32 %v3460_v8, %v3118_v30  ;;  %v4094_v36 = vpop.f32.mrf.mxu3  ;;  %v4633_v3 = vmax.f32 %v4601_v25, 0.0 }
 0x342   : > { %v3029_v27 = vpop.f32.mrf.mxu1 }
 0x343   : > { %v4186_v16 = vadd.f32 %v4094_v36, %v3552_v17  ;;  %v3934_v27 = vshrl.u32 %v5918_v4, 16 }
 0x344   : > { %v4416_v0 = vpop.f32.mrf.mxu0 }
 0x345   : > { %v4505_v15 = vadd.f32 %v4413_v28, %v4186_v16  ;;  %3068 = vmatmul.bf16.gmra.mxu1 %v2887_v24  ;;  %3502 = vmatmul.bf16.gmra.mxu2 %v5885_v54  ;;  %v5886_v28 = vld [vmem:[%s6457_s18 + $0xb0] sm:$0xff]  ;;  %v3938_v24 = vshll.u32 %v5919_v2, 16 }
 0x346   : > { %4136 = vmatmul.bf16.gmra.mxu3 %v3925_v7  ;;  %v6174_v0 = vld [vmem:[%s6457_s18 + $0xb4] sm:$0xff] }
 0x347   : > { %4455 = vmatmul.bf16.gmra.mxu0 %v4274_v33  ;;  %v4602_v43 = vadd.f32 %v6915_v22, %v4505_v15  ;;  %v2890_v7 = vrot.slane %v6174_v0, 1  ;;  %v3940_v25 = vrot.slane %v3938_v24, 1  ;;  %v4277_v15 = vrot.slane %v5919_v2, 1 }
 0x348   : > { %v3463_v49 = vpop.f32.mrf.mxu2 }
 0x349   : > { %v4634_v44 = vmax.f32 %v4602_v43, 0.0  ;;  %v4097_v31 = vpop.f32.mrf.mxu3  ;;  %v2891_v4 = vsel %vm1461_vm1, %v2888_v57, %v2890_v7  ;;  %v4278_v51 = vsel %vm1461_vm1, %v4275_v6, %v4277_v15 }
 0x34a   : > { %v3031_v1 = vpop.f32.mrf.mxu1  ;;  %v5887_v31 = vld [vmem:[%s6457_s18 + $0xb8] sm:$0xff] }
 0x34b   : > { %v5980_v47 = vpack.c.bf16 %v4634_v44, %v4633_v3  ;;  %v3120_v40 = vadd.f32 %v3031_v1, %v6759_v56 }
 0x34c   : > { %v4418_v50 = vpop.f32.mrf.mxu0 }
 0x34d   : > { %6039 = vst [vmem:[%s6929_s30 + $0x30] sm:$0xff] %v5980_v47  }
 0x350   : > { %v3465_v32 = vpop.f32.mrf.mxu2 }
 0x351   : > { %v3554_v52 = vadd.f32 %v3465_v32, %v3120_v40  ;;  %v4099_v21 = vpop.f32.mrf.mxu3  ;;  %v5920_v40 = vld [vmem:[%s6457_s18 + $0xc8] sm:$0xff] }
 0x352   : > { %v3034_v61 = vpop.f32.mrf.mxu1 }
 0x353   : > { %v4188_v30 = vadd.f32 %v4099_v21, %v3554_v52  ;;  %v3121_v56 = vadd.f32 %v3034_v61, %v6768_v12  ;;  %v3936_v12 = vor.u32 %v3934_v27, %v3932_v14  ;;  %v3942_v21 = vshrl.u32 %v5919_v2, 16 }
 0x354   : > { %v4421_v37 = vpop.f32.mrf.mxu0 }
 0x355   : > { %3073 = vmatmul.bf16.gmra.mxu1 %v2889_v62  ;;  %3507 = vmatmul.bf16.gmra.mxu2 %v5886_v28  ;;  %v4507_v8 = vadd.f32 %v4418_v50, %v4188_v30  ;;  %v3941_v45 = vsel %vm994_vm0, %v3936_v12, %v3940_v25  ;;  %v3946_v28 = vshll.u32 %v5920_v40, 16  ;;  %v6175_v62 = vld [vmem:[%s6457_s18 + $0xbc] sm:$0xff]  ;;  %v4279_v30 = vrot.slane %v5920_v40, 1 }
 0x356   : > { %4141 = vmatmul.bf16.gmra.mxu3 %v3933_v58  ;;  %v2892_v6 = vrot.slane %v6175_v62, 1  ;;  %v3944_v58 = vor.u32 %v3942_v21, %v3940_v25 }
 0x357   : > { %4460 = vmatmul.bf16.gmra.mxu0 %v4276_v55  ;;  %v4603_v10 = vadd.f32 %v6915_v22, %v4507_v8  ;;  %v3948_v55 = vrot.slane %v3946_v28, 1  ;;  %v4280_v27 = vsel %vm1461_vm1, %v4277_v15, %v4279_v30 }
 0x358   : > { %v3468_v5 = vpop.f32.mrf.mxu2 }
 0x359   : > { %v3555_v20 = vadd.f32 %v3468_v5, %v3121_v56  ;;  %v4102_v17 = vpop.f32.mrf.mxu3  ;;  %v4635_v49 = vmax.f32 %v4603_v10, 0.0 }
 0x35a   : > { %v3036_v36 = vpop.f32.mrf.mxu1 }
 0x35b   : > { %v4189_v35 = vadd.f32 %v4102_v17, %v3555_v20  ;;  %v5888_v20 = vld [vmem:[%s6457_s18 + $0xc0] sm:$0xff]  ;;  %v2893_v36 = vsel %vm1461_vm1, %v2890_v7, %v2892_v6 }
 0x35c   : > { %v4423_v54 = vpop.f32.mrf.mxu0 }
 0x35d   : > { %v4508_v16 = vadd.f32 %v4421_v37, %v4189_v35  ;;  %v3949_v54 = vsel %vm994_vm0, %v3944_v58, %v3948_v55 }
 0x35f   : > { %v4604_v33 = vadd.f32 %v6915_v22, %v4508_v16  ;;  %v7045_v16 = vld [vmem:[%s6457_s18 + $0xd0] sm:$0xff] }
 0x360   : > { %v3470_v43 = vpop.f32.mrf.mxu2 }
 0x361   : > { %v4636_v3 = vmax.f32 %v4604_v33, 0.0  ;;  %v4104_v44 = vpop.f32.mrf.mxu3 }
 0x362   : > { %v3039_v1 = vpop.f32.mrf.mxu1  ;;  %v6176_v44 = vld [vmem:[%s6457_s18 + $0xc4] sm:$0xff] }
 0x363   : > { %v5985_v47 = vpack.c.bf16 %v4636_v3, %v4635_v49  ;;  %v3123_v34 = vadd.f32 %v3039_v1, %v6779_v60  ;;  %v3950_v49 = vshrl.u32 %v5920_v40, 16  ;;  %v3954_v3 = vshll.u32 %v7045_v16, 16 }
 0x364   : > { %v4426_v50 = vpop.f32.mrf.mxu0 }
 0x365   : > { %6040 = vst [vmem:[%s6929_s30 + $0x38] sm:$0xff] %v5985_v47   ;;  %3078 = vmatmul.bf16.gmra.mxu1 %v2891_v4  ;;  %3512 = vmatmul.bf16.gmra.mxu2 %v5887_v31  ;;  %v2894_v31 = vrot.slane %v6176_v44, 1  ;;  %v3952_v4 = vor.u32 %v3950_v49, %v3948_v55  ;;  %v3956_v47 = vrot.slane %v3954_v3, 1 }
 0x366   : > { %4146 = vmatmul.bf16.gmra.mxu3 %v3941_v45 }
 0x367   : > { %4465 = vmatmul.bf16.gmra.mxu0 %v4278_v51  ;;  %v3629_v51 = vld [vmem:[%s6457_s18 + $0xd8] sm:$0x1] }
 0x368   : > { %v3473_v59 = vpop.f32.mrf.mxu2  ;;  %v3744_v28 = vunpack.c.l.b16 %v3629_v51 }
 0x369   : > { %v3557_v14 = vadd.f32 %v3473_v59, %v3123_v34  ;;  %v4107_v32 = vpop.f32.mrf.mxu3 }
 0x36a   : > { %v3041_v57 = vpop.f32.mrf.mxu1  ;;  %v3769_v62 = vpack.c.b16 %v3744_v28, %v3744_v28 }
 0x36b   : > { %v4191_v61 = vadd.f32 %v4107_v32, %v3557_v14  ;;  %v3124_v37 = vadd.f32 %v3041_v57, %v6786_v18  ;;  %v5889_v14 = vld [vmem:[%s6457_s18 + $0xc8] sm:$0xff]  ;;  %v2895_v57 = vsel %vm1461_vm1, %v2892_v6, %v2894_v31 }
 0x36c   : > { %v4428_v52 = vpop.f32.mrf.mxu0 }
 0x36d   : > { %v4510_v5 = vadd.f32 %v4426_v50, %v4191_v61  ;;  %v4281_v50 = vrot.slane %v7045_v16, 1 }
 0x36f   : > { %v4605_v18 = vadd.f32 %v6915_v22, %v4510_v5  ;;  %v4282_v21 = vsel %vm1461_vm1, %v4279_v30, %v4281_v50  ;;  %v3962_v30 = vshll.u32 %v3769_v62, 16 }
 0x370   : > { %v3475_v56 = vpop.f32.mrf.mxu2 }
 0x371   : > { %v3558_v60 = vadd.f32 %v3475_v56, %v3124_v37  ;;  %v4109_v8 = vpop.f32.mrf.mxu3  ;;  %v4637_v7 = vmax.f32 %v4605_v18, 0.0 }
 0x372   : > { %v3044_v17 = vpop.f32.mrf.mxu1 }
 0x373   : > { %v4192_v35 = vadd.f32 %v4109_v8, %v3558_v60  ;;  %v3958_v8 = vshrl.u32 %v7045_v16, 16 }
 0x374   : > { %v4431_v2 = vpop.f32.mrf.mxu0 }
 0x375   : > { %v4511_v24 = vadd.f32 %v4428_v52, %v4192_v35  ;;  %3083 = vmatmul.bf16.gmra.mxu1 %v2893_v36  ;;  %3517 = vmatmul.bf16.gmra.mxu2 %v5888_v20  ;;  %v3957_v52 = vsel %vm994_vm0, %v3952_v4, %v3956_v47  ;;  %v2896_v36 = vrot.slane %v6800_v26, 1  ;;  %v3960_v35 = vor.u32 %v3958_v8, %v3956_v47 }
 0x376   : > { %4151 = vmatmul.bf16.gmra.mxu3 %v3949_v54  ;;  %v3964_v2 = vrot.slane %v3962_v30, 1  ;;  %v4283_v54 = vrot.slane %v3769_v62, 1 }
 0x377   : > { %4470 = vmatmul.bf16.gmra.mxu0 %v4280_v27  ;;  %v4606_v10 = vadd.f32 %v6915_v22, %v4511_v24  ;;  %v2897_v16 = vsel %vm1461_vm1, %v2894_v31, %v2896_v36 }
 0x378   : > { %v3478_v0 = vpop.f32.mrf.mxu2  ;;  %v4284_v26 = vsel %vm1461_vm1, %v4281_v50, %v4283_v54 }
 0x379   : > { %v4638_v33 = vmax.f32 %v4606_v10, 0.0  ;;  %v4112_v12 = vpop.f32.mrf.mxu3  ;;  %v5890_v0 = vld [vmem:[%s6457_s18 + $0xd0] sm:$0xff] }
 0x37a   : > { %v3046_v25 = vpop.f32.mrf.mxu1 }
 0x37b   : > { %v5990_v15 = vpack.c.bf16 %v4638_v33, %v4637_v7  ;;  %v3126_v1 = vadd.f32 %v3046_v25, %v6797_v41  ;;  %v3965_v25 = vsel %vm994_vm0, %v3960_v35, %v3964_v2 }
 0x37c   : > { %v4433_v43 = vpop.f32.mrf.mxu0 }
 0x37d   : > { %6041 = vst [vmem:[%s6929_s30 + $0x40] sm:$0xff] %v5990_v15  }
 0x380   : > { %v3480_v45 = vpop.f32.mrf.mxu2 }
 0x381   : > { %v3560_v34 = vadd.f32 %v3480_v45, %v3126_v1  ;;  %v4114_v59 = vpop.f32.mrf.mxu3 }
 0x382   : > { %v3049_v32 = vpop.f32.mrf.mxu1 }
 0x383   : > { %v4194_v61 = vadd.f32 %v4114_v59, %v3560_v34  ;;  %v3127_v41 = vadd.f32 %v3049_v32, %v6803_v48 }
 0x384   : > { %v4436_v40 = vpop.f32.mrf.mxu0 }
 0x385   : > { %3088 = vmatmul.bf16.gmra.mxu1 %v2895_v57  ;;  %3522 = vmatmul.bf16.gmra.mxu2 %v5889_v14  ;;  %v4513_v58 = vadd.f32 %v4433_v43, %v4194_v61 }
 0x386   : > { %4156 = vmatmul.bf16.gmra.mxu3 %v3957_v52 }
 0x387   : > { %4475 = vmatmul.bf16.gmra.mxu0 %v4282_v21  ;;  %v4607_v20 = vadd.f32 %v6915_v22, %v4513_v58 }
 0x388   : > { %v3483_v37 = vpop.f32.mrf.mxu2 }
 0x389   : > { %v3561_v55 = vadd.f32 %v3483_v37, %v3127_v41  ;;  %v4117_v56 = vpop.f32.mrf.mxu3  ;;  %v4639_v18 = vmax.f32 %v4607_v20, 0.0 }
 0x38a   : > { %v3051_v5 = vpop.f32.mrf.mxu1 }
 0x38b   : > { %v4195_v6 = vadd.f32 %v4117_v56, %v3561_v55 }
 0x38c   : > { %v4438_v60 = vpop.f32.mrf.mxu0 }
 0x38d   : > { %v4514_v17 = vadd.f32 %v4436_v40, %v4195_v6 }
 0x38f   : > { %v4608_v48 = vadd.f32 %v6915_v22, %v4514_v17 }
 0x390   : > { %v3485_v27 = vpop.f32.mrf.mxu2 }
 0x391   : > { %v4640_v24 = vmax.f32 %v4608_v48, 0.0  ;;  %v4119_v10 = vpop.f32.mrf.mxu3 }
 0x392   : > { %v3054_v7 = vpop.f32.mrf.mxu1 }
 0x393   : > { %v5995_v33 = vpack.c.bf16 %v4640_v24, %v4639_v18  ;;  %v3129_v15 = vadd.f32 %v3054_v7, %v6816_v53 }
 0x394   : > { %v4441_v12 = vpop.f32.mrf.mxu0 }
 0x395   : > { %6042 = vst [vmem:[%s6929_s30 + $0x48] sm:$0xff] %v5995_v33   ;;  %3093 = vmatmul.bf16.gmra.mxu1 %v2897_v16  ;;  %3527 = vmatmul.bf16.gmra.mxu2 %v5890_v0 }
 0x396   : > { %4161 = vmatmul.bf16.gmra.mxu3 %v3965_v25 }
 0x397   : > { %4480 = vmatmul.bf16.gmra.mxu0 %v4284_v26 }
 0x398   : > { %v3488_v43 = vpop.f32.mrf.mxu2 }
 0x399   : > { %v3563_v49 = vadd.f32 %v3488_v43, %v3129_v15  ;;  %v4122_v3 = vpop.f32.mrf.mxu3 }
 0x39a   : > { %v3056_v44 = vpop.f32.mrf.mxu1 }
 0x39b   : > { %v4197_v4 = vadd.f32 %v4122_v3, %v3563_v49  ;;  %v3130_v31 = vadd.f32 %v3056_v44, %v6824_v38 }
 0x39c   : > { %v4443_v1 = vpop.f32.mrf.mxu0 }
 0x39d   : > { %v4516_v45 = vadd.f32 %v4441_v12, %v4197_v4 }
 0x39f   : > { %v4609_v32 = vadd.f32 %v6915_v22, %v4516_v45 }
 0x3a0   : > { %v3490_v47 = vpop.f32.mrf.mxu2 }
 0x3a1   : > { %v3564_v51 = vadd.f32 %v3490_v47, %v3130_v31  ;;  %v4124_v50 = vpop.f32.mrf.mxu3  ;;  %v4641_v52 = vmax.f32 %v4609_v32, 0.0 }
 0x3a2   : > { %v3059_v34 = vpop.f32.mrf.mxu1 }
 0x3a3   : > { %v4198_v59 = vadd.f32 %v4124_v50, %v3564_v51 }
 0x3a4   : > { %v4446_v14 = vpop.f32.mrf.mxu0 }
 0x3a5   : > { %v4517_v57 = vadd.f32 %v4443_v1, %v4198_v59 }
 0x3a7   : > { %v4610_v53 = vadd.f32 %v6915_v22, %v4517_v57 }
 0x3a8   : > { %v3493_v40 = vpop.f32.mrf.mxu2 }
 0x3a9   : > { %v4642_v21 = vmax.f32 %v4610_v53, 0.0  ;;  %v4127_v28 = vpop.f32.mrf.mxu3 }
 0x3aa   : > { %v3061_v61 = vpop.f32.mrf.mxu1 }
 0x3ab   : > { %v6000_v41 = vpack.c.bf16 %v4642_v21, %v4641_v52  ;;  %v3132_v62 = vadd.f32 %v3061_v61, %v6833_v9  ;;  %v7077_v9 = vld [vmem:[%s7143_s2] ss:$0 sm:$0xff] }
 0x3ac   : > { %v4448_v38 = vpop.f32.mrf.mxu0 }
 0x3ad   : > { %6043 = vst [vmem:[%s6929_s30 + $0x50] sm:$0xff] %v6000_v41  }
 0x3b0   : > { %v3495_v37 = vpop.f32.mrf.mxu2 }
 0x3b1   : > { %v3566_v58 = vadd.f32 %v3495_v37, %v3132_v62  ;;  %v4129_v55 = vpop.f32.mrf.mxu3 }
 0x3b2   : > { %v3064_v56 = vpop.f32.mrf.mxu1 }
 0x3b3   : > { %v4200_v6 = vadd.f32 %v4129_v55, %v3566_v58  ;;  %v3133_v60 = vadd.f32 %v3064_v56, %v6837_v63 }
 0x3b4   : > { %v4451_v5 = vpop.f32.mrf.mxu0 }
 0x3b5   : > { %v4519_v22 = vadd.f32 %v4448_v38, %v4200_v6 }
 0x3b7   : > { %v4611_v35 = vadd.f32 %v7077_v9, %v4519_v22 }
 0x3b8   : > { %v3498_v8 = vpop.f32.mrf.mxu2 }
 0x3b9   : > { %v3567_v30 = vadd.f32 %v3498_v8, %v3133_v60  ;;  %v4132_v20 = vpop.f32.mrf.mxu3  ;;  %v4643_v63 = vmax.f32 %v4611_v35, 0.0 }
 0x3ba   : > { %v3066_v17 = vpop.f32.mrf.mxu1 }
 0x3bb   : > { %v4201_v36 = vadd.f32 %v4132_v20, %v3567_v30 }
 0x3bc   : > { %v4453_v48 = vpop.f32.mrf.mxu0 }
 0x3bd   : > { %v4520_v2 = vadd.f32 %v4451_v5, %v4201_v36 }
 0x3bf   : > { %v4612_v54 = vadd.f32 %v7077_v9, %v4520_v2 }
 0x3c0   : > { %v3500_v27 = vpop.f32.mrf.mxu2 }
 0x3c1   : > { %v4644_v18 = vmax.f32 %v4612_v54, 0.0  ;;  %v4134_v24 = vpop.f32.mrf.mxu3 }
 0x3c2   : > { %v3069_v10 = vpop.f32.mrf.mxu1 }
 0x3c3   : > { %v6005_v0 = vpack.c.bf16 %v4644_v18, %v4643_v63  ;;  %v3135_v16 = vadd.f32 %v3069_v10, %v6846_v46 }
 0x3c4   : > { %v4456_v7 = vpop.f32.mrf.mxu0 }
 0x3c5   : > { %6044 = vst [vmem:[%s6929_s30 + $0x58] sm:$0xff] %v6005_v0  }
 0x3c8   : > { %v3503_v33 = vpop.f32.mrf.mxu2 }
 0x3c9   : > { %v3569_v12 = vadd.f32 %v3503_v33, %v3135_v16  ;;  %v4137_v25 = vpop.f32.mrf.mxu3 }
 0x3ca   : > { %v3071_v26 = vpop.f32.mrf.mxu1 }
 0x3cb   : > { %v4203_v43 = vadd.f32 %v4137_v25, %v3569_v12  ;;  %v3136_v49 = vadd.f32 %v3071_v26, %v6854_v19 }
 0x3cc   : > { %v4458_v15 = vpop.f32.mrf.mxu0 }
 0x3cd   : > { %v4522_v44 = vadd.f32 %v4456_v7, %v4203_v43 }
 0x3cf   : > { %v4613_v51 = vadd.f32 %v7077_v9, %v4522_v44 }
 0x3d0   : > { %v3505_v3 = vpop.f32.mrf.mxu2 }
 0x3d1   : > { %v3570_v1 = vadd.f32 %v3505_v3, %v3136_v49  ;;  %v4139_v4 = vpop.f32.mrf.mxu3  ;;  %v4645_v59 = vmax.f32 %v4613_v51, 0.0 }
 0x3d2   : > { %v3074_v31 = vpop.f32.mrf.mxu1 }
 0x3d3   : > { %v4204_v47 = vadd.f32 %v4139_v4, %v3570_v1 }
 0x3d4   : > { %v4461_v45 = vpop.f32.mrf.mxu0 }
 0x3d5   : > { %v4523_v50 = vadd.f32 %v4458_v15, %v4204_v47 }
 0x3d7   : > { %v4614_v46 = vadd.f32 %v7077_v9, %v4523_v50 }
 0x3d8   : > { %v3508_v34 = vpop.f32.mrf.mxu2 }
 0x3d9   : > { %v4646_v14 = vmax.f32 %v4614_v46, 0.0  ;;  %v4142_v32 = vpop.f32.mrf.mxu3 }
 0x3da   : > { %v3076_v57 = vpop.f32.mrf.mxu1 }
 0x3db   : > { %v6010_v53 = vpack.c.bf16 %v4646_v14, %v4645_v59  ;;  %v3138_v40 = vadd.f32 %v3076_v57, %v6863_v42 }
 0x3dc   : > { %v4463_v19 = vpop.f32.mrf.mxu0 }
 0x3dd   : > { %6045 = vst [vmem:[%s6929_s30 + $0x60] sm:$0xff] %v6010_v53  }
 0x3e0   : > { %v3510_v52 = vpop.f32.mrf.mxu2 }
 0x3e1   : > { %v3572_v21 = vadd.f32 %v3510_v52, %v3138_v40  ;;  %v4144_v28 = vpop.f32.mrf.mxu3 }
 0x3e2   : > { %v3079_v61 = vpop.f32.mrf.mxu1 }
 0x3e3   : > { %v4206_v38 = vadd.f32 %v4144_v28, %v3572_v21  ;;  %v3139_v62 = vadd.f32 %v3079_v61, %v6867_v13 }
 0x3e4   : > { %v4466_v41 = vpop.f32.mrf.mxu0 }
 0x3e5   : > { %v4525_v58 = vadd.f32 %v4463_v19, %v4206_v38 }
 0x3e7   : > { %v4615_v8 = vadd.f32 %v7077_v9, %v4525_v58 }
 0x3e8   : > { %v3513_v37 = vpop.f32.mrf.mxu2 }
 0x3e9   : > { %v3573_v55 = vadd.f32 %v3513_v37, %v3139_v62  ;;  %v4147_v56 = vpop.f32.mrf.mxu3  ;;  %v4647_v20 = vmax.f32 %v4615_v8, 0.0 }
 0x3ea   : > { %v3081_v5 = vpop.f32.mrf.mxu1 }
 0x3eb   : > { %v4207_v6 = vadd.f32 %v4147_v56, %v3573_v55 }
 0x3ec   : > { %v4468_v60 = vpop.f32.mrf.mxu0 }
 0x3ed   : > { %v4526_v22 = vadd.f32 %v4466_v41, %v4207_v6 }
 0x3ef   : > { %v4616_v42 = vadd.f32 %v7077_v9, %v4526_v22 }
 0x3f0   : > { %v3515_v30 = vpop.f32.mrf.mxu2 }
 0x3f1   : > { %v4648_v17 = vmax.f32 %v4616_v42, 0.0  ;;  %v4149_v36 = vpop.f32.mrf.mxu3 }
 0x3f2   : > { %v3084_v48 = vpop.f32.mrf.mxu1 }
 0x3f3   : > { %v6015_v35 = vpack.c.bf16 %v4648_v17, %v4647_v20  ;;  %v3141_v2 = vadd.f32 %v3084_v48, %v6876_v29 }
 0x3f4   : > { %v4471_v13 = vpop.f32.mrf.mxu0 }
 0x3f5   : > { %6046 = vst [vmem:[%s6929_s30 + $0x68] sm:$0xff] %v6015_v35  }
 0x3f8   : > { %v3518_v54 = vpop.f32.mrf.mxu2 }
 0x3f9   : > { %v3575_v27 = vadd.f32 %v3518_v54, %v3141_v2  ;;  %v4152_v63 = vpop.f32.mrf.mxu3 }
 0x3fa   : > { %v3086_v18 = vpop.f32.mrf.mxu1 }
 0x3fb   : > { %v4209_v10 = vadd.f32 %v4152_v63, %v3575_v27  ;;  %v3142_v0 = vadd.f32 %v3086_v18, %v6884_v39 }
 0x3fc   : > { %v4473_v24 = vpop.f32.mrf.mxu0 }
 0x3fd   : > { %v4528_v16 = vadd.f32 %v4471_v13, %v4209_v10 }
 0x3ff   : > { %v4617_v43 = vadd.f32 %v7077_v9, %v4528_v16 }
 0x400   : > { %v3520_v7 = vpop.f32.mrf.mxu2 }
 0x401   : > { %v3576_v33 = vadd.f32 %v3520_v7, %v3142_v0  ;;  %v4154_v12 = vpop.f32.mrf.mxu3  ;;  %v4649_v44 = vmax.f32 %v4617_v43, 0.0 }
 0x402   : > { %v3089_v25 = vpop.f32.mrf.mxu1 }
 0x403   : > { %v4210_v26 = vadd.f32 %v4154_v12, %v3576_v33 }
 0x404   : > { %v4476_v15 = vpop.f32.mrf.mxu0 }
 0x405   : > { %v4529_v49 = vadd.f32 %v4473_v24, %v4210_v26 }
 0x407   : > { %v4618_v29 = vadd.f32 %v7077_v9, %v4529_v49 }
 0x408   : > { %v3523_v3 = vpop.f32.mrf.mxu2 }
 0x409   : > { %v4650_v1 = vmax.f32 %v4618_v29, 0.0  ;;  %v4157_v4 = vpop.f32.mrf.mxu3 }
 0x40a   : > { %v3091_v31 = vpop.f32.mrf.mxu1 }
 0x40b   : > { %v6020_v39 = vpack.c.bf16 %v4650_v1, %v4649_v44  ;;  %v3144_v45 = vadd.f32 %v3091_v31, %v6893_v11 }
 0x40c   : > { %v4478_v47 = vpop.f32.mrf.mxu0 }
 0x40d   : > { %6047 = vst [vmem:[%s6929_s30 + $0x70] sm:$0xff] %v6020_v39  }
 0x410   : > { %v3525_v51 = vpop.f32.mrf.mxu2 }
 0x411   : > { %v3578_v50 = vadd.f32 %v3525_v51, %v3144_v45  ;;  %v4159_v46 = vpop.f32.mrf.mxu3 }
 0x412   : > { %v3094_v34 = vpop.f32.mrf.mxu1 }
 0x413   : > { %v4212_v14 = vadd.f32 %v4159_v46, %v3578_v50  ;;  %v3145_v32 = vadd.f32 %v3094_v34, %v6897_v23 }
 0x414   : > { %v4481_v59 = vpop.f32.mrf.mxu0 }
 0x415   : > { %v4531_v53 = vadd.f32 %v4478_v47, %v4212_v14 }
 0x417   : > { %v4619_v11 = vadd.f32 %v7077_v9, %v4531_v53 }
 0x418   : > { %v3528_v57 = vpop.f32.mrf.mxu2 }
 0x419   : > { %v3579_v19 = vadd.f32 %v3528_v57, %v3145_v32  ;;  %v4162_v40 = vpop.f32.mrf.mxu3  ;;  %v4651_v38 = vmax.f32 %v4619_v11, 0.0 }
 0x41a   : > { %v3096_v52 = vpop.f32.mrf.mxu1 }
 0x41b   : > { %v4213_v21 = vadd.f32 %v4162_v40, %v3579_v19 }
 0x41c   : > { %v4483_v28 = vpop.f32.mrf.mxu0 }
 0x41d   : > { %v4532_v61 = vadd.f32 %v4481_v59, %v4213_v21 }
 0x41f   : > { %v4620_v41 = vadd.f32 %v7077_v9, %v4532_v61 }
 0x420   : > { %v3530_v23 = vpop.f32.mrf.mxu2 }
 0x421   : > { %v4652_v62 = vmax.f32 %v4620_v41, 0.0  ;;  %v4164_v37 = vpop.f32.mrf.mxu3 }
 0x423   : > { %v6025_v58 = vpack.c.bf16 %v4652_v62, %v4651_v38 }
 0x425   : > { %6048 = vst [vmem:[%s6929_s30 + $0x78] sm:$0xff] %v6025_v58  }
 0x426   : > { %6268 = shalt.err (!%p6265_p0)
}
 0x427   : > { %s6332_s6 = smov 64   ;;  %s6333_s30 = smov 4  }
 0x428   : > { %6082 = dma.vmem_to_hbm [thread:$0]  (%p6432_p5), %s4735_s28, 2048, %s4737_s21, %s4718_s15, %s6332_s6, %s6332_s6, %s6333_s30  }
 0x429 PF: > { %s4751_s4 = sand.u32 1, %s6307_s12   ;;  %p6093_p3 = pnand %p4863_p11, %p6403_p6 }
 0x42a   : > { %s4752_s9 = scalar_lea.sflag [#allocation5], %s4751_s4 }
 0x42b   : > { %p6094_p7 = pneg %p6093_p3 }
 0x42d   : > { %6302 = dma.done.wait (%p6094_p7), %s4752_s9, 2048  }
 0x42e   : > { %6304 = vsyncadd (%p6094_p7), %s4752_s9, 4294965248  ;;  %s20_s17 = sadd.s32 1, %s6327_s17   ;;  %s7151_s12 = smov %s6311_s13 }
 0x42f   : > { %p17_p9 = scmp.ge.s32.totalorder %s20_s17, 4   ;;  %s7152_s13 = smov %s6315_s14 }
 0x430   : > { %s7153_s14 = smov %s6441_s11  ;;  %s7154_s15 = smov %s6323_s16 }
 0x431   : > { %s7155_s16 = smov %s7157_s5  ;;  %19 = sbr.rel (!%p17_p9) target bundleno = 7 (0x7), region = 101 }
 0x436   :  { %4758 = vsyncpa [#allocation4], 1 }
 0x437   :  { %4760 = vsyncpa [#allocation4 + $0x1], 1 }
 0x438   :  { %4761 = vsyncpa [#allocation7], 1 }
 0x439   :  { %4762 = vsyncpa [#allocation5], 1 }
 0x43a   :  { %4764 = vsyncpa [#allocation5 + $0x1], 1 }

</bundles_post_ra>
